<compile_context>
chip_gen: v7x
topology: tpu7x:2x2x1
jax: 0.10.0
libtpu: 0.0.40
codegen_flags: <defaults>
</compile_context>

<pallas_src>
import jax
import jax.numpy as jnp
import numpy as np
from jax import lax
from jax.experimental import pallas as pl
from jax.experimental.pallas import tpu as pltpu

GN_GROUPS = 32
GN_EPS = 1e-5


def _group_norm_relu(x, gamma, beta, num_groups):
    """Two-pass GroupNorm + ReLU on an (M, C) activation (M = H*W pixels).

    x: (M, C) float32; gamma/beta: (1, C) float32.
    """
    M, C = x.shape
    gs = C // num_groups
    inv_n = 1.0 / float(M * gs)

    def group_sum(row):  # (1, C) per-channel sums -> per-group sums, back to (1, C)
        if gs == 1:
            return row
        # general grouped path (not traced for the demo shapes where gs == 1)
        g = jnp.sum(row.reshape(num_groups, gs), axis=1, keepdims=True)
        return jnp.broadcast_to(g, (num_groups, gs)).reshape(1, C)

    mean = group_sum(jnp.sum(x, axis=0, keepdims=True)) * inv_n
    d = x - mean
    var = group_sum(jnp.sum(d * d, axis=0, keepdims=True)) * inv_n
    xn = d * lax.rsqrt(var + GN_EPS)
    return jnp.maximum(xn * gamma + beta, 0.0)


def conv_block_kernel(p1_ref, w1_ref, b1_ref, g1_ref, be1_ref,
                      w2_ref, b2_ref, g2_ref, be2_ref,
                      o_ref, pad2_ref):
    # Shapes (static): p1_ref (1, H*W, 9*Cin) bf16; w1_ref (9*Cin, Cout) bf16;
    # w2_ref (9*Cout, Cout) bf16; pad2_ref (H+2, W+2, Cout) bf16 scratch;
    # o_ref (1, H*W, Cout) f32.  Bias / GN affine params are (1, Cout) f32.
    Cout = w2_ref.shape[1]
    H = pad2_ref.shape[0] - 2
    W = pad2_ref.shape[1] - 2
    gs = Cout // GN_GROUPS
    f32 = jnp.float32
    bf16 = jnp.bfloat16

    # ---------------- stage 1: conv1 as ONE im2col matmul ----------------
    acc1 = jnp.dot(p1_ref[0], w1_ref[...], preferred_element_type=f32)  # (H*W, Cout)
    if gs > 1:
        # With gs == 1 the per-channel bias cancels exactly in GroupNorm; only
        # add it when it actually affects the result (general Cout > 32 case).
        acc1 = acc1 + b1_ref[...]
    h = _group_norm_relu(acc1, g1_ref[...], be1_ref[...], GN_GROUPS)     # (H*W, Cout) f32

    # ---------------- stage 2: pad (halo only, bf16), 9 accumulated dots --
    # Only the 1-pixel halo is zeroed each step; the interior is fully
    # overwritten every grid step, so no stale data can leak between
    # images / TensorCores.
    zr = jnp.zeros((1, W + 2, Cout), bf16)
    zc = jnp.zeros((H, 1, Cout), bf16)
    pad2_ref[0:1, :, :] = zr
    pad2_ref[H + 1:H + 2, :, :] = zr
    pad2_ref[1:H + 1, 0:1, :] = zc
    pad2_ref[1:H + 1, W + 1:W + 2, :] = zc
    pad2_ref[1:H + 1, 1:W + 1, :] = h.astype(bf16).reshape(H, W, Cout)

    # conv2: accumulate the 9 taps directly into registers — no im2col scratch.
    acc2 = jnp.zeros((H * W, Cout), f32)
    for kh in range(3):
        for kw in range(3):
            t = kh * 3 + kw
            lhs = pad2_ref[kh:kh + H, kw:kw + W, :].reshape(H * W, Cout)   # bf16
            acc2 = acc2 + jnp.dot(lhs, w2_ref[t * Cout:(t + 1) * Cout, :],
                                  preferred_element_type=f32)
    if gs > 1:
        acc2 = acc2 + b2_ref[...]
    y = _group_norm_relu(acc2, g2_ref[...], be2_ref[...], GN_GROUPS)

    # Store in the natural matmul layout; HBM block is contiguous NHWC memory.
    o_ref[0] = y.astype(o_ref.dtype)


@jax.jit
def conv_block_forward(x_nchw, w1, b1, g1, be1, w2, b2, g2, be2):
    """x_nchw: (N, Cin, H, W); conv weights in PyTorch OIHW layout."""
    N, Cin, H, W = x_nchw.shape
    Cout = w1.shape[0]

    # NCHW -> NHWC, cast to bf16, build the stage-1 im2col in XLA (fuses with
    # the transpose/pad; ~18 KB/image of extra HBM traffic at Cin=4).
    x = jnp.transpose(x_nchw, (0, 2, 3, 1)).astype(jnp.bfloat16)
    xpad = jnp.pad(x, ((0, 0), (1, 1), (1, 1), (0, 0)))
    taps = [xpad[:, kh:kh + H, kw:kw + W, :]
            for kh in range(3) for kw in range(3)]
    p1 = jnp.concatenate(taps, axis=-1).reshape(N, H * W, 9 * Cin)

    # Conv weights flattened to matmul form; tap ordering matches p1 / pad2 taps.
    w1m = jnp.transpose(w1, (2, 3, 1, 0)).reshape(9 * Cin, Cout).astype(jnp.bfloat16)
    w2m = jnp.transpose(w2, (2, 3, 1, 0)).reshape(9 * Cout, Cout).astype(jnp.bfloat16)

    def row(v):  # (C,) -> (1, C) f32 for clean in-kernel broadcasting
        return v.reshape(1, -1).astype(jnp.float32)

    out_flat = pl.pallas_call(
        conv_block_kernel,
        out_shape=jax.ShapeDtypeStruct((N, H * W, Cout), jnp.float32),
        grid_spec=pltpu.PrefetchScalarGridSpec(
            num_scalar_prefetch=0,
            grid=(N,),
            in_specs=[
                pl.BlockSpec((1, H * W, 9 * Cin), lambda n: (n, 0, 0)),
                pl.BlockSpec((9 * Cin, Cout), lambda n: (0, 0)),
                pl.BlockSpec((1, Cout), lambda n: (0, 0)),
                pl.BlockSpec((1, Cout), lambda n: (0, 0)),
                pl.BlockSpec((1, Cout), lambda n: (0, 0)),
                pl.BlockSpec((9 * Cout, Cout), lambda n: (0, 0)),
                pl.BlockSpec((1, Cout), lambda n: (0, 0)),
                pl.BlockSpec((1, Cout), lambda n: (0, 0)),
                pl.BlockSpec((1, Cout), lambda n: (0, 0)),
            ],
            out_specs=pl.BlockSpec((1, H * W, Cout), lambda n: (n, 0, 0)),
            scratch_shapes=[
                # bf16 padded stage-2 activation (only VMEM scratch, ~21 KB here)
                pltpu.VMEM((H + 2, W + 2, Cout), jnp.bfloat16),
            ],
        ),
        compiler_params=pltpu.CompilerParams(
            dimension_semantics=("parallel",)),
    )(p1, w1m, row(b1), row(g1), row(be1), w2m, row(b2), row(g2), row(be2))

    # (N, H*W, Cout) is the same contiguous buffer as NHWC; reshape is free.
    # The module contract is NCHW, so pay one transpose pass (drop it if the
    # consumer accepts channels-last).
    out_nhwc = out_flat.reshape(N, H, W, Cout)
    return jnp.transpose(out_nhwc, (0, 3, 1, 2))


# ---------------- pure-JAX f32 reference (for correctness check) ----------------
def _ref_stage(x_nchw, w, b, gamma, beta):
    y = lax.conv_general_dilated(
        x_nchw, w, window_strides=(1, 1), padding="SAME",
        dimension_numbers=("NCHW", "OIHW", "NCHW"))
    y = y + b[None, :, None, None]
    N, C, H, W = y.shape
    yg = y.reshape(N, GN_GROUPS, C // GN_GROUPS, H, W)
    mean = jnp.mean(yg, axis=(2, 3, 4), keepdims=True)
    var = jnp.mean((yg - mean) ** 2, axis=(2, 3, 4), keepdims=True)
    yn = ((yg - mean) / jnp.sqrt(var + GN_EPS)).reshape(N, C, H, W)
    yn = yn * gamma[None, :, None, None] + beta[None, :, None, None]
    return jnp.maximum(yn, 0.0)


def conv_block_reference(x, w1, b1, g1, be1, w2, b2, g2, be2):
    h = _ref_stage(x, w1, b1, g1, be1)
    return _ref_stage(h, w2, b2, g2, be2)


if __name__ == "__main__":
    # small shapes; ch_out must be a multiple of 32 for GroupNorm(32, ch_out)
    N, CH_IN, CH_OUT, H, W = 2, 4, 32, 16, 16

    key = jax.random.PRNGKey(0)
    k_x, k_w1, k_b1, k_w2, k_b2, k_g1, k_be1, k_g2, k_be2 = jax.random.split(key, 9)

    x = jax.random.normal(k_x, (N, CH_IN, H, W), jnp.float32)

    # Conv weights/bias: deterministic random (module __init__ shapes, OIHW).
    w1 = 0.1 * jax.random.normal(k_w1, (CH_OUT, CH_IN, 3, 3), jnp.float32)
    b1 = 0.1 * jax.random.normal(k_b1, (CH_OUT,), jnp.float32)
    w2 = 0.1 * jax.random.normal(k_w2, (CH_OUT, CH_OUT, 3, 3), jnp.float32)
    b2 = 0.1 * jax.random.normal(k_b2, (CH_OUT,), jnp.float32)
    # GroupNorm affine params: perturbed away from the (1, 0) default so the
    # affine path is actually exercised.  Note: with groups == channels the
    # conv bias cancels in the normalization, so this test (like the module at
    # ch_out=32) cannot distinguish a dropped bias — documented contract.
    g1 = 1.0 + 0.1 * jax.random.normal(k_g1, (CH_OUT,), jnp.float32)
    be1 = 0.1 * jax.random.normal(k_be1, (CH_OUT,), jnp.float32)
    g2 = 1.0 + 0.1 * jax.random.normal(k_g2, (CH_OUT,), jnp.float32)
    be2 = 0.1 * jax.random.normal(k_be2, (CH_OUT,), jnp.float32)

    out = conv_block_forward(x, w1, b1, g1, be1, w2, b2, g2, be2)
    out = jax.block_until_ready(out)

    ref = conv_block_reference(x, w1, b1, g1, be1, w2, b2, g2, be2)
    # Kernel runs the convs with bf16 MXU inputs (f32 accumulation); reference
    # is full f32, so allow bf16-level tolerance.
    np.testing.assert_allclose(np.asarray(out), np.asarray(ref),
                               rtol=5e-2, atol=5e-2)
    print("KERNEL_OK")
</pallas_src>

<mosaic_0001>
module attributes {stable_mosaic.version = 11 : i64} {
  func.func @conv_block_kernel(%arg0: i32, %arg1: memref<1x256x36xbf16, #tpu.memory_space<vmem>>, %arg2: memref<36x32xbf16, #tpu.memory_space<vmem>>, %arg3: memref<1x32xf32, #tpu.memory_space<vmem>>, %arg4: memref<1x32xf32, #tpu.memory_space<vmem>>, %arg5: memref<1x32xf32, #tpu.memory_space<vmem>>, %arg6: memref<288x32xbf16, #tpu.memory_space<vmem>>, %arg7: memref<1x32xf32, #tpu.memory_space<vmem>>, %arg8: memref<1x32xf32, #tpu.memory_space<vmem>>, %arg9: memref<1x32xf32, #tpu.memory_space<vmem>>, %arg10: memref<1x256x32xf32, #tpu.memory_space<vmem>>, %arg11: memref<18x18x32xbf16, #tpu.memory_space<vmem>>) attributes {dimension_semantics = [#tpu.dimension_semantics<parallel>], iteration_bounds = array<i64: 2>, scalar_prefetch = 0 : i64, scratch_operands = 1 : i64, tpu.core_type = #tpu.core_type<tc>, window_params = [{transform_indices = @transform_0, window_bounds = array<i64: 1, 256, 36>}, {pipeline_mode = #tpu.pipeline_mode<synchronous>, transform_indices = @transform_1, window_bounds = array<i64: 36, 32>}, {pipeline_mode = #tpu.pipeline_mode<synchronous>, transform_indices = @transform_2, window_bounds = array<i64: 1, 32>}, {pipeline_mode = #tpu.pipeline_mode<synchronous>, transform_indices = @transform_3, window_bounds = array<i64: 1, 32>}, {pipeline_mode = #tpu.pipeline_mode<synchronous>, transform_indices = @transform_4, window_bounds = array<i64: 1, 32>}, {pipeline_mode = #tpu.pipeline_mode<synchronous>, transform_indices = @transform_5, window_bounds = array<i64: 288, 32>}, {pipeline_mode = #tpu.pipeline_mode<synchronous>, transform_indices = @transform_6, window_bounds = array<i64: 1, 32>}, {pipeline_mode = #tpu.pipeline_mode<synchronous>, transform_indices = @transform_7, window_bounds = array<i64: 1, 32>}, {pipeline_mode = #tpu.pipeline_mode<synchronous>, transform_indices = @transform_8, window_bounds = array<i64: 1, 32>}, {transform_indices = @transform_9, window_bounds = array<i64: 1, 256, 32>}]} {
    %c0 = arith.constant 0 : index
    %c0_0 = arith.constant 0 : index
    %c0_1 = arith.constant 0 : index
    %0 = vector.load %arg1[%c0, %c0_0, %c0_1] : memref<1x256x36xbf16, #tpu.memory_space<vmem>>, vector<1x256x36xbf16>
    %1 = vector.shape_cast %0 : vector<1x256x36xbf16> to vector<256x36xbf16>
    %c0_2 = arith.constant 0 : index
    %c0_3 = arith.constant 0 : index
    %2 = vector.load %arg2[%c0_2, %c0_3] : memref<36x32xbf16, #tpu.memory_space<vmem>>, vector<36x32xbf16>
    %cst = arith.constant dense<0.000000e+00> : vector<256x32xf32>
    %3 = tpu.matmul %1, %2, %cst {dimension_numbers = #tpu.dot_dimension_numbers<[1], [0], [0], [1], [0, 0, 1, 1], [], []>} : vector<256x36xbf16>, vector<36x32xbf16>, vector<256x32xf32> -> vector<256x32xf32>
    %c0_4 = arith.constant 0 : index
    %c0_5 = arith.constant 0 : index
    %4 = vector.load %arg4[%c0_4, %c0_5] : memref<1x32xf32, #tpu.memory_space<vmem>>, vector<1x32xf32>
    %c0_6 = arith.constant 0 : index
    %c0_7 = arith.constant 0 : index
    %5 = vector.load %arg5[%c0_6, %c0_7] : memref<1x32xf32, #tpu.memory_space<vmem>>, vector<1x32xf32>
    %cst_8 = arith.constant dense<0.000000e+00> : vector<32xf32>
    %6 = vector.multi_reduction <add>, %3, %cst_8 [0] : vector<256x32xf32> to vector<32xf32>
    %7 = vector.shape_cast %6 : vector<32xf32> to vector<1x32xf32>
    %cst_9 = arith.constant 3.906250e-03 : f32
    %8 = vector.broadcast %cst_9 : f32 to vector<1x32xf32>
    %9 = arith.mulf %7, %8 : vector<1x32xf32>
    %10 = vector.broadcast %9 : vector<1x32xf32> to vector<256x32xf32>
    %11 = arith.subf %3, %10 : vector<256x32xf32>
    %12 = arith.mulf %11, %11 : vector<256x32xf32>
    %cst_10 = arith.constant dense<0.000000e+00> : vector<32xf32>
    %13 = vector.multi_reduction <add>, %12, %cst_10 [0] : vector<256x32xf32> to vector<32xf32>
    %14 = vector.shape_cast %13 : vector<32xf32> to vector<1x32xf32>
    %cst_11 = arith.constant 3.906250e-03 : f32
    %15 = vector.broadcast %cst_11 : f32 to vector<1x32xf32>
    %16 = arith.mulf %14, %15 : vector<1x32xf32>
    %cst_12 = arith.constant 9.99999974E-6 : f32
    %17 = vector.broadcast %cst_12 : f32 to vector<1x32xf32>
    %18 = arith.addf %16, %17 : vector<1x32xf32>
    %19 = math.rsqrt %18 : vector<1x32xf32>
    %20 = vector.broadcast %19 : vector<1x32xf32> to vector<256x32xf32>
    %21 = arith.mulf %11, %20 : vector<256x32xf32>
    %22 = vector.broadcast %4 : vector<1x32xf32> to vector<256x32xf32>
    %23 = arith.mulf %21, %22 : vector<256x32xf32>
    %24 = vector.broadcast %5 : vector<1x32xf32> to vector<256x32xf32>
    %25 = arith.addf %23, %24 : vector<256x32xf32>
    %cst_13 = arith.constant 0.000000e+00 : f32
    %26 = vector.broadcast %cst_13 : f32 to vector<256x32xf32>
    %27 = arith.maximumf %25, %26 : vector<256x32xf32>
    %cst_14 = arith.constant 0.000000e+00 : bf16
    %28 = vector.broadcast %cst_14 : bf16 to vector<1x18x32xbf16>
    %cst_15 = arith.constant 0.000000e+00 : bf16
    %29 = vector.broadcast %cst_15 : bf16 to vector<16x1x32xbf16>
    %c0_16 = arith.constant 0 : index
    %c0_17 = arith.constant 0 : index
    %c0_18 = arith.constant 0 : index
    %30 = vector.load %arg11[%c0_16, %c0_17, %c0_18] : memref<18x18x32xbf16, #tpu.memory_space<vmem>>, vector<1x18x32xbf16>
    tpu.vector_store %arg11[%c0_16, %c0_17, %c0_18], %28 {strides = array<i32>} : memref<18x18x32xbf16, #tpu.memory_space<vmem>>, vector<1x18x32xbf16>,
    %c17 = arith.constant 17 : index
    %c0_19 = arith.constant 0 : index
    %c0_20 = arith.constant 0 : index
    %31 = vector.load %arg11[%c17, %c0_19, %c0_20] : memref<18x18x32xbf16, #tpu.memory_space<vmem>>, vector<1x18x32xbf16>
    tpu.vector_store %arg11[%c17, %c0_19, %c0_20], %28 {strides = array<i32>} : memref<18x18x32xbf16, #tpu.memory_space<vmem>>, vector<1x18x32xbf16>,
    %c1 = arith.constant 1 : index
    %c0_21 = arith.constant 0 : index
    %c0_22 = arith.constant 0 : index
    %32 = vector.load %arg11[%c1, %c0_21, %c0_22] : memref<18x18x32xbf16, #tpu.memory_space<vmem>>, vector<16x1x32xbf16>
    tpu.vector_store %arg11[%c1, %c0_21, %c0_22], %29 {strides = array<i32>} : memref<18x18x32xbf16, #tpu.memory_space<vmem>>, vector<16x1x32xbf16>,
    %c1_23 = arith.constant 1 : index
    %c17_24 = arith.constant 17 : index
    %c0_25 = arith.constant 0 : index
    %33 = vector.load %arg11[%c1_23, %c17_24, %c0_25] : memref<18x18x32xbf16, #tpu.memory_space<vmem>>, vector<16x1x32xbf16>
    tpu.vector_store %arg11[%c1_23, %c17_24, %c0_25], %29 {strides = array<i32>} : memref<18x18x32xbf16, #tpu.memory_space<vmem>>, vector<16x1x32xbf16>,
    %34 = arith.truncf %27 : vector<256x32xf32> to vector<256x32xbf16>
    %35 = vector.shape_cast %34 : vector<256x32xbf16> to vector<16x16x32xbf16>
    %c1_26 = arith.constant 1 : index
    %c1_27 = arith.constant 1 : index
    %c0_28 = arith.constant 0 : index
    %36 = vector.load %arg11[%c1_26, %c1_27, %c0_28] : memref<18x18x32xbf16, #tpu.memory_space<vmem>>, vector<16x16x32xbf16>
    tpu.vector_store %arg11[%c1_26, %c1_27, %c0_28], %35 {strides = array<i32>} : memref<18x18x32xbf16, #tpu.memory_space<vmem>>, vector<16x16x32xbf16>,
    %cst_29 = arith.constant 0.000000e+00 : f32
    %37 = vector.broadcast %cst_29 : f32 to vector<256x32xf32>
    %c0_30 = arith.constant 0 : index
    %c0_31 = arith.constant 0 : index
    %c0_32 = arith.constant 0 : index
    %38 = vector.load %arg11[%c0_30, %c0_31, %c0_32] : memref<18x18x32xbf16, #tpu.memory_space<vmem>>, vector<16x16x32xbf16>
    %39 = vector.shape_cast %38 : vector<16x16x32xbf16> to vector<256x32xbf16>
    %c0_33 = arith.constant 0 : index
    %c0_34 = arith.constant 0 : index
    %40 = vector.load %arg6[%c0_33, %c0_34] : memref<288x32xbf16, #tpu.memory_space<vmem>>, vector<32x32xbf16>
    %cst_35 = arith.constant dense<0.000000e+00> : vector<256x32xf32>
    %41 = tpu.matmul %39, %40, %cst_35 {dimension_numbers = #tpu.dot_dimension_numbers<[1], [0], [0], [1], [0, 0, 1, 1], [], []>} : vector<256x32xbf16>, vector<32x32xbf16>, vector<256x32xf32> -> vector<256x32xf32>
    %42 = arith.addf %37, %41 : vector<256x32xf32>
    %c0_36 = arith.constant 0 : index
    %c1_37 = arith.constant 1 : index
    %c0_38 = arith.constant 0 : index
    %43 = vector.load %arg11[%c0_36, %c1_37, %c0_38] : memref<18x18x32xbf16, #tpu.memory_space<vmem>>, vector<16x16x32xbf16>
    %44 = vector.shape_cast %43 : vector<16x16x32xbf16> to vector<256x32xbf16>
    %c32 = arith.constant 32 : index
    %c0_39 = arith.constant 0 : index
    %45 = vector.load %arg6[%c32, %c0_39] : memref<288x32xbf16, #tpu.memory_space<vmem>>, vector<32x32xbf16>
    %cst_40 = arith.constant dense<0.000000e+00> : vector<256x32xf32>
    %46 = tpu.matmul %44, %45, %cst_40 {dimension_numbers = #tpu.dot_dimension_numbers<[1], [0], [0], [1], [0, 0, 1, 1], [], []>} : vector<256x32xbf16>, vector<32x32xbf16>, vector<256x32xf32> -> vector<256x32xf32>
    %47 = arith.addf %42, %46 : vector<256x32xf32>
    %c0_41 = arith.constant 0 : index
    %c2 = arith.constant 2 : index
    %c0_42 = arith.constant 0 : index
    %48 = vector.load %arg11[%c0_41, %c2, %c0_42] : memref<18x18x32xbf16, #tpu.memory_space<vmem>>, vector<16x16x32xbf16>
    %49 = vector.shape_cast %48 : vector<16x16x32xbf16> to vector<256x32xbf16>
    %c64 = arith.constant 64 : index
    %c0_43 = arith.constant 0 : index
    %50 = vector.load %arg6[%c64, %c0_43] : memref<288x32xbf16, #tpu.memory_space<vmem>>, vector<32x32xbf16>
    %cst_44 = arith.constant dense<0.000000e+00> : vector<256x32xf32>
    %51 = tpu.matmul %49, %50, %cst_44 {dimension_numbers = #tpu.dot_dimension_numbers<[1], [0], [0], [1], [0, 0, 1, 1], [], []>} : vector<256x32xbf16>, vector<32x32xbf16>, vector<256x32xf32> -> vector<256x32xf32>
    %52 = arith.addf %47, %51 : vector<256x32xf32>
    %c1_45 = arith.constant 1 : index
    %c0_46 = arith.constant 0 : index
    %c0_47 = arith.constant 0 : index
    %53 = vector.load %arg11[%c1_45, %c0_46, %c0_47] : memref<18x18x32xbf16, #tpu.memory_space<vmem>>, vector<16x16x32xbf16>
    %54 = vector.shape_cast %53 : vector<16x16x32xbf16> to vector<256x32xbf16>
    %c96 = arith.constant 96 : index
    %c0_48 = arith.constant 0 : index
    %55 = vector.load %arg6[%c96, %c0_48] : memref<288x32xbf16, #tpu.memory_space<vmem>>, vector<32x32xbf16>
    %cst_49 = arith.constant dense<0.000000e+00> : vector<256x32xf32>
    %56 = tpu.matmul %54, %55, %cst_49 {dimension_numbers = #tpu.dot_dimension_numbers<[1], [0], [0], [1], [0, 0, 1, 1], [], []>} : vector<256x32xbf16>, vector<32x32xbf16>, vector<256x32xf32> -> vector<256x32xf32>
    %57 = arith.addf %52, %56 : vector<256x32xf32>
    %c1_50 = arith.constant 1 : index
    %c1_51 = arith.constant 1 : index
    %c0_52 = arith.constant 0 : index
    %58 = vector.load %arg11[%c1_50, %c1_51, %c0_52] : memref<18x18x32xbf16, #tpu.memory_space<vmem>>, vector<16x16x32xbf16>
    %59 = vector.shape_cast %58 : vector<16x16x32xbf16> to vector<256x32xbf16>
    %c128 = arith.constant 128 : index
    %c0_53 = arith.constant 0 : index
    %60 = vector.load %arg6[%c128, %c0_53] : memref<288x32xbf16, #tpu.memory_space<vmem>>, vector<32x32xbf16>
    %cst_54 = arith.constant dense<0.000000e+00> : vector<256x32xf32>
    %61 = tpu.matmul %59, %60, %cst_54 {dimension_numbers = #tpu.dot_dimension_numbers<[1], [0], [0], [1], [0, 0, 1, 1], [], []>} : vector<256x32xbf16>, vector<32x32xbf16>, vector<256x32xf32> -> vector<256x32xf32>
    %62 = arith.addf %57, %61 : vector<256x32xf32>
    %c1_55 = arith.constant 1 : index
    %c2_56 = arith.constant 2 : index
    %c0_57 = arith.constant 0 : index
    %63 = vector.load %arg11[%c1_55, %c2_56, %c0_57] : memref<18x18x32xbf16, #tpu.memory_space<vmem>>, vector<16x16x32xbf16>
    %64 = vector.shape_cast %63 : vector<16x16x32xbf16> to vector<256x32xbf16>
    %c160 = arith.constant 160 : index
    %c0_58 = arith.constant 0 : index
    %65 = vector.load %arg6[%c160, %c0_58] : memref<288x32xbf16, #tpu.memory_space<vmem>>, vector<32x32xbf16>
    %cst_59 = arith.constant dense<0.000000e+00> : vector<256x32xf32>
    %66 = tpu.matmul %64, %65, %cst_59 {dimension_numbers = #tpu.dot_dimension_numbers<[1], [0], [0], [1], [0, 0, 1, 1], [], []>} : vector<256x32xbf16>, vector<32x32xbf16>, vector<256x32xf32> -> vector<256x32xf32>
    %67 = arith.addf %62, %66 : vector<256x32xf32>
    %c2_60 = arith.constant 2 : index
    %c0_61 = arith.constant 0 : index
    %c0_62 = arith.constant 0 : index
    %68 = vector.load %arg11[%c2_60, %c0_61, %c0_62] : memref<18x18x32xbf16, #tpu.memory_space<vmem>>, vector<16x16x32xbf16>
    %69 = vector.shape_cast %68 : vector<16x16x32xbf16> to vector<256x32xbf16>
    %c192 = arith.constant 192 : index
    %c0_63 = arith.constant 0 : index
    %70 = vector.load %arg6[%c192, %c0_63] : memref<288x32xbf16, #tpu.memory_space<vmem>>, vector<32x32xbf16>
    %cst_64 = arith.constant dense<0.000000e+00> : vector<256x32xf32>
    %71 = tpu.matmul %69, %70, %cst_64 {dimension_numbers = #tpu.dot_dimension_numbers<[1], [0], [0], [1], [0, 0, 1, 1], [], []>} : vector<256x32xbf16>, vector<32x32xbf16>, vector<256x32xf32> -> vector<256x32xf32>
    %72 = arith.addf %67, %71 : vector<256x32xf32>
    %c2_65 = arith.constant 2 : index
    %c1_66 = arith.constant 1 : index
    %c0_67 = arith.constant 0 : index
    %73 = vector.load %arg11[%c2_65, %c1_66, %c0_67] : memref<18x18x32xbf16, #tpu.memory_space<vmem>>, vector<16x16x32xbf16>
    %74 = vector.shape_cast %73 : vector<16x16x32xbf16> to vector<256x32xbf16>
    %c224 = arith.constant 224 : index
    %c0_68 = arith.constant 0 : index
    %75 = vector.load %arg6[%c224, %c0_68] : memref<288x32xbf16, #tpu.memory_space<vmem>>, vector<32x32xbf16>
    %cst_69 = arith.constant dense<0.000000e+00> : vector<256x32xf32>
    %76 = tpu.matmul %74, %75, %cst_69 {dimension_numbers = #tpu.dot_dimension_numbers<[1], [0], [0], [1], [0, 0, 1, 1], [], []>} : vector<256x32xbf16>, vector<32x32xbf16>, vector<256x32xf32> -> vector<256x32xf32>
    %77 = arith.addf %72, %76 : vector<256x32xf32>
    %c2_70 = arith.constant 2 : index
    %c2_71 = arith.constant 2 : index
    %c0_72 = arith.constant 0 : index
    %78 = vector.load %arg11[%c2_70, %c2_71, %c0_72] : memref<18x18x32xbf16, #tpu.memory_space<vmem>>, vector<16x16x32xbf16>
    %79 = vector.shape_cast %78 : vector<16x16x32xbf16> to vector<256x32xbf16>
    %c256 = arith.constant 256 : index
    %c0_73 = arith.constant 0 : index
    %80 = vector.load %arg6[%c256, %c0_73] : memref<288x32xbf16, #tpu.memory_space<vmem>>, vector<32x32xbf16>
    %cst_74 = arith.constant dense<0.000000e+00> : vector<256x32xf32>
    %81 = tpu.matmul %79, %80, %cst_74 {dimension_numbers = #tpu.dot_dimension_numbers<[1], [0], [0], [1], [0, 0, 1, 1], [], []>} : vector<256x32xbf16>, vector<32x32xbf16>, vector<256x32xf32> -> vector<256x32xf32>
    %82 = arith.addf %77, %81 : vector<256x32xf32>
    %c0_75 = arith.constant 0 : index
    %c0_76 = arith.constant 0 : index
    %83 = vector.load %arg8[%c0_75, %c0_76] : memref<1x32xf32, #tpu.memory_space<vmem>>, vector<1x32xf32>
    %c0_77 = arith.constant 0 : index
    %c0_78 = arith.constant 0 : index
    %84 = vector.load %arg9[%c0_77, %c0_78] : memref<1x32xf32, #tpu.memory_space<vmem>>, vector<1x32xf32>
    %cst_79 = arith.constant dense<0.000000e+00> : vector<32xf32>
    %85 = vector.multi_reduction <add>, %82, %cst_79 [0] : vector<256x32xf32> to vector<32xf32>
    %86 = vector.shape_cast %85 : vector<32xf32> to vector<1x32xf32>
    %cst_80 = arith.constant 3.906250e-03 : f32
    %87 = vector.broadcast %cst_80 : f32 to vector<1x32xf32>
    %88 = arith.mulf %86, %87 : vector<1x32xf32>
    %89 = vector.broadcast %88 : vector<1x32xf32> to vector<256x32xf32>
    %90 = arith.subf %82, %89 : vector<256x32xf32>
    %91 = arith.mulf %90, %90 : vector<256x32xf32>
    %cst_81 = arith.constant dense<0.000000e+00> : vector<32xf32>
    %92 = vector.multi_reduction <add>, %91, %cst_81 [0] : vector<256x32xf32> to vector<32xf32>
    %93 = vector.shape_cast %92 : vector<32xf32> to vector<1x32xf32>
    %cst_82 = arith.constant 3.906250e-03 : f32
    %94 = vector.broadcast %cst_82 : f32 to vector<1x32xf32>
    %95 = arith.mulf %93, %94 : vector<1x32xf32>
    %cst_83 = arith.constant 9.99999974E-6 : f32
    %96 = vector.broadcast %cst_83 : f32 to vector<1x32xf32>
    %97 = arith.addf %95, %96 : vector<1x32xf32>
    %98 = math.rsqrt %97 : vector<1x32xf32>
    %99 = vector.broadcast %98 : vector<1x32xf32> to vector<256x32xf32>
    %100 = arith.mulf %90, %99 : vector<256x32xf32>
    %101 = vector.broadcast %83 : vector<1x32xf32> to vector<256x32xf32>
    %102 = arith.mulf %100, %101 : vector<256x32xf32>
    %103 = vector.broadcast %84 : vector<1x32xf32> to vector<256x32xf32>
    %104 = arith.addf %102, %103 : vector<256x32xf32>
    %cst_84 = arith.constant 0.000000e+00 : f32
    %105 = vector.broadcast %cst_84 : f32 to vector<256x32xf32>
    %106 = arith.maximumf %104, %105 : vector<256x32xf32>
    %c0_85 = arith.constant 0 : index
    %c0_86 = arith.constant 0 : index
    %c0_87 = arith.constant 0 : index
    %107 = vector.load %arg10[%c0_85, %c0_86, %c0_87] : memref<1x256x32xf32, #tpu.memory_space<vmem>>, vector<1x256x32xf32>
    %108 = vector.shape_cast %107 : vector<1x256x32xf32> to vector<256x32xf32>
    %109 = vector.shape_cast %106 : vector<256x32xf32> to vector<1x256x32xf32>
    tpu.vector_store %arg10[%c0_85, %c0_86, %c0_87], %109 {strides = array<i32>} : memref<1x256x32xf32, #tpu.memory_space<vmem>>, vector<1x256x32xf32>,
    return
  }
  func.func @transform_0(%arg0: i32) -> (i32, i32, i32) {
    %c0_i32 = arith.constant 0 : i32
    %c0_i32_0 = arith.constant 0 : i32
    %c0_i32_1 = arith.constant 0 : i32
    return %arg0, %c0_i32, %c0_i32_0 : i32, i32, i32
  }
  func.func @transform_1(%arg0: i32) -> (i32, i32) {
    %c0_i32 = arith.constant 0 : i32
    %c0_i32_0 = arith.constant 0 : i32
    %c0_i32_1 = arith.constant 0 : i32
    return %c0_i32, %c0_i32_0 : i32, i32
  }
  func.func @transform_2(%arg0: i32) -> (i32, i32) {
    %c0_i32 = arith.constant 0 : i32
    %c0_i32_0 = arith.constant 0 : i32
    %c0_i32_1 = arith.constant 0 : i32
    return %c0_i32, %c0_i32_0 : i32, i32
  }
  func.func @transform_3(%arg0: i32) -> (i32, i32) {
    %c0_i32 = arith.constant 0 : i32
    %c0_i32_0 = arith.constant 0 : i32
    %c0_i32_1 = arith.constant 0 : i32
    return %c0_i32, %c0_i32_0 : i32, i32
  }
  func.func @transform_4(%arg0: i32) -> (i32, i32) {
    %c0_i32 = arith.constant 0 : i32
    %c0_i32_0 = arith.constant 0 : i32
    %c0_i32_1 = arith.constant 0 : i32
    return %c0_i32, %c0_i32_0 : i32, i32
  }
  func.func @transform_5(%arg0: i32) -> (i32, i32) {
    %c0_i32 = arith.constant 0 : i32
    %c0_i32_0 = arith.constant 0 : i32
    %c0_i32_1 = arith.constant 0 : i32
    return %c0_i32, %c0_i32_0 : i32, i32
  }
  func.func @transform_6(%arg0: i32) -> (i32, i32) {
    %c0_i32 = arith.constant 0 : i32
    %c0_i32_0 = arith.constant 0 : i32
    %c0_i32_1 = arith.constant 0 : i32
    return %c0_i32, %c0_i32_0 : i32, i32
  }
  func.func @transform_7(%arg0: i32) -> (i32, i32) {
    %c0_i32 = arith.constant 0 : i32
    %c0_i32_0 = arith.constant 0 : i32
    %c0_i32_1 = arith.constant 0 : i32
    return %c0_i32, %c0_i32_0 : i32, i32
  }
  func.func @transform_8(%arg0: i32) -> (i32, i32) {
    %c0_i32 = arith.constant 0 : i32
    %c0_i32_0 = arith.constant 0 : i32
    %c0_i32_1 = arith.constant 0 : i32
    return %c0_i32, %c0_i32_0 : i32, i32
  }
  func.func @transform_9(%arg0: i32) -> (i32, i32, i32) {
    %c0_i32 = arith.constant 0 : i32
    %c0_i32_0 = arith.constant 0 : i32
    %c0_i32_1 = arith.constant 0 : i32
    return %arg0, %c0_i32, %c0_i32_0 : i32, i32, i32
  }
}

</mosaic_0001>

<bundles_post_ra>
// kernel: conv_block_forward.1
= control target key start
LH: loop header
LB: loop body
LE: loop exit
PB: predicated region body
PF: predicated region fallthrough
CT: control target
= control target key end

     0   :  { %14 = vsyncpa [#allocation4], 0  ;;  %s11332_s0 = inlined_call_operand.vmem [shape: bf16[2,256,36], index: 0, kind: input, shape index: {}]   ;;  %s11333_s1 = inlined_call_operand.vmem [shape: bf16[36,32], index: 1, kind: input, shape index: {}]   ;;  %s11334_s2 = inlined_call_operand.vmem [shape: f32[1,32], index: 2, kind: input, shape index: {}]   ;;  %s11335_s3 = inlined_call_operand.vmem [shape: f32[1,32], index: 3, kind: input, shape index: {}]   ;;  %s11336_s4 = inlined_call_operand.vmem [shape: f32[1,32], index: 4, kind: input, shape index: {}]   ;;  %s11337_s5 = inlined_call_operand.vmem [shape: bf16[288,32], index: 5, kind: input, shape index: {}]   ;;  %s11338_s6 = inlined_call_operand.vmem [shape: f32[1,32], index: 6, kind: input, shape index: {}]   ;;  %s11339_s7 = inlined_call_operand.vmem [shape: f32[1,32], index: 7, kind: input, shape index: {}]   ;;  %s11340_s8 = inlined_call_operand.vmem [shape: f32[1,32], index: 8, kind: input, shape index: {}]   ;;  %s11341_s9 = inlined_call_operand.hbm [shape: f32[2,256,32], index: 9, kind: output, shape index: {}]  }
   0x1   :  { %16 = vsyncpa [#allocation4 + $0x1], 0  ;;  %s8350_s29 = smov 0   ;;  %s8352_s30 = smov 0  }
   0x2   :  { %s8354_s10 = smov 0   ;;  %s8356_s11 = smov 0  }
   0x3 LB: > { %s8371_s6 = sadd.s32 4294967295, %s8294_s11   ;;  %s6782_s12 = sadd.s32 4294967294, %s8294_s11   ;;  %s8294_s11 = sphi %s8356_s11, %s11475_s11   ;;  %s8290_s10 = sphi %s8354_s10, %s11474_s10   ;;  %s8286_s30 = sphi %s8352_s30, %s11473_s30   ;;  %s8282_s29 = sphi %s8350_s29, %s11472_s29  }
   0x4   : > { %s8375_s13 = sadd.s32 1, %s8294_s11   ;;  %s223_s14 = sadd.s32 1, %s8290_s10 }
   0x5   : > { %s220_s15 = ssub.s32 %s8294_s11, %s8375_s13  ;;  %p233_p0 = scmp.ne.s32.totalorder %s8290_s10, %s8286_s30 }
   0x6   : > { %p221_p1 = scmp.eq.s32.totalorder %s220_s15, 0  ;;  %p234_p2 = scmp.eq.s32.totalorder %s8371_s6, 1 }
   0x7   : > { %p239_p3 = scmp.ne.s32.totalorder %s8286_s30, %s8282_s29  ;;  %p240_p4 = scmp.eq.s32.totalorder %s6782_s12, 1 }
   0x8   : > { %s8386_s16 = scalar_select %p221_p1, %s8290_s10, %s223_s14  }
   0x9   : > { %p8388_p5 = por %p234_p2, %p233_p0  ;;  %p8392_p6 = por %p240_p4, %p239_p3 }
   0xa   : > { %p6785_p7 = scmp.ge.s32.totalorder %s8294_s11, 1  ;;  %p290_p8 = scmp.lt.s32.totalorder %s8294_s11, 3 }
   0xc   : > { %p291_p9 = pnand %p6785_p7, %p290_p8 }
   0xe   : > { %294 = sbr.rel (%p291_p9) target bundleno = 1314 (0x522), region = 56 }
  0x15   : > { %v8095_v0 = vld [vmem:[%s11333_s1] sm:$0xff]   ;;  %v8096_v1 = vld [vmem:[%s11333_s1 + $0x8] sm:$0xff]   ;;  %p326_p10 = scmp.lt.s32.totalorder %s8371_s6, 1  ;;  %v8097_v2 = vld [vmem:[%s11333_s1 + $0x10] ss:$0 sps:$4 sm:$0x33]  }
  0x16   : > { %7434 = vmatprep.subr.bf16.mxu0 %v8095_v0  ;;  %vm513_vm0 = vcmask 1041408   ;;  %vm464_vm1 = vcmask 293888   ;;  %vm1030_vm2 = vcmask 253952   ;;  %vm1038_vm3 = vsmask.f32 256  ;;  %s323_s15 = sand.u32 1, %s8286_s30  }
  0x17   : > { %7435 = vmatpush3.bf16.msra.mxu0 %v8095_v0  ;;  %s327_s25 = scalar_select %p326_p10, %s8371_s6, 1  ;;  %v515_v4 = vsel %vm513_vm0, %v8097_v2, 0  ;;  %v1043_v20 = vld [vmem:[#allocation2 + $0x18] sm:$0x1]  ;;  %vm8448_vm4 = vmand %vm1030_vm2, %vm1038_vm3  ;;  %vm1088_vm5 = vsmask.f32 7938 }
  0x18   : > { %7436 = vmatprep.subr.bf16.mxu0 %v8096_v1  ;;  %v1040_v22 = vld [vmem:[#allocation2 + $0xc] sm:$0x1]  ;;  %v1044_v23 = vsel %vm8448_vm4, 0, %v1043_v20  ;;  %v1093_v25 = vld [vmem:[#allocation2 + $0x20] sm:$0x1]  ;;  %vm8458_vm6 = vmand %vm1030_vm2, %vm1088_vm5  ;;  %vm680_vm7 = vcmask 261120  }
  0x19   : > { %s7219_s26 = sshll.u32 %s327_s25, 7  ;;  %v1041_v24 = vsel %vm8448_vm4, 0, %v1040_v22  ;;  %1045 = vst [vmem:[#allocation2 + $0x18] sm:$0x1] %v1044_v23  ;;  %v1094_v27 = vsel %vm8458_vm6, 0, %v1093_v25  ;;  %vm1027_vm8 = vcmask 257024  }
  0x1a   : > { %s8412_s2 = scalar_lea.vmem %s11332_s0, %s7219_s26  ;;  %1042 = vst [vmem:[#allocation2 + $0xc] sm:$0x1] %v1041_v24  ;;  %1095 = vst [vmem:[#allocation2 + $0x20] sm:$0x1] %v1094_v27  ;;  %v1090_v28 = vld [vmem:[#allocation2 + $0x14] sm:$0x1] }
  0x1b   : > { %7437 = vmatpush3.bf16.msra.mxu0 %v8096_v1  ;;  %v8098_v3 = vld [vmem:[%s8412_s2] sm:$0xff]   ;;  %v8099_v5 = vld [vmem:[%s8412_s2 + $0x8] sm:$0xff]   ;;  %v8100_v6 = vld [vmem:[%s8412_s2 + $0x10] sm:$0xff]   ;;  %v1091_v29 = vsel %vm8458_vm6, 0, %v1090_v28  ;;  %vm1722_vm9 = vsmask.f32 3328 }
  0x1c   : > { %8052 = vmatprep.subr.msk.bf16.mxu0 %vm513_vm0, %v8097_v2  ;;  %7440 = vmatprep.mubr.msk.bf16.mxu0 %vm464_vm1, %v8098_v3  ;;  %v8101_v7 = vld [vmem:[%s8412_s2 + $0x18] sm:$0xff]   ;;  %v8102_v8 = vld [vmem:[%s8412_s2 + $0x20] sm:$0xff]   ;;  %v8103_v9 = vld [vmem:[%s8412_s2 + $0x28] sm:$0xff]   ;;  %1092 = vst [vmem:[#allocation2 + $0x14] sm:$0x1] %v1091_v29  ;;  %vm2731_vm15 = vcmask 1042432  }
  0x1d   : > { %v8104_v10 = vld [vmem:[%s8412_s2 + $0x30] sm:$0xff]   ;;  %v8105_v11 = vld [vmem:[%s8412_s2 + $0x38] sm:$0xff]   ;;  %v8106_v12 = vld [vmem:[%s8412_s2 + $0x40] sm:$0xff]   ;;  %vm1723_vm10 = vsmask.f32 7440  ;;  %vm2732_vm0 = vcmask 1046532  }
  0x1e   : > { %v8107_v13 = vld [vmem:[%s8412_s2 + $0x48] sm:$0xff]   ;;  %v8108_v14 = vld [vmem:[%s8412_s2 + $0x50] sm:$0xff]   ;;  %v8109_v15 = vld [vmem:[%s8412_s2 + $0x58] sm:$0xff]   ;;  %vm1234_vm12 = vsmask.f32 4368  ;;  %s6786_s23 = sshll.u32 %s323_s15, 8 }
  0x1f   : > { %7439 = vmatpush3.bf16.msra.mxu0 %v515_v4  ;;  %v8110_v16 = vld [vmem:[%s8412_s2 + $0x60] sm:$0xff]   ;;  %v8111_v17 = vld [vmem:[%s8412_s2 + $0x68] sm:$0xff]   ;;  %v8112_v18 = vld [vmem:[%s8412_s2 + $0x70] sm:$0xff]   ;;  %s11113_s24 = scalar_lea.vmem [#allocation3], %s6786_s23  ;;  %s7252_s25 = sshll.u32 %s8371_s6, 12 }
  0x20   : > { %v8113_v19 = vld [vmem:[%s8412_s2 + $0x78] sm:$0xff]   ;;  %v1049_v30 = vld [vmem:[#allocation2 + $0x30] sm:$0x1]  ;;  %v1046_v32 = vld [vmem:[#allocation2 + $0x24] sm:$0x1]  ;;  %s6720_s26 = sshll.u32 %s11113_s24, 4  ;;  %s11257_s28 = scalar_lea.hbm %s11341_s9, %s7252_s25  ;;  %s11259_s26 = int_to_ptr.vmem [resolvable:$true] %s6720_s26 }
  0x21   : > { %v1050_v31 = vsel %vm8448_vm4, 0, %v1049_v30  ;;  %v1047_v33 = vsel %vm8448_vm4, 0, %v1046_v32  ;;  %v1099_v34 = vld [vmem:[#allocation2 + $0x38] sm:$0x1]  ;;  %v1096_v36 = vld [vmem:[#allocation2 + $0x2c] sm:$0x1]  ;;  %vm8825_vm11 = vmor %vm1722_vm9, %vm1723_vm10 }
  0x22   : > { %7441 = vmatmul.mubr.msk.bf16.vlgmr.msra.gmra.mrb[0].mxu0 %vm464_vm1, %v8099_v5  ;;  %1051 = vst [vmem:[#allocation2 + $0x30] sm:$0x1] %v1050_v31  ;;  %1048 = vst [vmem:[#allocation2 + $0x24] sm:$0x1] %v1047_v33  ;;  %v1100_v35 = vsel %vm8458_vm6, 0, %v1099_v34  ;;  %v1097_v37 = vsel %vm8458_vm6, 0, %v1096_v36 }
  0x23   : > { %7444 = vmatprep.mubr.msk.bf16.mxu0 %vm464_vm1, %v8100_v6  ;;  %1101 = vst [vmem:[#allocation2 + $0x38] sm:$0x1] %v1100_v35  ;;  %1098 = vst [vmem:[#allocation2 + $0x2c] sm:$0x1] %v1097_v37  ;;  %v1055_v38 = vld [vmem:[#allocation2 + $0x48] sm:$0x1] }
  0x24   : > { %v1056_v39 = vsel %vm8448_vm4, 0, %v1055_v38  ;;  %v1052_v40 = vld [vmem:[#allocation2 + $0x3c] sm:$0x1]  ;;  %v1105_v41 = vld [vmem:[#allocation2 + $0x50] sm:$0x1]  ;;  %vm8897_vm13 = vmor %vm1038_vm3, %vm1234_vm12  ;;  %s11291_s2 = scalar_lea.sflag [#allocation4], %s323_s15 }
  0x25   : > { %1057 = vst [vmem:[#allocation2 + $0x48] sm:$0x1] %v1056_v39  ;;  %v1053_v42 = vsel %vm8448_vm4, 0, %v1052_v40  ;;  %v1106_v43 = vsel %vm8458_vm6, 0, %v1105_v41  ;;  %v1102_v44 = vld [vmem:[#allocation2 + $0x44] sm:$0x1]  ;;  %vm9166_vm14 = vmand %vm1027_vm8, %vm1088_vm5 }
  0x26   : > { %1054 = vst [vmem:[#allocation2 + $0x3c] sm:$0x1] %v1053_v42  ;;  %1107 = vst [vmem:[#allocation2 + $0x50] sm:$0x1] %v1106_v43  ;;  %v1103_v45 = vsel %vm8458_vm6, 0, %v1102_v44  ;;  %s8232_s12 = scalar_lea.vmem %s11259_s26, 4096 }
  0x27   : > { %1104 = vst [vmem:[#allocation2 + $0x44] sm:$0x1] %v1103_v45  ;;  %v1061_v46 = vld [vmem:[#allocation2 + $0x60] sm:$0x1]  ;;  %v1058_v48 = vld [vmem:[#allocation2 + $0x54] sm:$0x1]  ;;  %p8233_p11 = scmp.ne.s32.totalorder %s11259_s26, %s8232_s12 }
  0x28   : > { %v1062_v47 = vsel %vm8448_vm4, 0, %v1061_v46  ;;  %v1111_v49 = vld [vmem:[#allocation2 + $0x68] sm:$0x1]  ;;  %v1059_v50 = vsel %vm8448_vm4, 0, %v1058_v48  ;;  %v1108_v52 = vld [vmem:[#allocation2 + $0x5c] sm:$0x1] }
  0x29   : > { %1063 = vst [vmem:[#allocation2 + $0x60] sm:$0x1] %v1062_v47  ;;  %v1112_v51 = vsel %vm8458_vm6, 0, %v1111_v49  ;;  %1060 = vst [vmem:[#allocation2 + $0x54] sm:$0x1] %v1059_v50  ;;  %v1109_v53 = vsel %vm8458_vm6, 0, %v1108_v52  ;;  %p8234_p12 = pnand %p8233_p11, %p8388_p5 }
  0x2a   : > { %7445 = vmatmul.mubr.msk.bf16.gmra.mrb[4].mxu0 %vm464_vm1, %v8101_v7  ;;  %1113 = vst [vmem:[#allocation2 + $0x68] sm:$0x1] %v1112_v51  ;;  %1110 = vst [vmem:[#allocation2 + $0x5c] sm:$0x1] %v1109_v53  ;;  %v1067_v54 = vld [vmem:[#allocation2 + $0x78] sm:$0x1] }
  0x2b   : > { %7448 = vmatprep.mubr.msk.bf16.mxu0 %vm464_vm1, %v8102_v8  ;;  %v1068_v55 = vsel %vm8448_vm4, 0, %v1067_v54  ;;  %v1064_v56 = vld [vmem:[#allocation2 + $0x6c] sm:$0x1]  ;;  %v1117_v57 = vld [vmem:[#allocation2 + $0x80] sm:$0x1]  ;;  %p8235_p13 = pneg %p8234_p12  ;;  %s8297_s14 = smov [#allocation3]  }
  0x2c   : > { %1069 = vst [vmem:[#allocation2 + $0x78] sm:$0x1] %v1068_v55  ;;  %v1065_v58 = vsel %vm8448_vm4, 0, %v1064_v56  ;;  %v1118_v59 = vsel %vm8458_vm6, 0, %v1117_v57  ;;  %v1114_v60 = vld [vmem:[#allocation2 + $0x74] sm:$0x1] }
  0x2d   : > { %1066 = vst [vmem:[#allocation2 + $0x6c] sm:$0x1] %v1065_v58  ;;  %1119 = vst [vmem:[#allocation2 + $0x80] sm:$0x1] %v1118_v59  ;;  %v1115_v61 = vsel %vm8458_vm6, 0, %v1114_v60  ;;  %s8236_s19 = sshll.u32 %s8297_s14, 4  ;;  %s8237_s19 = int_to_ptr.vmem [resolvable:$false] %s8236_s19 }
  0x2e   : > { %1116 = vst [vmem:[#allocation2 + $0x74] sm:$0x1] %v1115_v61  ;;  %v1073_v62 = vld [vmem:[#allocation2 + $0x90] sm:$0x1]  ;;  %v1070_v0 = vld [vmem:[#allocation2 + $0x84] sm:$0x1]  ;;  %p8239_p0 = scmp.lt.s32.totalorder %s11259_s26, %s8237_s19 }
  0x2f   : > { %v1074_v63 = vsel %vm8448_vm4, 0, %v1073_v62  ;;  %v1123_v1 = vld [vmem:[#allocation2 + $0x98] sm:$0x1]  ;;  %v1071_v2 = vsel %vm8448_vm4, 0, %v1070_v0  ;;  %v1120_v4 = vld [vmem:[#allocation2 + $0x8c] sm:$0x1] }
  0x30   : > { %1075 = vst [vmem:[#allocation2 + $0x90] sm:$0x1] %v1074_v63  ;;  %v1124_v3 = vsel %vm8458_vm6, 0, %v1123_v1  ;;  %1072 = vst [vmem:[#allocation2 + $0x84] sm:$0x1] %v1071_v2  ;;  %v1121_v5 = vsel %vm8458_vm6, 0, %v1120_v4 }
  0x31   : > { %1125 = vst [vmem:[#allocation2 + $0x98] sm:$0x1] %v1124_v3  ;;  %1122 = vst [vmem:[#allocation2 + $0x8c] sm:$0x1] %v1121_v5  ;;  %v1079_v6 = vld [vmem:[#allocation2 + $0xa8] sm:$0x1] }
  0x32   : > { %7449 = vmatmul.mubr.msk.bf16.gmra.mrb[8].mxu0 %vm464_vm1, %v8103_v9  ;;  %v1080_v7 = vsel %vm8448_vm4, 0, %v1079_v6  ;;  %v1076_v8 = vld [vmem:[#allocation2 + $0x9c] sm:$0x1]  ;;  %v1129_v9 = vld [vmem:[#allocation2 + $0xb0] sm:$0x1]  ;;  %s8238_s20 = scalar_lea.vmem %s8237_s19, 8192 }
  0x33   : > { %7452 = vmatprep.mubr.msk.bf16.mxu0 %vm464_vm1, %v8104_v10  ;;  %1081 = vst [vmem:[#allocation2 + $0xa8] sm:$0x1] %v1080_v7  ;;  %v1077_v10 = vsel %vm8448_vm4, 0, %v1076_v8  ;;  %p8240_p1 = scmp.lt.s32.totalorder %s8238_s20, %s8232_s12 }
  0x34   : > { %1078 = vst [vmem:[#allocation2 + $0x9c] sm:$0x1] %v1077_v10 }
  0x35   : > { %p8241_p2 = por %p8240_p1, %p8239_p0 }
  0x37   : > { %p8242_p3 = pnand %p8241_p2, %p8235_p13 }
  0x3a   : > { %7453 = vmatmul.mubr.msk.bf16.gmra.mrb[12].mxu0 %vm464_vm1, %v8105_v11  ;;  %v1130_v11 = vsel %vm8458_vm6, 0, %v1129_v9 }
  0x3b   : > { %7456 = vmatprep.mubr.msk.bf16.mxu0 %vm464_vm1, %v8106_v12  ;;  %1131 = vst [vmem:[#allocation2 + $0xb0] sm:$0x1] %v1130_v11  ;;  %v1126_v12 = vld [vmem:[#allocation2 + $0xa4] sm:$0x1] }
  0x42   : > { %7457 = vmatmul.mubr.msk.bf16.gmra.mrb[16].mxu0 %vm464_vm1, %v8107_v13  ;;  %v1127_v13 = vsel %vm8458_vm6, 0, %v1126_v12 }
  0x43   : > { %7460 = vmatprep.mubr.msk.bf16.mxu0 %vm464_vm1, %v8108_v14  ;;  %1128 = vst [vmem:[#allocation2 + $0xa4] sm:$0x1] %v1127_v13  ;;  %v1085_v14 = vld [vmem:[#allocation2 + $0xc0] sm:$0x1] }
  0x4a   : > { %7461 = vmatmul.mubr.msk.bf16.gmra.mrb[20].mxu0 %vm464_vm1, %v8109_v15  ;;  %v1086_v15 = vsel %vm8448_vm4, 0, %v1085_v14 }
  0x4b   : > { %7464 = vmatprep.mubr.msk.bf16.mxu0 %vm464_vm1, %v8110_v16  ;;  %1087 = vst [vmem:[#allocation2 + $0xc0] sm:$0x1] %v1086_v15  ;;  %v1082_v16 = vld [vmem:[#allocation2 + $0xb4] sm:$0x1] }
  0x52   : > { %7465 = vmatmul.mubr.msk.bf16.gmra.mrb[24].mxu0 %vm464_vm1, %v8111_v17  ;;  %v1135_v17 = vld [vmem:[#allocation2 + $0xc8] sm:$0x1] }
  0x53   : > { %7468 = vmatprep.mubr.msk.bf16.mxu0 %vm464_vm1, %v8112_v18  ;;  %v1083_v18 = vsel %vm8448_vm4, 0, %v1082_v16 }
  0x54   : > { %1084 = vst [vmem:[#allocation2 + $0xb4] sm:$0x1] %v1083_v18 }
  0x5a   : > { %7469 = vmatmul.mubr.msk.bf16.gmra.mrb[28].mxu0 %vm464_vm1, %v8113_v19  ;;  %v1136_v19 = vsel %vm8458_vm6, 0, %v1135_v17  ;;  %vm9624_vm1 = vmor %vm2731_vm15, %vm2732_vm0 }
  0x5b   : > { %1137 = vst [vmem:[#allocation2 + $0xc8] sm:$0x1] %v1136_v19 }
  0xf5   : > { %v8520_v20 = vpop.f32.mrb[0].mxu0 }
  0xf6   : > { %v8522_v22 = vpop.f32.mrb[1].mxu0  ;;  %v684_v29 = vsel %vm680_vm7, %v8520_v20, 0.0 }
  0xf7   : > { %v8524_v23 = vpop.f32.mrb[2].mxu0  ;;  %v681_v25 = vsel %vm680_vm7, %v8522_v22, 0.0 }
  0xf8   : > { %v8526_v24 = vpop.f32.mrb[3].mxu0  ;;  %v686_v31 = vsel %vm680_vm7, %v8524_v23, 0.0 }
  0xf9   : > { %v682_v27 = vsel %vm680_vm7, %v8526_v24, 0.0 }
  0xfa   : > { %v683_v28 = vadd.f32 %v682_v27, %v681_v25 }
  0xfc   : > { %v685_v30 = vadd.f32 %v684_v29, %v683_v28 }
  0xfd   : > { %v8536_v32 = vpop.f32.mrb[4].mxu0 }
  0xfe   : > { %v8538_v33 = vpop.f32.mrb[5].mxu0  ;;  %v687_v34 = vadd.f32 %v686_v31, %v685_v30  ;;  %v692_v41 = vsel %vm680_vm7, %v8536_v32, 0.0 }
  0xff   : > { %v688_v35 = vsel %vm680_vm7, %v8538_v33, 0.0  ;;  %v8542_v36 = vpop.f32.mrb[6].mxu0 }
 0x100   : > { %v689_v37 = vadd.f32 %v688_v35, %v687_v34  ;;  %v8544_v38 = vpop.f32.mrb[7].mxu0  ;;  %v694_v43 = vsel %vm680_vm7, %v8542_v36, 0.0 }
 0x101   : > { %v690_v39 = vsel %vm680_vm7, %v8544_v38, 0.0 }
 0x102   : > { %v691_v40 = vadd.f32 %v690_v39, %v689_v37 }
 0x104   : > { %v693_v42 = vadd.f32 %v692_v41, %v691_v40 }
 0x105   : > { %v8552_v44 = vpop.f32.mrb[8].mxu0 }
 0x106   : > { %v8554_v45 = vpop.f32.mrb[9].mxu0  ;;  %v695_v46 = vadd.f32 %v694_v43, %v693_v42  ;;  %v700_v53 = vsel %vm680_vm7, %v8552_v44, 0.0 }
 0x107   : > { %v696_v47 = vsel %vm680_vm7, %v8554_v45, 0.0  ;;  %v8558_v48 = vpop.f32.mrb[10].mxu0 }
 0x108   : > { %v697_v49 = vadd.f32 %v696_v47, %v695_v46  ;;  %v8560_v50 = vpop.f32.mrb[11].mxu0  ;;  %v702_v55 = vsel %vm680_vm7, %v8558_v48, 0.0 }
 0x109   : > { %v698_v51 = vsel %vm680_vm7, %v8560_v50, 0.0 }
 0x10a   : > { %v699_v52 = vadd.f32 %v698_v51, %v697_v49 }
 0x10c   : > { %v701_v54 = vadd.f32 %v700_v53, %v699_v52 }
 0x10d   : > { %v8568_v56 = vpop.f32.mrb[12].mxu0 }
 0x10e   : > { %v8570_v57 = vpop.f32.mrb[13].mxu0  ;;  %v703_v58 = vadd.f32 %v702_v55, %v701_v54  ;;  %v708_v1 = vsel %vm680_vm7, %v8568_v56, 0.0 }
 0x10f   : > { %v704_v59 = vsel %vm680_vm7, %v8570_v57, 0.0  ;;  %v8574_v60 = vpop.f32.mrb[14].mxu0 }
 0x110   : > { %v705_v61 = vadd.f32 %v704_v59, %v703_v58  ;;  %v8576_v62 = vpop.f32.mrb[15].mxu0  ;;  %v710_v3 = vsel %vm680_vm7, %v8574_v60, 0.0 }
 0x111   : > { %v706_v63 = vsel %vm680_vm7, %v8576_v62, 0.0 }
 0x112   : > { %v707_v0 = vadd.f32 %v706_v63, %v705_v61 }
 0x114   : > { %v709_v2 = vadd.f32 %v708_v1, %v707_v0 }
 0x115   : > { %v8584_v4 = vpop.f32.mrb[16].mxu0 }
 0x116   : > { %v8586_v5 = vpop.f32.mrb[17].mxu0  ;;  %v711_v6 = vadd.f32 %v710_v3, %v709_v2  ;;  %v716_v13 = vsel %vm680_vm7, %v8584_v4, 0.0 }
 0x117   : > { %v712_v7 = vsel %vm680_vm7, %v8586_v5, 0.0  ;;  %v8590_v8 = vpop.f32.mrb[18].mxu0 }
 0x118   : > { %v713_v9 = vadd.f32 %v712_v7, %v711_v6  ;;  %v8592_v10 = vpop.f32.mrb[19].mxu0  ;;  %v718_v15 = vsel %vm680_vm7, %v8590_v8, 0.0 }
 0x119   : > { %v714_v11 = vsel %vm680_vm7, %v8592_v10, 0.0 }
 0x11a   : > { %v715_v12 = vadd.f32 %v714_v11, %v713_v9  ;;  %v1132_v11 = vld [vmem:[#allocation2 + $0xbc] sm:$0x1] }
 0x11c   : > { %v717_v14 = vadd.f32 %v716_v13, %v715_v12  ;;  %v1133_v12 = vsel %vm8458_vm6, 0, %v1132_v11 }
 0x11d   : > { %v8600_v16 = vpop.f32.mrb[20].mxu0  ;;  %1134 = vst [vmem:[#allocation2 + $0xbc] sm:$0x1] %v1133_v12 }
 0x11e   : > { %v8602_v17 = vpop.f32.mrb[21].mxu0  ;;  %v719_v18 = vadd.f32 %v718_v15, %v717_v14  ;;  %v724_v31 = vsel %vm680_vm7, %v8600_v16, 0.0 }
 0x11f   : > { %v720_v19 = vsel %vm680_vm7, %v8602_v17, 0.0  ;;  %v8606_v25 = vpop.f32.mrb[22].mxu0 }
 0x120   : > { %v721_v27 = vadd.f32 %v720_v19, %v719_v18  ;;  %v634_v28 = vpop.f32.mrb[23].mxu0  ;;  %v726_v35 = vsel %vm680_vm7, %v8606_v25, 0.0 }
 0x121   : > { %v722_v29 = vsel %vm680_vm7, %v634_v28, 0.0 }
 0x122   : > { %v723_v30 = vadd.f32 %v722_v29, %v721_v27 }
 0x124   : > { %v725_v34 = vadd.f32 %v724_v31, %v723_v30 }
 0x125   : > { %v7466_v37 = vpop.f32.mrb[24].mxu0 }
 0x126   : > { %v647_v39 = vpop.f32.mrb[25].mxu0  ;;  %v727_v40 = vadd.f32 %v726_v35, %v725_v34  ;;  %v732_v51 = vsel %vm680_vm7, %v7466_v37, 0.0 }
 0x127   : > { %v728_v41 = vsel %vm680_vm7, %v647_v39, 0.0  ;;  %v7467_v42 = vpop.f32.mrb[26].mxu0 }
 0x128   : > { %v729_v43 = vadd.f32 %v728_v41, %v727_v40  ;;  %v650_v46 = vpop.f32.mrb[27].mxu0  ;;  %v734_v53 = vsel %vm680_vm7, %v7467_v42, 0.0 }
 0x129   : > { %v730_v47 = vsel %vm680_vm7, %v650_v46, 0.0 }
 0x12a   : > { %v731_v49 = vadd.f32 %v730_v47, %v729_v43 }
 0x12c   : > { %v733_v52 = vadd.f32 %v732_v51, %v731_v49 }
 0x12d   : > { %v7470_v54 = vpop.f32.mrb[28].mxu0 }
 0x12e   : > { %v663_v55 = vpop.f32.mrb[29].mxu0  ;;  %v735_v58 = vadd.f32 %v734_v53, %v733_v52  ;;  %v740_v3 = vsel %vm680_vm7, %v7470_v54, 0.0 }
 0x12f   : > { %v736_v59 = vsel %vm680_vm7, %v663_v55, 0.0  ;;  %v7471_v61 = vpop.f32.mrb[30].mxu0 }
 0x130   : > { %v737_v63 = vadd.f32 %v736_v59, %v735_v58  ;;  %v666_v0 = vpop.f32.mrb[31].mxu0  ;;  %v742_v7 = vsel %vm680_vm7, %v7471_v61, 0.0 }
 0x131   : > { %v738_v1 = vsel %vm680_vm7, %v666_v0, 0.0 }
 0x132   : > { %v739_v2 = vadd.f32 %v738_v1, %v737_v63 }
 0x134   : > { %v741_v6 = vadd.f32 %v740_v3, %v739_v2 }
 0x136   : > { %v743_v9 = vadd.f32 %v742_v7, %v741_v6 }
 0x138   : > { %v744_v13 = vrot.slane %v743_v9, 4 }
 0x13a   : > { %v745_v14 = vadd.f32 %v744_v13, %v743_v9 }
 0x13c   : > { %v746_v15 = vrot.slane %v745_v14, 2 }
 0x13e   : > { %v747_v18 = vadd.f32 %v746_v15, %v745_v14 }
 0x140   : > { %v748_v19 = vrot.slane %v747_v18, 1 }
 0x142   : > { %v749_v27 = vadd.f32 %v748_v19, %v747_v18 }
 0x144   : > { %v750_v29 = vmul.f32 0.00390625, %v749_v27 }
 0x146   : > { %v8624_v30 = vsub.f32 %v8522_v22, %v750_v29  ;;  %v8627_v31 = vsub.f32 %v8526_v24, %v750_v29  ;;  %v8630_v34 = vsub.f32 %v8520_v20, %v750_v29  ;;  %v8633_v26 = vsub.f32 %v8524_v23, %v750_v29 }
 0x147   : > { %v8636_v35 = vsub.f32 %v8538_v33, %v750_v29  ;;  %v8639_v40 = vsub.f32 %v8544_v38, %v750_v29  ;;  %v8642_v41 = vsub.f32 %v8536_v32, %v750_v29  ;;  %v8645_v22 = vsub.f32 %v8542_v36, %v750_v29 }
 0x148   : > { %v8648_v24 = vsub.f32 %v8554_v45, %v750_v29  ;;  %v8651_v20 = vsub.f32 %v8560_v50, %v750_v29  ;;  %v8654_v23 = vsub.f32 %v8552_v44, %v750_v29  ;;  %v8657_v33 = vsub.f32 %v8558_v48, %v750_v29 }
 0x149   : > { %v8660_v38 = vsub.f32 %v8570_v57, %v750_v29  ;;  %v8663_v32 = vsub.f32 %v8576_v62, %v750_v29  ;;  %v8666_v36 = vsub.f32 %v8568_v56, %v750_v29  ;;  %v8669_v45 = vsub.f32 %v8574_v60, %v750_v29 }
 0x14a   : > { %v8672_v50 = vsub.f32 %v8586_v5, %v750_v29  ;;  %v8675_v44 = vsub.f32 %v8592_v10, %v750_v29  ;;  %v8678_v48 = vsub.f32 %v8584_v4, %v750_v29  ;;  %v8681_v57 = vsub.f32 %v8590_v8, %v750_v29 }
 0x14b   : > { %v8684_v62 = vsub.f32 %v8602_v17, %v750_v29  ;;  %v8686_v56 = vsub.f32 %v634_v28, %v750_v29  ;;  %v8689_v60 = vsub.f32 %v8600_v16, %v750_v29  ;;  %v8692_v5 = vsub.f32 %v8606_v25, %v750_v29 }
 0x14c   : > { %v8694_v43 = vsub.f32 %v647_v39, %v750_v29  ;;  %v8696_v10 = vsub.f32 %v650_v46, %v750_v29  ;;  %v8698_v4 = vsub.f32 %v7466_v37, %v750_v29  ;;  %v8700_v47 = vsub.f32 %v7467_v42, %v750_v29 }
 0x14d   : > { %v8702_v8 = vsub.f32 %v663_v55, %v750_v29  ;;  %v8704_v17 = vsub.f32 %v666_v0, %v750_v29  ;;  %v8706_v28 = vsub.f32 %v7470_v54, %v750_v29  ;;  %v8708_v49 = vsub.f32 %v7471_v61, %v750_v29 }
 0x14e   : > { %v783_v16 = vmul.f32 %v8624_v30, %v8624_v30  ;;  %v784_v25 = vmul.f32 %v8627_v31, %v8627_v31  ;;  %v785_v37 = vmul.f32 %v8630_v34, %v8630_v34  ;;  %v786_v39 = vmul.f32 %v8633_v26, %v8633_v26 }
 0x14f   : > { %v787_v52 = vmul.f32 %v8636_v35, %v8636_v35  ;;  %v788_v55 = vmul.f32 %v8639_v40, %v8639_v40  ;;  %v789_v61 = vmul.f32 %v8642_v41, %v8642_v41  ;;  %v790_v1 = vmul.f32 %v8645_v22, %v8645_v22 }
 0x150   : > { %v815_v42 = vsel %vm680_vm7, %v783_v16, 0.0  ;;  %v816_v46 = vsel %vm680_vm7, %v784_v25, 0.0  ;;  %v818_v53 = vsel %vm680_vm7, %v785_v37, 0.0  ;;  %v820_v58 = vsel %vm680_vm7, %v786_v39, 0.0 }
 0x151   : > { %v817_v51 = vadd.f32 %v816_v46, %v815_v42  ;;  %v822_v63 = vsel %vm680_vm7, %v787_v52, 0.0  ;;  %v824_v2 = vsel %vm680_vm7, %v788_v55, 0.0  ;;  %v791_v6 = vmul.f32 %v8648_v24, %v8648_v24 }
 0x152   : > { %v826_v7 = vsel %vm680_vm7, %v789_v61, 0.0  ;;  %v792_v11 = vmul.f32 %v8651_v20, %v8651_v20  ;;  %v828_v12 = vsel %vm680_vm7, %v790_v1, 0.0  ;;  %v793_v14 = vmul.f32 %v8654_v23, %v8654_v23 }
 0x153   : > { %v819_v54 = vadd.f32 %v818_v53, %v817_v51  ;;  %v830_v15 = vsel %vm680_vm7, %v791_v6, 0.0  ;;  %v794_v19 = vmul.f32 %v8657_v33, %v8657_v33  ;;  %v795_v16 = vmul.f32 %v8660_v38, %v8660_v38 }
 0x154   : > { %v832_v27 = vsel %vm680_vm7, %v792_v11, 0.0  ;;  %v834_v25 = vsel %vm680_vm7, %v793_v14, 0.0  ;;  %v796_v39 = vmul.f32 %v8663_v32, %v8663_v32  ;;  %v797_v51 = vmul.f32 %v8666_v36, %v8666_v36 }
 0x155   : > { %v821_v59 = vadd.f32 %v820_v58, %v819_v54  ;;  %v836_v42 = vsel %vm680_vm7, %v794_v19, 0.0  ;;  %v838_v52 = vsel %vm680_vm7, %v795_v16, 0.0  ;;  %v798_v54 = vmul.f32 %v8669_v45, %v8669_v45 }
 0x156   : > { %v840_v55 = vsel %vm680_vm7, %v796_v39, 0.0  ;;  %v842_v61 = vsel %vm680_vm7, %v797_v51, 0.0 }
 0x157   : > { %v823_v0 = vadd.f32 %v822_v63, %v821_v59  ;;  %v799_v59 = vmul.f32 %v8672_v50, %v8672_v50  ;;  %v844_v1 = vsel %vm680_vm7, %v798_v54, 0.0 }
 0x159   : > { %v825_v3 = vadd.f32 %v824_v2, %v823_v0  ;;  %v800_v0 = vmul.f32 %v8675_v44, %v8675_v44  ;;  %v846_v6 = vsel %vm680_vm7, %v799_v59, 0.0 }
 0x15b   : > { %v827_v9 = vadd.f32 %v826_v7, %v825_v3  ;;  %v801_v3 = vmul.f32 %v8678_v48, %v8678_v48  ;;  %v848_v11 = vsel %vm680_vm7, %v800_v0, 0.0 }
 0x15d   : > { %v829_v13 = vadd.f32 %v828_v12, %v827_v9  ;;  %v802_v9 = vmul.f32 %v8681_v57, %v8681_v57  ;;  %v850_v14 = vsel %vm680_vm7, %v801_v3, 0.0 }
 0x15f   : > { %v831_v18 = vadd.f32 %v830_v15, %v829_v13  ;;  %v803_v13 = vmul.f32 %v8684_v62, %v8684_v62  ;;  %v852_v19 = vsel %vm680_vm7, %v802_v9, 0.0 }
 0x161   : > { %v833_v29 = vadd.f32 %v832_v27, %v831_v18  ;;  %v804_v18 = vmul.f32 %v8686_v56, %v8686_v56  ;;  %v854_v16 = vsel %vm680_vm7, %v803_v13, 0.0  ;;  %v813_v13 = vmul.f32 %v8706_v28, %v8706_v28 }
 0x163   : > { %v835_v37 = vadd.f32 %v834_v25, %v833_v29  ;;  %v805_v29 = vmul.f32 %v8689_v60, %v8689_v60  ;;  %v856_v39 = vsel %vm680_vm7, %v804_v18, 0.0  ;;  %v8115_v18 = vld [vmem:[%s11337_s5 + $0x40] sm:$0xff]  }
 0x164   : > { %7616 = vmatprep.subr.bf16.mxu1 %v8115_v18 }
 0x165   : > { %v837_v46 = vadd.f32 %v836_v42, %v835_v37  ;;  %v806_v37 = vmul.f32 %v8692_v5, %v8692_v5  ;;  %v858_v51 = vsel %vm680_vm7, %v805_v29, 0.0  ;;  %7617 = vmatpush3.bf16.msra.mxu1 %v8115_v18 }
 0x167   : > { %v839_v53 = vadd.f32 %v838_v52, %v837_v46  ;;  %v807_v46 = vmul.f32 %v8694_v43, %v8694_v43  ;;  %v860_v54 = vsel %vm680_vm7, %v806_v37, 0.0 }
 0x169   : > { %v841_v58 = vadd.f32 %v840_v55, %v839_v53  ;;  %v808_v53 = vmul.f32 %v8696_v10, %v8696_v10  ;;  %v862_v59 = vsel %vm680_vm7, %v807_v46, 0.0 }
 0x16b   : > { %v843_v63 = vadd.f32 %v842_v61, %v841_v58  ;;  %v809_v58 = vmul.f32 %v8698_v4, %v8698_v4  ;;  %v864_v0 = vsel %vm680_vm7, %v808_v53, 0.0 }
 0x16d   : > { %v845_v2 = vadd.f32 %v844_v1, %v843_v63  ;;  %v810_v63 = vmul.f32 %v8700_v47, %v8700_v47  ;;  %v866_v3 = vsel %vm680_vm7, %v809_v58, 0.0 }
 0x16f   : > { %v847_v7 = vadd.f32 %v846_v6, %v845_v2  ;;  %v811_v2 = vmul.f32 %v8702_v8, %v8702_v8  ;;  %v868_v9 = vsel %vm680_vm7, %v810_v63, 0.0 }
 0x171   : > { %v849_v12 = vadd.f32 %v848_v11, %v847_v7  ;;  %v812_v7 = vmul.f32 %v8704_v17, %v8704_v17 }
 0x173   : > { %v851_v15 = vadd.f32 %v850_v14, %v849_v12  ;;  %v8296_v12 = vmov 0   ;;  %v870_v14 = vsel %vm680_vm7, %v811_v2, 0.0 }
 0x174   : > { %1028 = vst.msk [vmem:[#allocation2] sm:$0xf] %vm1027_vm8, %v8296_v12  ;;  %1029 = vst.msk [vmem:[#allocation2 + $0x4] sm:$0xf] %vm1027_vm8, %v8296_v12 }
 0x175   : > { %v853_v27 = vadd.f32 %v852_v19, %v851_v15  ;;  %1031 = vst.msk [vmem:[#allocation2 + $0x8] sm:$0x1] %vm1030_vm2, %v8296_v12  ;;  %1035 = vst.msk [vmem:[#allocation2 + $0xd4] sm:$0x1] %vm1030_vm2, %v8296_v12  ;;  %v8114_v15 = vld [vmem:[%s11337_s5 + $0x10] sm:$0xff]   ;;  %v8116_v19 = vld [vmem:[%s11337_s5 + $0x18] sm:$0xff]  }
 0x176   : > { %1033 = vst.msk [vmem:[#allocation2 + $0xcc] sm:$0xf] %vm1027_vm8, %v8296_v12  ;;  %1034 = vst.msk [vmem:[#allocation2 + $0xd0] sm:$0xf] %vm1027_vm8, %v8296_v12  ;;  %7472 = vmatprep.subr.bf16.mxu0 %v8114_v15 }
 0x177   : > { %v855_v25 = vadd.f32 %v854_v16, %v853_v27  ;;  %v814_v27 = vmul.f32 %v8708_v49, %v8708_v49  ;;  %v8117_v16 = vld [vmem:[%s11337_s5 + $0x48] sm:$0xff]   ;;  %7473 = vmatpush3.bf16.msra.mxu0 %v8114_v15 }
 0x178   : > { %7474 = vmatprep.subr.bf16.mxu0 %v8116_v19  ;;  %7618 = vmatprep.subr.bf16.mxu1 %v8117_v16 }
 0x179   : > { %v857_v42 = vadd.f32 %v856_v39, %v855_v25  ;;  %v872_v25 = vsel %vm680_vm7, %v812_v7, 0.0  ;;  %v874_v39 = vsel %vm680_vm7, %v813_v13, 0.0  ;;  %v876_v46 = vsel %vm680_vm7, %v814_v27, 0.0  ;;  %7619 = vmatpush3.bf16.msra.mxu1 %v8117_v16 }
 0x17b   : > { %v859_v52 = vadd.f32 %v858_v51, %v857_v42  ;;  %v1670_v51 = vld [vmem:[#allocation2] sm:$0xf]  ;;  %7475 = vmatpush3.bf16.msra.mxu0 %v8116_v19 }
 0x17c   : > { %v1706_v53 = vld [vmem:[#allocation2 + $0x8] sm:$0x1]  ;;  %v1729_v58 = vshll.u32 %v1670_v51, 16 }
 0x17d   : > { %v861_v55 = vadd.f32 %v860_v54, %v859_v52  ;;  %v1671_v52 = vld [vmem:[#allocation2 + $0x4] sm:$0xf]  ;;  %v1745_v63 = vshll.u32 %v1706_v53, 16 }
 0x17e   : > { %v1731_v2 = vrot.slane %v1729_v58, 5 }
 0x17f   : > { %v863_v61 = vadd.f32 %v862_v59, %v861_v55  ;;  %v1726_v55 = vshrl.u32 %v1670_v51, 16  ;;  %v1735_v59 = vshll.u32 %v1671_v52, 16  ;;  %v1747_v13 = vrot.slane %v1745_v63, 5 }
 0x181   : > { %v865_v1 = vadd.f32 %v864_v0, %v863_v61  ;;  %v1739_v61 = vshrl.u32 %v1671_v52, 16  ;;  %v8840_v52 = vld [vmem:[%s11335_s3] ss:$0 sm:$0xff] }
 0x183   : > { %v867_v6 = vadd.f32 %v866_v3, %v865_v1  ;;  %v1728_v1 = vrot.slane %v1726_v55, 4  ;;  %v1737_v3 = vrot.slane %v1735_v59, 5  ;;  %v8849_v59 = vld [vmem:[%s11336_s4] ss:$0 sm:$0xff] }
 0x185   : > { %v869_v11 = vadd.f32 %v868_v9, %v867_v6  ;;  %v1741_v6 = vrot.slane %v1739_v61, 4  ;;  %v1732_v9 = vor.u32 %v1731_v2, %v1728_v1 }
 0x187   : > { %v871_v29 = vadd.f32 %v870_v14, %v869_v11  ;;  %v11372_v11 = vmov 0  ;;  %v1742_v12 = vor.u32 %v1741_v6, %v1737_v3  ;;  %v1733_v15 = vrot.slane %v1732_v9, 4 }
 0x188   : > { %v11373_v11 = vsel %vm8825_vm11, 4294967295, %v11372_v11 }
 0x189   : > { %v873_v37 = vadd.f32 %v872_v25, %v871_v29  ;;  %11374 = vst [vmem:[#allocation6_spill] sm:$0xff] %v11373_v11  ;;  %v1743_v18 = vrot.slane %v1742_v12, 4  ;;  %v1738_v27 = vsel %vm8825_vm11, %v1733_v15, %v1737_v3  ;;  %v8118_v29 = vld [vmem:[%s11337_s5 + $0x50] sm:$0xff]  }
 0x18a   : > { %7652 = vmatprep.subr.bf16.mxu1 %v8118_v29 }
 0x18b   : > { %v875_v42 = vadd.f32 %v874_v39, %v873_v37  ;;  %v1748_v16 = vsel %vm8825_vm11, %v1743_v18, %v1747_v13 }
 0x18c   : > { %v6858_v37 = vcombine.low %v1738_v27, %v1748_v16  ;;  %v1660_v16 = vld [vmem:[#allocation2 + $0xbc] sm:$0x1] }
 0x18d   : > { %v877_v54 = vadd.f32 %v876_v46, %v875_v42 }
 0x18e   : > { %7476 = vmatprep.mubr.msk.bf16.mxu0 %vm680_vm7, %v6858_v37 }
 0x18f   : > { %v878_v0 = vrot.slane %v877_v54, 4 }
 0x191   : > { %v879_v7 = vadd.f32 %v878_v0, %v877_v54 }
 0x193   : > { %v880_v14 = vrot.slane %v879_v7, 2 }
 0x195   : > { %v881_v19 = vadd.f32 %v880_v14, %v879_v7 }
 0x197   : > { %v882_v25 = vrot.slane %v881_v19, 1 }
 0x199   : > { %v883_v39 = vadd.f32 %v882_v25, %v881_v19 }
 0x19b   : > { %v884_v42 = vmul.f32 0.00390625, %v883_v39 }
 0x19d   : > { %v885_v46 = vadd.f32 1e-05, %v884_v42 }
 0x19f   : > { %8179 = vrsqrt.f32 %v885_v46 }
 0x1a9   : > { %v8180_v51 = vpop.eup %8179 }
 0x1aa   : > { %v915_v53 = vmul.f32 %v8180_v51, %v8702_v8  ;;  %v916_v54 = vmul.f32 %v8180_v51, %v8704_v17  ;;  %v887_v55 = vmul.f32 %v8180_v51, %v8624_v30  ;;  %v888_v58 = vmul.f32 %v8180_v51, %v8627_v31 }
 0x1ab   : > { %v889_v61 = vmul.f32 %v8180_v51, %v8630_v34  ;;  %v890_v63 = vmul.f32 %v8180_v51, %v8633_v26  ;;  %v891_v0 = vmul.f32 %v8180_v51, %v8636_v35  ;;  %v892_v1 = vmul.f32 %v8180_v51, %v8639_v40 }
 0x1ac   : > { %v953_v8 = vmul.f32 %v8840_v52, %v915_v53  ;;  %v954_v30 = vmul.f32 %v8840_v52, %v916_v54  ;;  %v893_v31 = vmul.f32 %v8180_v51, %v8642_v41  ;;  %v894_v17 = vmul.f32 %v8180_v51, %v8645_v22 }
 0x1ad   : > { %v895_v2 = vmul.f32 %v8180_v51, %v8648_v24  ;;  %v896_v3 = vmul.f32 %v8180_v51, %v8651_v20  ;;  %v897_v34 = vmul.f32 %v8180_v51, %v8654_v23  ;;  %v898_v26 = vmul.f32 %v8180_v51, %v8657_v33 }
 0x1ae   : > { %v991_v35 = vadd.f32 %v8849_v59, %v953_v8  ;;  %v992_v40 = vadd.f32 %v8849_v59, %v954_v30  ;;  %v899_v6 = vmul.f32 %v8180_v51, %v8660_v38  ;;  %v900_v7 = vmul.f32 %v8180_v51, %v8663_v32 }
 0x1af   : > { %v901_v41 = vmul.f32 %v8180_v51, %v8666_v36  ;;  %v902_v22 = vmul.f32 %v8180_v51, %v8669_v45  ;;  %v903_v24 = vmul.f32 %v8180_v51, %v8672_v50  ;;  %v904_v20 = vmul.f32 %v8180_v51, %v8675_v44 }
 0x1b0   : > { %v1023_v9 = vmax.f32 %v991_v35, 0.0  ;;  %v1024_v23 = vmax.f32 %v992_v40, 0.0  ;;  %v905_v33 = vmul.f32 %v8180_v51, %v8678_v48  ;;  %v906_v12 = vmul.f32 %v8180_v51, %v8681_v57 }
 0x1b1   : > { %v907_v13 = vmul.f32 %v8180_v51, %v8684_v62  ;;  %v908_v38 = vmul.f32 %v8180_v51, %v8686_v56  ;;  %v909_v32 = vmul.f32 %v8180_v51, %v8689_v60  ;;  %v910_v36 = vmul.f32 %v8180_v51, %v8692_v5 }
 0x1b2   : > { %v8877_v14 = vpack.c.bf16 %v1023_v9, %v1023_v9  ;;  %v7249_v45 = vpack.c.bf16 %v1024_v23, %v1024_v23  ;;  %v911_v50 = vmul.f32 %v8180_v51, %v8694_v43  ;;  %v912_v44 = vmul.f32 %v8180_v51, %v8696_v10 }
 0x1b3   : > { %v913_v15 = vmul.f32 %v8180_v51, %v8698_v4  ;;  %v914_v48 = vmul.f32 %v8180_v51, %v8700_v47  ;;  %v917_v57 = vmul.f32 %v8180_v51, %v8706_v28  ;;  %v918_v62 = vmul.f32 %v8180_v51, %v8708_v49 }
 0x1b4   : > { %v1475_v56 = vshrl.u32 %v8877_v14, 16  ;;  %v1483_v60 = vshrl.u32 %v7249_v45, 16  ;;  %v1486_v18 = vshll.u32 %v7249_v45, 16  ;;  %v1478_v5 = vshll.u32 %v8877_v14, 16 }
 0x1b5   : > { %v925_v19 = vmul.f32 %v8840_v52, %v887_v55  ;;  %v926_v43 = vmul.f32 %v8840_v52, %v888_v58  ;;  %v927_v10 = vmul.f32 %v8840_v52, %v889_v61  ;;  %v928_v4 = vmul.f32 %v8840_v52, %v890_v63 }
 0x1b6   : > { %v8891_v27 = vrot.slane %v1475_v56, 7  ;;  %v1485_v47 = vrot.slane %v1483_v60, 7  ;;  %v929_v28 = vmul.f32 %v8840_v52, %v891_v0  ;;  %v930_v49 = vmul.f32 %v8840_v52, %v892_v1 }
 0x1b7   : > { %v931_v25 = vmul.f32 %v8840_v52, %v893_v31  ;;  %v932_v37 = vmul.f32 %v8840_v52, %v894_v17  ;;  %v933_v39 = vmul.f32 %v8840_v52, %v895_v2  ;;  %v934_v42 = vmul.f32 %v8840_v52, %v896_v3 }
 0x1b8   : > { %v1481_v46 = vrot.slane %v8891_v27, 4  ;;  %v1488_v51 = vor.u32 %v1486_v18, %v1485_v47  ;;  %v1490_v53 = vrot.slane %v1485_v47, 4  ;;  %v935_v54 = vmul.f32 %v8840_v52, %v897_v34 }
 0x1b9   : > { %v936_v55 = vmul.f32 %v8840_v52, %v898_v26  ;;  %v937_v58 = vmul.f32 %v8840_v52, %v899_v6  ;;  %v938_v61 = vmul.f32 %v8840_v52, %v900_v7  ;;  %v939_v63 = vmul.f32 %v8840_v52, %v901_v41 }
 0x1ba   : > { %v1489_v0 = vsel %vm8897_vm13, %v1481_v46, %v1488_v51  ;;  %v1661_v1 = vsel %vm8448_vm4, %v1490_v53, %v1660_v16  ;;  %v940_v8 = vmul.f32 %v8840_v52, %v902_v22  ;;  %v941_v30 = vmul.f32 %v8840_v52, %v903_v24 }
 0x1bb   : > { %1659 = vst.msk [vmem:[#allocation2 + $0xb8] sm:$0xf] %vm1027_vm8, %v1489_v0  ;;  %1662 = vst [vmem:[#allocation2 + $0xbc] sm:$0x1] %v1661_v1  ;;  %v942_v31 = vmul.f32 %v8840_v52, %v904_v20  ;;  %v943_v17 = vmul.f32 %v8840_v52, %v905_v33  ;;  %v944_v2 = vmul.f32 %v8840_v52, %v906_v12 }
 0x1bc   : > { %v945_v3 = vmul.f32 %v8840_v52, %v907_v13  ;;  %v946_v34 = vmul.f32 %v8840_v52, %v908_v38  ;;  %v947_v26 = vmul.f32 %v8840_v52, %v909_v32  ;;  %v948_v35 = vmul.f32 %v8840_v52, %v910_v36 }
 0x1bd   : > { %v949_v40 = vmul.f32 %v8840_v52, %v911_v50  ;;  %v950_v6 = vmul.f32 %v8840_v52, %v912_v44  ;;  %v951_v7 = vmul.f32 %v8840_v52, %v913_v15  ;;  %v952_v41 = vmul.f32 %v8840_v52, %v914_v48 }
 0x1be   : > { %v955_v22 = vmul.f32 %v8840_v52, %v917_v57  ;;  %v956_v24 = vmul.f32 %v8840_v52, %v918_v62  ;;  %v963_v20 = vadd.f32 %v8849_v59, %v925_v19  ;;  %v964_v9 = vadd.f32 %v8849_v59, %v926_v43 }
 0x1bf   : > { %v965_v23 = vadd.f32 %v8849_v59, %v927_v10  ;;  %v966_v33 = vadd.f32 %v8849_v59, %v928_v4  ;;  %v967_v12 = vadd.f32 %v8849_v59, %v929_v28  ;;  %v968_v13 = vadd.f32 %v8849_v59, %v930_v49 }
 0x1c0   : > { %v969_v38 = vadd.f32 %v8849_v59, %v931_v25  ;;  %v970_v32 = vadd.f32 %v8849_v59, %v932_v37  ;;  %v971_v36 = vadd.f32 %v8849_v59, %v933_v39  ;;  %v972_v52 = vadd.f32 %v8849_v59, %v934_v42 }
 0x1c1   : > { %v973_v45 = vadd.f32 %v8849_v59, %v935_v54  ;;  %v974_v50 = vadd.f32 %v8849_v59, %v936_v55  ;;  %v975_v44 = vadd.f32 %v8849_v59, %v937_v58  ;;  %v976_v15 = vadd.f32 %v8849_v59, %v938_v61 }
 0x1c2   : > { %v977_v48 = vadd.f32 %v8849_v59, %v939_v63  ;;  %v978_v57 = vadd.f32 %v8849_v59, %v940_v8  ;;  %v979_v62 = vadd.f32 %v8849_v59, %v941_v30  ;;  %v980_v56 = vadd.f32 %v8849_v59, %v942_v31 }
 0x1c3   : > { %v981_v60 = vadd.f32 %v8849_v59, %v943_v17  ;;  %v982_v18 = vadd.f32 %v8849_v59, %v944_v2  ;;  %v983_v19 = vadd.f32 %v8849_v59, %v945_v3  ;;  %v984_v43 = vadd.f32 %v8849_v59, %v946_v34 }
 0x1c4   : > { %v985_v10 = vadd.f32 %v8849_v59, %v947_v26  ;;  %v986_v4 = vadd.f32 %v8849_v59, %v948_v35  ;;  %v987_v47 = vadd.f32 %v8849_v59, %v949_v40  ;;  %v988_v28 = vadd.f32 %v8849_v59, %v950_v6 }
 0x1c5   : > { %v989_v49 = vadd.f32 %v8849_v59, %v951_v7  ;;  %v990_v16 = vadd.f32 %v8849_v59, %v952_v41  ;;  %v993_v25 = vadd.f32 %v8849_v59, %v955_v22  ;;  %v994_v37 = vadd.f32 %v8849_v59, %v956_v24 }
 0x1c6   : > { %v995_v39 = vmax.f32 %v963_v20, 0.0  ;;  %v996_v42 = vmax.f32 %v964_v9, 0.0  ;;  %v997_v46 = vmax.f32 %v965_v23, 0.0  ;;  %v998_v51 = vmax.f32 %v966_v33, 0.0 }
 0x1c7   : > { %v999_v53 = vmax.f32 %v967_v12, 0.0  ;;  %v1000_v54 = vmax.f32 %v968_v13, 0.0  ;;  %v1001_v55 = vmax.f32 %v969_v38, 0.0  ;;  %v1002_v58 = vmax.f32 %v970_v32, 0.0 }
 0x1c8   : > { %v1003_v61 = vmax.f32 %v971_v36, 0.0  ;;  %v1004_v63 = vmax.f32 %v972_v52, 0.0  ;;  %v1005_v0 = vmax.f32 %v973_v45, 0.0  ;;  %v1006_v1 = vmax.f32 %v974_v50, 0.0 }
 0x1c9   : > { %v1007_v8 = vmax.f32 %v975_v44, 0.0  ;;  %v1008_v30 = vmax.f32 %v976_v15, 0.0  ;;  %v1009_v31 = vmax.f32 %v977_v48, 0.0  ;;  %v1010_v17 = vmax.f32 %v978_v57, 0.0 }
 0x1ca   : > { %v1011_v2 = vmax.f32 %v979_v62, 0.0  ;;  %v1012_v3 = vmax.f32 %v980_v56, 0.0  ;;  %v1013_v34 = vmax.f32 %v981_v60, 0.0  ;;  %v1014_v59 = vmax.f32 %v982_v18, 0.0 }
 0x1cb   : > { %v1015_v26 = vmax.f32 %v983_v19, 0.0  ;;  %v1016_v35 = vmax.f32 %v984_v43, 0.0  ;;  %v1017_v40 = vmax.f32 %v985_v10, 0.0  ;;  %v1018_v6 = vmax.f32 %v986_v4, 0.0 }
 0x1cc   : > { %v1019_v7 = vmax.f32 %v987_v47, 0.0  ;;  %v1020_v41 = vmax.f32 %v988_v28, 0.0  ;;  %v1021_v22 = vmax.f32 %v989_v49, 0.0  ;;  %v1022_v24 = vmax.f32 %v990_v16, 0.0 }
 0x1cd   : > { %v1025_v20 = vmax.f32 %v993_v25, 0.0  ;;  %v1026_v9 = vmax.f32 %v994_v37, 0.0  ;;  %v7220_v23 = vpack.c.bf16 %v995_v39, %v995_v39  ;;  %v7221_v33 = vpack.c.bf16 %v996_v42, %v996_v42 }
 0x1ce   : > { %v7222_v12 = vpack.c.bf16 %v997_v46, %v997_v46  ;;  %v7223_v13 = vpack.c.bf16 %v998_v51, %v998_v51  ;;  %v7224_v38 = vpack.c.bf16 %v999_v53, %v999_v53  ;;  %v7225_v32 = vpack.c.bf16 %v1000_v54, %v1000_v54 }
 0x1cf   : > { %v8961_v36 = vpack.c.bf16 %v1001_v55, %v1001_v55  ;;  %v8963_v52 = vpack.c.bf16 %v1002_v58, %v1002_v58  ;;  %v8965_v45 = vpack.c.bf16 %v1003_v61, %v1003_v61  ;;  %v8967_v50 = vpack.c.bf16 %v1004_v63, %v1004_v63 }
 0x1d0   : > { %v8969_v44 = vpack.c.bf16 %v1005_v0, %v1005_v0  ;;  %v8971_v15 = vpack.c.bf16 %v1006_v1, %v1006_v1  ;;  %v8973_v48 = vpack.c.bf16 %v1007_v8, %v1007_v8  ;;  %v8975_v57 = vpack.c.bf16 %v1008_v30, %v1008_v30 }
 0x1d1   : > { %v8977_v62 = vpack.c.bf16 %v1009_v31, %v1009_v31  ;;  %v8979_v56 = vpack.c.bf16 %v1010_v17, %v1010_v17  ;;  %v8981_v60 = vpack.c.bf16 %v1011_v2, %v1011_v2  ;;  %v8983_v18 = vpack.c.bf16 %v1012_v3, %v1012_v3 }
 0x1d2   : > { %v8985_v19 = vpack.c.bf16 %v1013_v34, %v1013_v34  ;;  %v8987_v43 = vpack.c.bf16 %v1014_v59, %v1014_v59  ;;  %v8989_v10 = vpack.c.bf16 %v1015_v26, %v1015_v26  ;;  %v8991_v4 = vpack.c.bf16 %v1016_v35, %v1016_v35 }
 0x1d3   : > { %v8993_v47 = vpack.c.bf16 %v1017_v40, %v1017_v40  ;;  %v8995_v28 = vpack.c.bf16 %v1018_v6, %v1018_v6  ;;  %v8997_v49 = vpack.c.bf16 %v1019_v7, %v1019_v7  ;;  %v8999_v16 = vpack.c.bf16 %v1020_v41, %v1020_v41  ;;  %v1618_v7 = vld [vmem:[#allocation2 + $0x74] sm:$0x1] }
 0x1d4   : > { %v9001_v25 = vpack.c.bf16 %v1021_v22, %v1021_v22  ;;  %v9003_v37 = vpack.c.bf16 %v1022_v24, %v1022_v24  ;;  %v9005_v39 = vpack.c.bf16 %v1025_v20, %v1025_v20  ;;  %v9007_v42 = vpack.c.bf16 %v1026_v9, %v1026_v9 }
 0x1d5   : > { %v1237_v46 = vshrl.u32 %v7220_v23, 16  ;;  %v1240_v51 = vshll.u32 %v7220_v23, 16  ;;  %v1245_v53 = vshrl.u32 %v7221_v33, 16  ;;  %v1248_v54 = vshll.u32 %v7221_v33, 16 }
 0x1d6   : > { %v1254_v55 = vshrl.u32 %v7222_v12, 16  ;;  %v1257_v61 = vshll.u32 %v7222_v12, 16  ;;  %v1262_v63 = vshrl.u32 %v7223_v13, 16  ;;  %v1265_v0 = vshll.u32 %v7223_v13, 16 }
 0x1d7   : > { %v1239_v58 = vrot.slane %v1237_v46, 7  ;;  %v9009_v1 = vrot.slane %v1245_v53, 7  ;;  %v1271_v30 = vshrl.u32 %v7224_v38, 16  ;;  %v1274_v31 = vshll.u32 %v7224_v38, 16 }
 0x1d8   : > { %v1256_v8 = vrot.slane %v1254_v55, 7  ;;  %v9013_v3 = vrot.slane %v1262_v63, 7  ;;  %v1279_v34 = vshrl.u32 %v7225_v32, 16  ;;  %v1282_v20 = vshll.u32 %v7225_v32, 16 }
 0x1d9   : > { %v9011_v17 = vor.u32 %v1240_v51, %v1239_v58  ;;  %v1243_v2 = vrot.slane %v1239_v58, 4  ;;  %v1250_v59 = vor.u32 %v1248_v54, %v9009_v1  ;;  %v1252_v26 = vrot.slane %v9009_v1, 4 }
 0x1da   : > { %v9017_v35 = vor.u32 %v1257_v61, %v1256_v8  ;;  %v1260_v40 = vrot.slane %v1256_v8, 4  ;;  %v1267_v6 = vor.u32 %v1265_v0, %v9013_v3  ;;  %v1273_v41 = vrot.slane %v1271_v30, 7 }
 0x1db   : > { %v9021_v22 = vrot.slane %v1279_v34, 7  ;;  %v1251_v24 = vsel %vm8897_vm13, %v1243_v2, %v1250_v59  ;;  %v1288_v9 = vshrl.u32 %v8961_v36, 16  ;;  %v1291_v23 = vshll.u32 %v8961_v36, 16 }
 0x1dc   : > { %v1268_v33 = vsel %vm8897_vm13, %v1260_v40, %v1267_v6  ;;  %v9029_v12 = vor.u32 %v1274_v31, %v1273_v41  ;;  %v1277_v13 = vrot.slane %v1273_v41, 4  ;;  %1561 = vst.msk [vmem:[#allocation2 + $0x10] sm:$0xf] %vm1027_vm8, %v1251_v24  ;;  %v1296_v53 = vshrl.u32 %v8963_v52, 16  ;;  %v1600_v24 = vld [vmem:[#allocation2 + $0x54] sm:$0xf] }
 0x1dd   : > { %v1284_v46 = vor.u32 %v1282_v20, %v9021_v22  ;;  %v1290_v51 = vrot.slane %v1288_v9, 7  ;;  %v1299_v32 = vshll.u32 %v8963_v52, 16  ;;  %1568 = vst.msk [vmem:[#allocation2 + $0x1c] sm:$0xf] %vm1027_vm8, %v1268_v33  ;;  %v1305_v36 = vshrl.u32 %v8965_v45, 16 }
 0x1de   : > { %v1308_v54 = vshll.u32 %v8965_v45, 16  ;;  %v1313_v55 = vshrl.u32 %v8967_v50, 16  ;;  %v1316_v58 = vshll.u32 %v8967_v50, 16  ;;  %v9045_v8 = vrot.slane %v1296_v53, 7 }
 0x1df   : > { %v1285_v61 = vsel %vm8897_vm13, %v1277_v13, %v1284_v46  ;;  %v9043_v63 = vor.u32 %v1291_v23, %v1290_v51  ;;  %v1294_v0 = vrot.slane %v1290_v51, 4  ;;  %v1307_v30 = vrot.slane %v1305_v36, 7  ;;  %v1590_v36 = vld [vmem:[#allocation2 + $0x44] sm:$0x1] }
 0x1e0   : > { %v9047_v52 = vrot.slane %v1313_v55, 7  ;;  %v1322_v31 = vshrl.u32 %v8969_v44, 16  ;;  %v1325_v2 = vshll.u32 %v8969_v44, 16  ;;  %1575 = vst.msk [vmem:[#allocation2 + $0x28] sm:$0xf] %vm1027_vm8, %v1285_v61  ;;  %v1301_v45 = vor.u32 %v1299_v32, %v9045_v8 }
 0x1e1   : > { %v1330_v34 = vshrl.u32 %v8971_v15, 16  ;;  %v1333_v59 = vshll.u32 %v8971_v15, 16  ;;  %v9056_v40 = vor.u32 %v1308_v54, %v1307_v30  ;;  %v1311_v6 = vrot.slane %v1307_v30, 4 }
 0x1e2   : > { %v1318_v41 = vor.u32 %v1316_v58, %v9047_v52  ;;  %v1302_v44 = vsel %vm8897_vm13, %v1294_v0, %v1301_v45  ;;  %v1324_v20 = vrot.slane %v1322_v31, 7  ;;  %v1339_v23 = vshrl.u32 %v8973_v48, 16 }
 0x1e3   : > { %v9062_v9 = vrot.slane %v1330_v34, 7  ;;  %v1342_v15 = vshll.u32 %v8973_v48, 16  ;;  %v1347_v13 = vshrl.u32 %v8975_v57, 16  ;;  %v1350_v46 = vshll.u32 %v8975_v57, 16  ;;  %1582 = vst.msk [vmem:[#allocation2 + $0x34] sm:$0xf] %vm1027_vm8, %v1302_v44 }
 0x1e4   : > { %v1319_v33 = vsel %vm8897_vm13, %v1311_v6, %v1318_v41  ;;  %v9071_v51 = vor.u32 %v1325_v2, %v1324_v20  ;;  %v1328_v53 = vrot.slane %v1324_v20, 4  ;;  %v1341_v54 = vrot.slane %v1339_v23, 7  ;;  %v1597_v34 = vld [vmem:[#allocation2 + $0x50] sm:$0x1] }
 0x1e5   : > { %v1335_v32 = vor.u32 %v1333_v59, %v9062_v9  ;;  %1589 = vst.msk [vmem:[#allocation2 + $0x40] sm:$0xf] %vm1027_vm8, %v1319_v33  ;;  %v9076_v55 = vrot.slane %v1347_v13, 7  ;;  %v1356_v48 = vshrl.u32 %v8977_v62, 16  ;;  %v1359_v58 = vshll.u32 %v8977_v62, 16 }
 0x1e6   : > { %v1364_v61 = vshrl.u32 %v8979_v56, 16  ;;  %v1367_v0 = vshll.u32 %v8979_v56, 16  ;;  %v1373_v30 = vshrl.u32 %v8981_v60, 16  ;;  %v9085_v31 = vor.u32 %v1342_v15, %v1341_v54 }
 0x1e7   : > { %v1336_v57 = vsel %vm8897_vm13, %v1328_v53, %v1335_v32  ;;  %v1345_v2 = vrot.slane %v1341_v54, 4  ;;  %v1352_v45 = vor.u32 %v1350_v46, %v9076_v55  ;;  %v1358_v59 = vrot.slane %v1356_v48, 7 }
 0x1e8   : > { %1596 = vst.msk [vmem:[#allocation2 + $0x4c] sm:$0xf] %vm1027_vm8, %v1336_v57  ;;  %v9090_v62 = vrot.slane %v1364_v61, 7  ;;  %v1375_v6 = vrot.slane %v1373_v30, 7  ;;  %v1376_v41 = vshll.u32 %v8981_v60, 16  ;;  %v1381_v44 = vshrl.u32 %v8983_v18, 16 }
 0x1e9   : > { %v1353_v56 = vsel %vm8897_vm13, %v1345_v2, %v1352_v45  ;;  %v1384_v20 = vshll.u32 %v8983_v18, 16  ;;  %v1390_v23 = vshrl.u32 %v8985_v19, 16  ;;  %v9098_v33 = vor.u32 %v1359_v58, %v1358_v59 }
 0x1ea   : > { %v1362_v15 = vrot.slane %v1358_v59, 4  ;;  %v1369_v13 = vor.u32 %v1367_v0, %v9090_v62  ;;  %1603 = vst.msk [vmem:[#allocation2 + $0x58] sm:$0xf] %vm1027_vm8, %v1353_v56  ;;  %v9103_v53 = vor.u32 %v1376_v41, %v1375_v6  ;;  %v1379_v60 = vrot.slane %v1375_v6, 4 }
 0x1eb   : > { %v9105_v32 = vrot.slane %v1381_v44, 7  ;;  %v1392_v54 = vrot.slane %v1390_v23, 7  ;;  %v1393_v48 = vshll.u32 %v8985_v19, 16  ;;  %v1398_v58 = vshrl.u32 %v8987_v43, 16 }
 0x1ec   : > { %v1370_v18 = vsel %vm8897_vm13, %v1362_v15, %v1369_v13  ;;  %v1401_v57 = vshll.u32 %v8987_v43, 16  ;;  %v1407_v2 = vshrl.u32 %v8989_v10, 16  ;;  %v1410_v6 = vshll.u32 %v8989_v10, 16 }
 0x1ed   : > { %v1386_v61 = vor.u32 %v1384_v20, %v9105_v32  ;;  %v1396_v30 = vrot.slane %v1392_v54, 4  ;;  %1610 = vst.msk [vmem:[#allocation2 + $0x64] sm:$0xf] %vm1027_vm8, %v1370_v18  ;;  %v9116_v45 = vor.u32 %v1393_v48, %v1392_v54  ;;  %v9118_v59 = vrot.slane %v1398_v58, 7 }
 0x1ee   : > { %v1415_v19 = vshrl.u32 %v8991_v4, 16  ;;  %v1409_v41 = vrot.slane %v1407_v2, 7  ;;  %v1418_v56 = vshll.u32 %v8991_v4, 16  ;;  %v1424_v44 = vshrl.u32 %v8993_v47, 16 }
 0x1ef   : > { %v1387_v43 = vsel %vm8897_vm13, %v1379_v60, %v1386_v61  ;;  %v1403_v20 = vor.u32 %v1401_v57, %v9118_v59  ;;  %v1427_v13 = vshll.u32 %v8993_v47, 16  ;;  %v1432_v60 = vshrl.u32 %v8995_v28, 16 }
 0x1f0   : > { %v9128_v15 = vrot.slane %v1415_v19, 7  ;;  %1617 = vst.msk [vmem:[#allocation2 + $0x70] sm:$0xf] %vm1027_vm8, %v1387_v43  ;;  %v9132_v10 = vor.u32 %v1410_v6, %v1409_v41  ;;  %v1413_v54 = vrot.slane %v1409_v41, 4  ;;  %v1426_v18 = vrot.slane %v1424_v44, 7 }
 0x1f1   : > { %v1404_v4 = vsel %vm8897_vm13, %v1396_v30, %v1403_v20  ;;  %v1435_v57 = vshll.u32 %v8995_v28, 16  ;;  %v9142_v2 = vrot.slane %v1432_v60, 7  ;;  %v1441_v6 = vshrl.u32 %v8997_v49, 16 }
 0x1f2   : > { %v1420_v48 = vor.u32 %v1418_v56, %v9128_v15  ;;  %v9140_v61 = vor.u32 %v1427_v13, %v1426_v18  ;;  %v1430_v47 = vrot.slane %v1426_v18, 4  ;;  %1624 = vst.msk [vmem:[#allocation2 + $0x7c] sm:$0xf] %vm1027_vm8, %v1404_v4  ;;  %v1444_v30 = vshll.u32 %v8997_v49, 16  ;;  %v1558_v13 = vld [vmem:[#allocation2 + $0xc] sm:$0xf] }
 0x1f3   : > { %v1449_v43 = vshrl.u32 %v8999_v16, 16  ;;  %v1452_v41 = vshll.u32 %v8999_v16, 16  ;;  %v1437_v28 = vor.u32 %v1435_v57, %v9142_v2  ;;  %v1443_v44 = vrot.slane %v1441_v6, 7  ;;  %v1565_v4 = vld [vmem:[#allocation2 + $0x18] sm:$0xf] }
 0x1f4   : > { %v1421_v19 = vsel %vm8897_vm13, %v1413_v54, %v1420_v48  ;;  %v1458_v20 = vshrl.u32 %v9001_v25, 16  ;;  %v1461_v54 = vshll.u32 %v9001_v25, 16  ;;  %v1466_v49 = vshrl.u32 %v9003_v37, 16  ;;  %v1569_v16 = vld [vmem:[#allocation2 + $0x20] sm:$0x1] }
 0x1f5   : > { %1631 = vst.msk [vmem:[#allocation2 + $0x88] sm:$0xf] %vm1027_vm8, %v1421_v19  ;;  %v9155_v18 = vrot.slane %v1449_v43, 7  ;;  %v1469_v60 = vshll.u32 %v9003_v37, 16  ;;  %v1562_v48 = vld [vmem:[#allocation2 + $0x14] sm:$0x1]  ;;  %v1438_v57 = vsel %vm8897_vm13, %v1430_v47, %v1437_v28  ;;  %v9162_v6 = vor.u32 %v1444_v30, %v1443_v44 }
 0x1f6   : > { %v1447_v56 = vrot.slane %v1443_v44, 4  ;;  %v1460_v58 = vrot.slane %v1458_v20, 7  ;;  %v1572_v25 = vld [vmem:[#allocation2 + $0x24] sm:$0xf]  ;;  %v9172_v23 = vrot.slane %v1466_v49, 7  ;;  %v9177_v47 = vor.u32 %v1478_v5, %v8891_v27 }
 0x1f7   : > { %v1454_v43 = vor.u32 %v1452_v41, %v9155_v18  ;;  %1638 = vst.msk [vmem:[#allocation2 + $0x94] sm:$0xf] %vm1027_vm8, %v1438_v57  ;;  %v1579_v30 = vld [vmem:[#allocation2 + $0x30] sm:$0xf]  ;;  %v1583_v28 = vld [vmem:[#allocation2 + $0x38] sm:$0x1] }
 0x1f8   : > { %11379 = vst [vmem:[#allocation7_spill] sm:$0xff] %v9177_v47  ;;  %v1576_v44 = vld [vmem:[#allocation2 + $0x2c] sm:$0x1]  ;;  %v9180_v20 = vor.u32 %v1461_v54, %v1460_v58  ;;  %v1464_v0 = vrot.slane %v1460_v58, 4  ;;  %v1492_v46 = vshrl.u32 %v9005_v39, 16  ;;  %v1495_v41 = vshll.u32 %v9005_v39, 16 }
 0x1f9   : > { %v1593_v37 = vld [vmem:[#allocation2 + $0x48] sm:$0xf]  ;;  %v1586_v49 = vld [vmem:[#allocation2 + $0x3c] sm:$0xf]  ;;  %v1455_v14 = vsel %vm8897_vm13, %v1447_v56, %v1454_v43  ;;  %v1471_v5 = vor.u32 %v1469_v60, %v9172_v23  ;;  %v1500_v57 = vshrl.u32 %v9007_v42, 16  ;;  %v1503_v38 = vshll.u32 %v9007_v42, 16 }
 0x1fa   : > { %v1607_v54 = vld [vmem:[#allocation2 + $0x60] sm:$0xf]  ;;  %v1604_v58 = vld [vmem:[#allocation2 + $0x5c] sm:$0x1]  ;;  %v1494_v50 = vrot.slane %v1492_v46, 7  ;;  %v1559_v39 = vsel %vm9166_vm14, %v9011_v17, %v1558_v13  ;;  %v1563_v56 = vsel %vm8448_vm4, %v1252_v26, %v1562_v48  ;;  %v1566_v42 = vsel %vm9166_vm14, %v9017_v35, %v1565_v4 }
 0x1fb   : > { %1645 = vst.msk [vmem:[#allocation2 + $0xa0] sm:$0xf] %vm1027_vm8, %v1455_v14  ;;  %v1611_v60 = vld [vmem:[#allocation2 + $0x68] sm:$0x1]  ;;  %v1621_v43 = vld [vmem:[#allocation2 + $0x78] sm:$0xf]  ;;  %v1472_v46 = vsel %vm8897_vm13, %v1464_v0, %v1471_v5  ;;  %v1573_v5 = vsel %vm9166_vm14, %v9029_v12, %v1572_v25  ;;  %v1580_v12 = vsel %vm9166_vm14, %v9043_v63, %v1579_v30 }
 0x1fc   : > { %v1614_v27 = vld [vmem:[#allocation2 + $0x6c] sm:$0xf]  ;;  %v9200_v11 = vrot.slane %v1500_v57, 7  ;;  %1560 = vst [vmem:[#allocation2 + $0xc] sm:$0xf] %v1559_v39  ;;  %v11380_v1 = vrot.slane %v9013_v3, 4  ;;  %v9209_v47 = vor.u32 %v1495_v41, %v1494_v50 }
 0x1fd   : > { %1564 = vst [vmem:[#allocation2 + $0x14] sm:$0x1] %v1563_v56  ;;  %v1625_v26 = vld [vmem:[#allocation2 + $0x80] sm:$0x1]  ;;  %v1635_v13 = vld [vmem:[#allocation2 + $0x90] sm:$0xf] }
 0x1fe   : > { %v1570_v17 = vsel %vm8448_vm4, %v11380_v1, %v1569_v16  ;;  %v1628_v48 = vld [vmem:[#allocation2 + $0x84] sm:$0xf]  ;;  %v1632_v14 = vld [vmem:[#allocation2 + $0x8c] sm:$0x1]  ;;  %v1498_v0 = vrot.slane %v1494_v50, 4  ;;  %v11381_v35 = vrot.slane %v9021_v22, 4  ;;  %v1505_v41 = vor.u32 %v1503_v38, %v9200_v11 }
 0x1ff   : > { %1567 = vst [vmem:[#allocation2 + $0x18] sm:$0xf] %v1566_v42  ;;  %1571 = vst [vmem:[#allocation2 + $0x20] sm:$0x1] %v1570_v17  ;;  %v1639_v4 = vld [vmem:[#allocation2 + $0x98] sm:$0x1] }
 0x200   : > { %v1577_v3 = vsel %vm8448_vm4, %v11381_v35, %v1576_v44  ;;  %1652 = vst.msk [vmem:[#allocation2 + $0xac] sm:$0xf] %vm1027_vm8, %v1472_v46  ;;  %v1649_v16 = vld [vmem:[#allocation2 + $0xa8] sm:$0xf]  ;;  %v1642_v57 = vld [vmem:[#allocation2 + $0x9c] sm:$0xf]  ;;  %v1506_v1 = vsel %vm8897_vm13, %v1498_v0, %v1505_v41 }
 0x201   : > { %v1646_v39 = vld [vmem:[#allocation2 + $0xa4] sm:$0x1]  ;;  %v1507_v50 = vrot.slane %v9200_v11, 4  ;;  %1574 = vst [vmem:[#allocation2 + $0x24] sm:$0xf] %v1573_v5  ;;  %v11382_v22 = vrot.slane %v9045_v8, 4  ;;  %v1587_v11 = vsel %vm9166_vm14, %v9056_v40, %v1586_v49  ;;  %v1594_v8 = vsel %vm9166_vm14, %v9071_v51, %v1593_v37 }
 0x202   : > { %1578 = vst [vmem:[#allocation2 + $0x2c] sm:$0x1] %v1577_v3  ;;  %v1653_v44 = vld [vmem:[#allocation2 + $0xb0] sm:$0x1]  ;;  %v1663_v56 = vld [vmem:[#allocation2 + $0xc0] sm:$0xf] }
 0x203   : > { %v1584_v25 = vsel %vm8448_vm4, %v11382_v22, %v1583_v28  ;;  %v1656_v46 = vld [vmem:[#allocation2 + $0xb4] sm:$0xf]  ;;  %v1667_v42 = vld [vmem:[#allocation2 + $0xc8] sm:$0x1]  ;;  %1581 = vst [vmem:[#allocation2 + $0x30] sm:$0xf] %v1580_v12 }
 0x204   : > { %1585 = vst [vmem:[#allocation2 + $0x38] sm:$0x1] %v1584_v25  ;;  %v11383_v38 = vrot.slane %v9047_v52, 4  ;;  %v11384_v30 = vrot.slane %v9062_v9, 4  ;;  %1588 = vst [vmem:[#allocation2 + $0x3c] sm:$0xf] %v1587_v11  ;;  %v1601_v52 = vsel %vm9166_vm14, %v9085_v31, %v1600_v24  ;;  %v1608_v9 = vsel %vm9166_vm14, %v9098_v33, %v1607_v54 }
 0x205   : > { %1595 = vst [vmem:[#allocation2 + $0x48] sm:$0xf] %v1594_v8  ;;  %v11385_v40 = vrot.slane %v9076_v55, 4  ;;  %1602 = vst [vmem:[#allocation2 + $0x54] sm:$0xf] %v1601_v52  ;;  %v11386_v29 = vrot.slane %v9090_v62, 4  ;;  %v1615_v24 = vsel %vm9166_vm14, %v9103_v53, %v1614_v27  ;;  %v1629_v53 = vsel %vm9166_vm14, %v9132_v10, %v1628_v48 }
 0x206   : > { %v1591_v63 = vsel %vm8448_vm4, %v11383_v38, %v1590_v36  ;;  %v1598_v28 = vsel %vm8448_vm4, %v11384_v30, %v1597_v34  ;;  %1609 = vst [vmem:[#allocation2 + $0x60] sm:$0xf] %v1608_v9  ;;  %v11387_v55 = vrot.slane %v9105_v32, 4  ;;  %v1622_v34 = vsel %vm9166_vm14, %v9116_v45, %v1621_v43  ;;  %1666 = vst.msk [vmem:[#allocation2 + $0xc4] sm:$0xf] %vm1027_vm8, %v1506_v1 }
 0x207   : > { %1592 = vst [vmem:[#allocation2 + $0x44] sm:$0x1] %v1591_v63  ;;  %1599 = vst [vmem:[#allocation2 + $0x50] sm:$0x1] %v1598_v28  ;;  %v1605_v51 = vsel %vm8448_vm4, %v11385_v40, %v1604_v58  ;;  %v1612_v36 = vsel %vm8448_vm4, %v11386_v29, %v1611_v60  ;;  %v11388_v62 = vrot.slane %v9118_v59, 4  ;;  %v1636_v45 = vsel %vm9166_vm14, %v9140_v61, %v1635_v13 }
 0x208   : > { %1606 = vst [vmem:[#allocation2 + $0x5c] sm:$0x1] %v1605_v51  ;;  %v1619_v31 = vsel %vm8448_vm4, %v11387_v55, %v1618_v7  ;;  %1613 = vst [vmem:[#allocation2 + $0x68] sm:$0x1] %v1612_v36  ;;  %v11389_v7 = vrot.slane %v9128_v15, 4  ;;  %v11390_v59 = vrot.slane %v9142_v2, 4  ;;  %v1643_v15 = vsel %vm9166_vm14, %v9162_v6, %v1642_v57 }
 0x209   : > { %1616 = vst [vmem:[#allocation2 + $0x6c] sm:$0xf] %v1615_v24  ;;  %1620 = vst [vmem:[#allocation2 + $0x74] sm:$0x1] %v1619_v31  ;;  %v1626_v33 = vsel %vm8448_vm4, %v11388_v62, %v1625_v26  ;;  %v1673_v37 = vld [vmem:[#allocation2 + $0x10] sm:$0xf]  ;;  %v1650_v54 = vsel %vm9166_vm14, %v9180_v20, %v1649_v16  ;;  %v1664_v20 = vsel %vm9166_vm14, %v9209_v47, %v1663_v56 }
 0x20a   : > { %1623 = vst [vmem:[#allocation2 + $0x78] sm:$0xf] %v1622_v34  ;;  %v1633_v32 = vsel %vm8448_vm4, %v11389_v7, %v1632_v14  ;;  %v9283_v49 = vld [vmem:[#allocation2 + $0x10] sm:$0xf]  ;;  %1627 = vst [vmem:[#allocation2 + $0x80] sm:$0x1] %v1626_v33  ;;  %v1640_v10 = vsel %vm8448_vm4, %v11390_v59, %v1639_v4  ;;  %v1668_v26 = vsel %vm8448_vm4, %v1507_v50, %v1667_v42 }
 0x20b   : > { %1630 = vst [vmem:[#allocation2 + $0x84] sm:$0xf] %v1629_v53  ;;  %1634 = vst [vmem:[#allocation2 + $0x8c] sm:$0x1] %v1633_v32  ;;  %v11391_v27 = vrot.slane %v9155_v18, 4  ;;  %v11392_v2 = vrot.slane %v9172_v23, 4 }
 0x20c   : > { %1637 = vst [vmem:[#allocation2 + $0x90] sm:$0xf] %v1636_v45  ;;  %v1672_v58 = vld [vmem:[#allocation2 + $0xc] sm:$0xf]  ;;  %v1707_v60 = vld [vmem:[#allocation2 + $0x14] sm:$0x1] }
 0x20d   : > { %v1647_v61 = vsel %vm8448_vm4, %v11391_v27, %v1646_v39  ;;  %v3520_v43 = vld [vmem:[#allocation2 + $0xc] sm:$0xf]  ;;  %1641 = vst [vmem:[#allocation2 + $0x98] sm:$0x1] %v1640_v10  ;;  %1644 = vst [vmem:[#allocation2 + $0x9c] sm:$0xf] %v1643_v15  ;;  %v1654_v6 = vsel %vm8448_vm4, %v11392_v2, %v1653_v44 }
 0x20e   : > { %1648 = vst [vmem:[#allocation2 + $0xa4] sm:$0x1] %v1647_v61  ;;  %1651 = vst [vmem:[#allocation2 + $0xa8] sm:$0xf] %v1650_v54  ;;  %v11393_v18 = vld [vmem:[#allocation7_spill] sm:$0xff]  ;;  %v1750_v13 = vshrl.u32 %v1672_v58, 16 }
 0x20f   : > { %v1657_v17 = vsel %vm9166_vm14, %v11393_v18, %v1656_v46  ;;  %1655 = vst [vmem:[#allocation2 + $0xb0] sm:$0x1] %v1654_v6  ;;  %1665 = vst [vmem:[#allocation2 + $0xc0] sm:$0xf] %v1664_v20  ;;  %v1753_v23 = vshll.u32 %v1672_v58, 16  ;;  %v1759_v48 = vshll.u32 %v1673_v37, 16 }
 0x210   : > { %1658 = vst [vmem:[#allocation2 + $0xb4] sm:$0xf] %v1657_v17  ;;  %1669 = vst [vmem:[#allocation2 + $0xc8] sm:$0x1] %v1668_v26  ;;  %v1763_v14 = vshrl.u32 %v1673_v37, 16  ;;  %v1769_v0 = vshll.u32 %v1707_v60, 16 }
 0x211   : > { %v9311_v5 = vld [vmem:[#allocation2 + $0x14] sm:$0x1]  ;;  %v3569_v35 = vshrl.u32 %v3520_v43, 16  ;;  %v3572_v3 = vshll.u32 %v3520_v43, 16  ;;  %v3578_v4 = vshll.u32 %v9283_v49, 16  ;;  %v1752_v19 = vrot.slane %v1750_v13, 4 }
 0x212   : > { %v1755_v47 = vrot.slane %v1753_v23, 5  ;;  %v1761_v16 = vrot.slane %v1759_v48, 5  ;;  %v1765_v21 = vrot.slane %v1763_v14, 4  ;;  %v1674_v57 = vld [vmem:[#allocation2 + $0x18] sm:$0xf]  ;;  %v3582_v25 = vshrl.u32 %v9283_v49, 16 }
 0x213   : > { %v3571_v39 = vrot.slane %v3569_v35, 4  ;;  %v3574_v41 = vrot.slane %v3572_v3, 5  ;;  %v3580_v50 = vrot.slane %v3578_v4, 5  ;;  %v3588_v44 = vshll.u32 %v9311_v5, 16  ;;  %v1675_v56 = vld [vmem:[#allocation2 + $0x1c] sm:$0xf] }
 0x214   : > { %v1756_v12 = vor.u32 %v1755_v47, %v1752_v19  ;;  %v1766_v22 = vor.u32 %v1765_v21, %v1761_v16  ;;  %v1771_v46 = vrot.slane %v1769_v0, 5  ;;  %v1774_v11 = vshrl.u32 %v1674_v57, 16  ;;  %v1708_v28 = vld [vmem:[#allocation2 + $0x20] sm:$0x1]  ;;  %v3523_v9 = vld [vmem:[#allocation2 + $0x18] sm:$0xf] }
 0x215   : > { %v3575_v42 = vor.u32 %v3574_v41, %v3571_v39  ;;  %v3584_v8 = vrot.slane %v3582_v25, 4  ;;  %v3590_v30 = vrot.slane %v3588_v44, 5  ;;  %v1777_v40 = vshll.u32 %v1674_v57, 16  ;;  %v9320_v34 = vld [vmem:[#allocation2 + $0x1c] sm:$0xf]  ;;  %v8120_v62 = vld [vmem:[%s11337_s5] sm:$0xff]  }
 0x216   : > { %v1757_v38 = vrot.slane %v1756_v12, 4  ;;  %v1767_v63 = vrot.slane %v1766_v22, 4  ;;  %v1776_v52 = vrot.slane %v1774_v11, 4  ;;  %v1783_v51 = vshll.u32 %v1675_v56, 16  ;;  %7508 = vmatprep.subr.bf16.mxu0 %v8120_v62  ;;  %v3525_v27 = vld [vmem:[#allocation2 + $0x20] sm:$0x1] }
 0x217   : > { %v3576_v1 = vrot.slane %v3575_v42, 4  ;;  %v3585_v55 = vor.u32 %v3584_v8, %v3580_v50  ;;  %v1787_v31 = vshrl.u32 %v1675_v56, 16  ;;  %v1779_v7 = vrot.slane %v1777_v40, 5  ;;  %v3526_v18 = vld [vmem:[#allocation2 + $0x24] sm:$0xf]  ;;  %v8121_v23 = vld [vmem:[%s11337_s5 + $0x8] sm:$0xff]  }
 0x218   : > { %v1762_v36 = vsel %vm8825_vm11, %v1757_v38, %v1761_v16  ;;  %v1772_v24 = vsel %vm8825_vm11, %v1767_v63, %v1771_v46  ;;  %v1785_v32 = vrot.slane %v1783_v51, 5  ;;  %v1793_v59 = vshll.u32 %v1708_v28, 16  ;;  %v3527_v47 = vld [vmem:[#allocation2 + $0x28] sm:$0xf]  ;;  %v3528_v16 = vld [vmem:[#allocation2 + $0x2c] sm:$0x1] }
 0x219   : > { %v6859_v33 = vcombine.low %v1762_v36, %v1772_v24  ;;  %v3581_v53 = vsel %vm8825_vm11, %v3576_v1, %v3580_v50  ;;  %v3586_v45 = vrot.slane %v3585_v55, 4  ;;  %v1789_v37 = vrot.slane %v1787_v31, 4  ;;  %v1676_v12 = vld [vmem:[#allocation2 + $0x24] sm:$0xf]  ;;  %v1677_v63 = vld [vmem:[#allocation2 + $0x28] sm:$0xf] }
 0x21a   : > { %v3593_v10 = vshrl.u32 %v3523_v9, 16  ;;  %v1780_v15 = vor.u32 %v1779_v7, %v1776_v52  ;;  %v3596_v61 = vshll.u32 %v3523_v9, 16  ;;  %v3602_v54 = vshll.u32 %v9320_v34, 16  ;;  %v1709_v28 = vld [vmem:[#allocation2 + $0x2c] sm:$0x1] }
 0x21b   : > { %7477 = vmatmul.mubr.msk.bf16.vlgmr.msra.gmra.mrb[32].mxu0 %vm680_vm7, %v6859_v33  ;;  %v3606_v58 = vshrl.u32 %v9320_v34, 16  ;;  %v3591_v60 = vsel %vm8825_vm11, %v3586_v45, %v3590_v30  ;;  %v1790_v2 = vor.u32 %v1789_v37, %v1785_v32  ;;  %v1795_v14 = vrot.slane %v1793_v59, 5  ;;  %v1678_v24 = vld [vmem:[#allocation2 + $0x30] sm:$0xf] }
 0x21c   : > { %v3595_v6 = vrot.slane %v3593_v10, 4  ;;  %7509 = vmatpush3.bf16.msra.mxu0 %v8120_v62  ;;  %v7010_v17 = vcombine.low %v3581_v53, %v3591_v60  ;;  %v1781_v20 = vrot.slane %v1780_v15, 4  ;;  %v3598_v26 = vrot.slane %v3596_v61, 5  ;;  %v8119_v53 = vld [vmem:[%s11337_s5 + $0x58] sm:$0xff]   ;;  %v1679_v15 = vld [vmem:[#allocation2 + $0x34] sm:$0xf] }
 0x21d   : > { %v3604_v13 = vrot.slane %v3602_v54, 5  ;;  %v1791_v48 = vrot.slane %v1790_v2, 4  ;;  %v3608_v0 = vrot.slane %v3606_v58, 4  ;;  %v3612_v35 = vshll.u32 %v3525_v27, 16  ;;  %7510 = vmatprep.subr.bf16.mxu0 %v8121_v23  ;;  %v8183_v54 = vld [vmem:[%s11337_s5 + $0x50] sm:$0xff]  }
 0x21e   : > { %7620 = vmatprep.mubr.msk.bf16.mxu1 %vm680_vm7, %v7010_v17  ;;  %v1786_v4 = vsel %vm8825_vm11, %v1781_v20, %v1785_v32  ;;  %v3599_v19 = vor.u32 %v3598_v26, %v3595_v6  ;;  %v3617_v21 = vshrl.u32 %v3526_v18, 16  ;;  %v3620_v56 = vshll.u32 %v3526_v18, 16  ;;  %v1710_v18 = vld [vmem:[#allocation2 + $0x38] sm:$0x1]  ;;  %v8203_v29 = vld [vmem:[#allocation2 + $0x50] sm:$0x1] }
 0x21f   : > { %v1796_v57 = vsel %vm8825_vm11, %v1791_v48, %v1795_v14  ;;  %v3609_v39 = vor.u32 %v3608_v0, %v3604_v13  ;;  %v3614_v41 = vrot.slane %v3612_v35, 5  ;;  %v3626_v42 = vshll.u32 %v3527_v47, 16  ;;  %v8123_v48 = vld [vmem:[%s11337_s5 + $0x60] sm:$0xff]  }
 0x220   : > { %7511 = vmatpush3.bf16.msra.mxu0 %v8121_v23  ;;  %v6860_v22 = vcombine.low %v1786_v4, %v1796_v57  ;;  %v3600_v25 = vrot.slane %v3599_v19, 4  ;;  %v3619_v44 = vrot.slane %v3617_v21, 4  ;;  %v3630_v11 = vshrl.u32 %v3527_v47, 16  ;;  %v3529_v23 = vld [vmem:[#allocation2 + $0x30] sm:$0xf] }
 0x221   : > { %v3610_v46 = vrot.slane %v3609_v39, 4  ;;  %v3636_v38 = vshll.u32 %v3528_v16, 16  ;;  %v3622_v30 = vrot.slane %v3620_v56, 5  ;;  %v1798_v1 = vshrl.u32 %v1676_v12, 16  ;;  %v3530_v19 = vld [vmem:[#allocation2 + $0x34] sm:$0xf] }
 0x222   : > { %7480 = vmatprep.mubr.msk.bf16.mxu0 %vm680_vm7, %v6860_v22  ;;  %v3605_v8 = vsel %vm8825_vm11, %v3600_v25, %v3604_v13  ;;  %v1801_v52 = vshll.u32 %v1676_v12, 16  ;;  %v3628_v51 = vrot.slane %v3626_v42, 5  ;;  %v3632_v9 = vrot.slane %v3630_v11, 4  ;;  %v3531_v22 = vld [vmem:[#allocation2 + $0x38] sm:$0x1] }
 0x223   : > { %v3615_v40 = vsel %vm8825_vm11, %v3610_v46, %v3614_v41  ;;  %v3638_v36 = vrot.slane %v3636_v38, 5  ;;  %v3623_v31 = vor.u32 %v3622_v30, %v3619_v44  ;;  %v1800_v62 = vrot.slane %v1798_v1, 4  ;;  %v3532_v11 = vld [vmem:[#allocation2 + $0x3c] sm:$0xf] }
 0x224   : > { %v7011_v55 = vcombine.low %v3605_v8, %v3615_v40  ;;  %v1803_v33 = vrot.slane %v1801_v52, 5  ;;  %v3633_v7 = vor.u32 %v3632_v9, %v3628_v51  ;;  %v1807_v32 = vshll.u32 %v1677_v63, 16 }
 0x225   : > { %v1811_v45 = vshrl.u32 %v1677_v63, 16  ;;  %v1817_v37 = vshll.u32 %v1709_v28, 16  ;;  %v3624_v59 = vrot.slane %v3623_v31, 4  ;;  %v1822_v27 = vshrl.u32 %v1678_v24, 16  ;;  %v3533_v28 = vld [vmem:[#allocation2 + $0x40] sm:$0xf] }
 0x226   : > { %7621 = vmatmul.mubr.msk.bf16.vlgmr.msra.gmra.mrb[0].mxu1 %vm680_vm7, %v7011_v55  ;;  %v1804_v10 = vor.u32 %v1803_v33, %v1800_v62  ;;  %v1825_v61 = vshll.u32 %v1678_v24, 16  ;;  %v3634_v58 = vrot.slane %v3633_v7, 4  ;;  %v1809_v60 = vrot.slane %v1807_v32, 5  ;;  %v3534_v55 = vld [vmem:[#allocation2 + $0x44] sm:$0x1] }
 0x227   : > { %7653 = vmatpush3.bf16.msra.mxu1 %v8183_v54  ;;  %v1813_v2 = vrot.slane %v1811_v45, 4  ;;  %v1819_v6 = vrot.slane %v1817_v37, 5  ;;  %v3629_v17 = vsel %vm8825_vm11, %v3624_v59, %v3628_v51  ;;  %v1824_v26 = vrot.slane %v1822_v27, 4  ;;  %v1680_v32 = vld [vmem:[#allocation2 + $0x3c] sm:$0xf] }
 0x228   : > { %v1805_v20 = vrot.slane %v1804_v10, 4  ;;  %v1827_v13 = vrot.slane %v1825_v61, 5  ;;  %7654 = vmatprep.subr.bf16.mxu1 %v8119_v53  ;;  %v3639_v14 = vsel %vm8825_vm11, %v3634_v58, %v3638_v36  ;;  %v1831_v35 = vshll.u32 %v1679_v15, 16 }
 0x229   : > { %v1814_v0 = vor.u32 %v1813_v2, %v1809_v60  ;;  %v1835_v4 = vshrl.u32 %v1679_v15, 16  ;;  %v7012_v47 = vcombine.low %v3629_v17, %v3639_v14  ;;  %v1841_v57 = vshll.u32 %v1710_v18, 16  ;;  %v1681_v15 = vld [vmem:[#allocation2 + $0x40] sm:$0xf] }
 0x22a   : > { %v1810_v16 = vsel %vm8825_vm11, %v1805_v20, %v1809_v60  ;;  %v1828_v21 = vor.u32 %v1827_v13, %v1824_v26  ;;  %v1833_v41 = vrot.slane %v1831_v35, 5  ;;  %v3641_v25 = vshrl.u32 %v3529_v23, 16  ;;  %v1711_v26 = vld [vmem:[#allocation2 + $0x44] sm:$0x1] }
 0x22b   : > { %v1815_v39 = vrot.slane %v1814_v0, 4  ;;  %v1837_v12 = vrot.slane %v1835_v4, 4  ;;  %7655 = vmatpush3.bf16.msra.mxu1 %v8119_v53  ;;  %7624 = vmatprep.mubr.msk.bf16.mxu1 %vm680_vm7, %v7012_v47  ;;  %v1843_v56 = vrot.slane %v1841_v57, 5  ;;  %v3644_v46 = vshll.u32 %v3529_v23, 16 }
 0x22c   : > { %v1829_v44 = vrot.slane %v1828_v21, 4  ;;  %v3650_v42 = vshll.u32 %v3530_v19, 16  ;;  %7688 = vmatprep.subr.bf16.mxu1 %v8123_v48  ;;  %v3643_v8 = vrot.slane %v3641_v25, 4  ;;  %v3654_v30 = vshrl.u32 %v3530_v19, 16  ;;  %v1682_v48 = vld [vmem:[#allocation2 + $0x48] sm:$0xf] }
 0x22d   : > { %v1820_v38 = vsel %vm8825_vm11, %v1815_v39, %v1819_v6  ;;  %v1838_v63 = vor.u32 %v1837_v12, %v1833_v41  ;;  %v3646_v40 = vrot.slane %v3644_v46, 5  ;;  %v3660_v24 = vshll.u32 %v3531_v22, 16  ;;  %v1683_v19 = vld [vmem:[#allocation2 + $0x4c] sm:$0xf] }
 0x22e   : > { %v6861_v1 = vcombine.low %v1810_v16, %v1820_v38  ;;  %v1834_v52 = vsel %vm8825_vm11, %v1829_v44, %v1833_v41  ;;  %v3652_v51 = vrot.slane %v3650_v42, 5  ;;  %v3656_v36 = vrot.slane %v3654_v30, 4 }
 0x22f   : > { %v1839_v9 = vrot.slane %v1838_v63, 4  ;;  %v3665_v31 = vshrl.u32 %v3532_v11, 16  ;;  %v3647_v62 = vor.u32 %v3646_v40, %v3643_v8  ;;  %v3668_v33 = vshll.u32 %v3532_v11, 16  ;;  %v3535_v11 = vld [vmem:[#allocation2 + $0x48] sm:$0xf] }
 0x230   : > { %7481 = vmatmul.mubr.msk.bf16.gmra.mrb[36].mxu0 %vm680_vm7, %v6861_v1  ;;  %v3674_v53 = vshll.u32 %v3533_v28, 16  ;;  %v3678_v7 = vshrl.u32 %v3533_v28, 16  ;;  %v3657_v37 = vor.u32 %v3656_v36, %v3652_v51  ;;  %v3662_v59 = vrot.slane %v3660_v24, 5  ;;  %v3536_v28 = vld [vmem:[#allocation2 + $0x4c] sm:$0xf] }
 0x231   : > { %v1844_v45 = vsel %vm8825_vm11, %v1839_v9, %v1843_v56  ;;  %v3667_v10 = vrot.slane %v3665_v31, 4  ;;  %v3648_v61 = vrot.slane %v3647_v62, 4  ;;  %v3670_v54 = vrot.slane %v3668_v33, 5  ;;  %v1712_v56 = vld [vmem:[#allocation2 + $0x50] sm:$0x1] }
 0x232   : > { %v6862_v27 = vcombine.low %v1834_v52, %v1844_v45  ;;  %v3676_v58 = vrot.slane %v3674_v53, 5  ;;  %v3658_v60 = vrot.slane %v3657_v37, 4  ;;  %v3680_v2 = vrot.slane %v3678_v7, 4  ;;  %v3537_v33 = vld [vmem:[#allocation2 + $0x50] sm:$0x1] }
 0x233   : > { %v3684_v6 = vshll.u32 %v3534_v55, 16  ;;  %v1846_v18 = vshrl.u32 %v1680_v32, 16  ;;  %v3653_v17 = vsel %vm8825_vm11, %v3648_v61, %v3652_v51  ;;  %v3671_v20 = vor.u32 %v3670_v54, %v3667_v10 }
 0x234   : > { %7484 = vmatprep.mubr.msk.bf16.mxu0 %vm680_vm7, %v6862_v27  ;;  %v1849_v13 = vshll.u32 %v1680_v32, 16  ;;  %v1855_v23 = vshll.u32 %v1681_v15, 16  ;;  %v3663_v14 = vsel %vm8825_vm11, %v3658_v60, %v3662_v59  ;;  %v3681_v0 = vor.u32 %v3680_v2, %v3676_v58  ;;  %v3538_v32 = vld [vmem:[#allocation2 + $0x54] sm:$0xf] }
 0x235   : > { %v3686_v35 = vrot.slane %v3684_v6, 5  ;;  %v1848_v4 = vrot.slane %v1846_v18, 4  ;;  %v7013_v47 = vcombine.low %v3653_v17, %v3663_v14  ;;  %v3672_v16 = vrot.slane %v3671_v20, 4  ;;  %v9387_v6 = vld [vmem:[#allocation2 + $0x58] sm:$0xf] }
 0x236   : > { %v1851_v21 = vrot.slane %v1849_v13, 5  ;;  %v1857_v57 = vrot.slane %v1855_v23, 5  ;;  %v3682_v39 = vrot.slane %v3681_v0, 4  ;;  %v1859_v41 = vshrl.u32 %v1681_v15, 16  ;;  %v3540_v23 = vld [vmem:[#allocation2 + $0x5c] sm:$0x1] }
 0x237   : > { %v1865_v12 = vshll.u32 %v1711_v26, 16  ;;  %v1870_v22 = vshrl.u32 %v1682_v48, 16  ;;  %7625 = vmatmul.mubr.msk.bf16.gmra.mrb[4].mxu1 %vm680_vm7, %v7013_v47  ;;  %v3677_v25 = vsel %vm8825_vm11, %v3672_v16, %v3676_v58  ;;  %v1873_v46 = vshll.u32 %v1682_v48, 16  ;;  %v1684_v48 = vld [vmem:[#allocation2 + $0x54] sm:$0xf] }
 0x238   : > { %v1852_v44 = vor.u32 %v1851_v21, %v1848_v4  ;;  %v1879_v42 = vshll.u32 %v1683_v19, 16  ;;  %v3687_v38 = vsel %vm8825_vm11, %v3682_v39, %v3686_v35  ;;  %v1861_v63 = vrot.slane %v1859_v41, 4 }
 0x239   : > { %v1867_v8 = vrot.slane %v1865_v12, 5  ;;  %v1872_v30 = vrot.slane %v1870_v22, 4  ;;  %v7014_v1 = vcombine.low %v3677_v25, %v3687_v38  ;;  %v1875_v40 = vrot.slane %v1873_v46, 5  ;;  %v1685_v12 = vld [vmem:[#allocation2 + $0x58] sm:$0xf] }
 0x23a   : > { %v1853_v52 = vrot.slane %v1852_v44, 4  ;;  %v1881_v51 = vrot.slane %v1879_v42, 5  ;;  %v1862_v9 = vor.u32 %v1861_v63, %v1857_v57  ;;  %v1883_v36 = vshrl.u32 %v1683_v19, 16  ;;  %v1713_v42 = vld [vmem:[#allocation2 + $0x5c] sm:$0x1] }
 0x23b   : > { %v1889_v24 = vshll.u32 %v1712_v56, 16  ;;  %v3689_v55 = vshrl.u32 %v3535_v11, 16  ;;  %7628 = vmatprep.mubr.msk.bf16.mxu1 %vm680_vm7, %v7014_v1  ;;  %v1876_v62 = vor.u32 %v1875_v40, %v1872_v30  ;;  %v3692_v53 = vshll.u32 %v3535_v11, 16  ;;  %v1686_v11 = vld [vmem:[#allocation2 + $0x60] sm:$0xf] }
 0x23c   : > { %v1858_v31 = vsel %vm8825_vm11, %v1853_v52, %v1857_v57  ;;  %v3698_v7 = vshll.u32 %v3536_v28, 16  ;;  %v1863_v45 = vrot.slane %v1862_v9, 4  ;;  %v1885_v37 = vrot.slane %v1883_v36, 4 }
 0x23d   : > { %v1891_v59 = vrot.slane %v1889_v24, 5  ;;  %v3691_v10 = vrot.slane %v3689_v55, 4  ;;  %v1877_v15 = vrot.slane %v1876_v62, 4  ;;  %v3694_v27 = vrot.slane %v3692_v53, 5 }
 0x23e   : > { %v3700_v61 = vrot.slane %v3698_v7, 5  ;;  %v3702_v54 = vshrl.u32 %v3536_v28, 16  ;;  %v1868_v58 = vsel %vm8825_vm11, %v1863_v45, %v1867_v8  ;;  %v1886_v60 = vor.u32 %v1885_v37, %v1881_v51 }
 0x23f   : > { %v3708_v2 = vshll.u32 %v3537_v33, 16  ;;  %v3713_v18 = vshrl.u32 %v3538_v32, 16  ;;  %v6863_v17 = vcombine.low %v1858_v31, %v1868_v58  ;;  %v1882_v20 = vsel %vm8825_vm11, %v1877_v15, %v1881_v51  ;;  %v1687_v51 = vld [vmem:[#allocation2 + $0x64] sm:$0xf]  ;;  %v1714_v31 = vld [vmem:[#allocation2 + $0x68] sm:$0x1] }
 0x240   : > { %v3695_v26 = vor.u32 %v3694_v27, %v3691_v10  ;;  %v3704_v13 = vrot.slane %v3702_v54, 4  ;;  %v1887_v14 = vrot.slane %v1886_v60, 4  ;;  %v3716_v4 = vshll.u32 %v3538_v32, 16  ;;  %v9404_v10 = vld [vmem:[#allocation2 + $0x64] sm:$0xf] }
 0x241   : > { %v3710_v0 = vrot.slane %v3708_v2, 5  ;;  %v3715_v35 = vrot.slane %v3713_v18, 4  ;;  %7485 = vmatmul.mubr.msk.bf16.gmra.mrb[40].mxu0 %vm680_vm7, %v6863_v17  ;;  %v3722_v16 = vshll.u32 %v9387_v6, 16  ;;  %v3726_v21 = vshrl.u32 %v9387_v6, 16  ;;  %v3541_v58 = vld [vmem:[#allocation2 + $0x60] sm:$0xf] }
 0x242   : > { %v3696_v19 = vrot.slane %v3695_v26, 4  ;;  %v3705_v47 = vor.u32 %v3704_v13, %v3700_v61  ;;  %v1892_v57 = vsel %vm8825_vm11, %v1887_v14, %v1891_v59  ;;  %v3718_v39 = vrot.slane %v3716_v4, 5 }
 0x243   : > { %v3732_v41 = vshll.u32 %v3540_v23, 16  ;;  %v1894_v22 = vshrl.u32 %v1684_v48, 16  ;;  %v6864_v25 = vcombine.low %v1882_v20, %v1892_v57  ;;  %v3724_v46 = vrot.slane %v3722_v16, 5 }
 0x244   : > { %v3701_v44 = vsel %vm8825_vm11, %v3696_v19, %v3700_v61  ;;  %v3706_v56 = vrot.slane %v3705_v47, 4  ;;  %v3719_v38 = vor.u32 %v3718_v39, %v3715_v35  ;;  %v3728_v63 = vrot.slane %v3726_v21, 4  ;;  %v3544_v19 = vld [vmem:[#allocation2 + $0x6c] sm:$0xf] }
 0x245   : > { %v3734_v8 = vrot.slane %v3732_v41, 5  ;;  %v1896_v30 = vrot.slane %v1894_v22, 4  ;;  %7488 = vmatprep.mubr.msk.bf16.mxu0 %vm680_vm7, %v6864_v25  ;;  %v1897_v1 = vshll.u32 %v1684_v48, 16  ;;  %v1903_v52 = vshll.u32 %v1685_v12, 16  ;;  %v3543_v48 = vld [vmem:[#allocation2 + $0x68] sm:$0x1] }
 0x246   : > { %v3711_v28 = vsel %vm8825_vm11, %v3706_v56, %v3710_v0  ;;  %v1907_v40 = vshrl.u32 %v1685_v12, 16  ;;  %v3720_v36 = vrot.slane %v3719_v38, 4  ;;  %v3729_v24 = vor.u32 %v3728_v63, %v3724_v46  ;;  %v9414_v25 = vld [vmem:[#allocation2 + $0x70] sm:$0xf] }
 0x247   : > { %v7015_v9 = vcombine.low %v3701_v44, %v3711_v28  ;;  %v1913_v55 = vshll.u32 %v1713_v42, 16  ;;  %v1899_v62 = vrot.slane %v1897_v1, 5  ;;  %v1905_v33 = vrot.slane %v1903_v52, 5 }
 0x248   : > { %v1909_v53 = vrot.slane %v1907_v40, 4  ;;  %v1918_v7 = vshrl.u32 %v1686_v11, 16  ;;  %v3725_v32 = vsel %vm8825_vm11, %v3720_v36, %v3724_v46  ;;  %v3730_v45 = vrot.slane %v3729_v24, 4 }
 0x249   : > { %7629 = vmatmul.mubr.msk.bf16.gmra.mrb[8].mxu1 %vm680_vm7, %v7015_v9  ;;  %v1915_v37 = vrot.slane %v1913_v55, 5  ;;  %v1921_v59 = vshll.u32 %v1686_v11, 16  ;;  %v1900_v15 = vor.u32 %v1899_v62, %v1896_v30  ;;  %v1927_v54 = vshll.u32 %v1687_v51, 16  ;;  %v9417_v11 = vld [vmem:[#allocation2 + $0x74] sm:$0x1] }
 0x24a   : > { %v1910_v27 = vor.u32 %v1909_v53, %v1905_v33  ;;  %v1920_v61 = vrot.slane %v1918_v7, 4  ;;  %v3735_v60 = vsel %vm8825_vm11, %v3730_v45, %v3734_v8  ;;  %v1931_v18 = vshrl.u32 %v1687_v51, 16  ;;  %v9423_v51 = vld [vmem:[#allocation2 + $0x6c] sm:$0xf] }
 0x24b   : > { %v1923_v2 = vrot.slane %v1921_v59, 5  ;;  %v1937_v17 = vshll.u32 %v1714_v31, 16  ;;  %v7016_v20 = vcombine.low %v3725_v32, %v3735_v60  ;;  %v1901_v26 = vrot.slane %v1900_v15, 4  ;;  %v9428_v31 = vld [vmem:[#allocation2 + $0x70] sm:$0xf] }
 0x24c   : > { %v1911_v13 = vrot.slane %v1910_v27, 4  ;;  %v1929_v23 = vrot.slane %v1927_v54, 5  ;;  %v1933_v0 = vrot.slane %v1931_v18, 4  ;;  %v3737_v4 = vshrl.u32 %v3541_v58, 16  ;;  %v1715_v59 = vld [vmem:[#allocation2 + $0x74] sm:$0x1] }
 0x24d   : > { %v1924_v14 = vor.u32 %v1923_v2, %v1920_v61  ;;  %v1939_v35 = vrot.slane %v1937_v17, 5  ;;  %7632 = vmatprep.mubr.msk.bf16.mxu1 %vm680_vm7, %v7016_v20  ;;  %v1906_v47 = vsel %vm8825_vm11, %v1901_v26, %v1905_v33  ;;  %v3740_v21 = vshll.u32 %v3541_v58, 16  ;;  %v9435_v27 = vld [vmem:[%s11337_s5 + $0x20] sm:$0xff]   ;;  %v9442_v2 = vld [vmem:[#allocation2 + $0x78] sm:$0xf] }
 0x24e   : > { %v1916_v16 = vsel %vm8825_vm11, %v1911_v13, %v1915_v37  ;;  %v3746_v57 = vshll.u32 %v9404_v10, 16  ;;  %v1934_v12 = vor.u32 %v1933_v0, %v1929_v23  ;;  %v3739_v22 = vrot.slane %v3737_v4, 4  ;;  %v9444_v18 = vld [vmem:[#allocation2 + $0x7c] sm:$0xf]  ;;  %7544 = vmatprep.subr.bf16.mxu0 %v9435_v27 }
 0x24f   : > { %v6865_v39 = vcombine.low %v1906_v47, %v1916_v16  ;;  %v1925_v41 = vrot.slane %v1924_v14, 4  ;;  %v3742_v44 = vrot.slane %v3740_v21, 5  ;;  %v3750_v46 = vshrl.u32 %v9404_v10, 16 }
 0x250   : > { %v3748_v56 = vrot.slane %v3746_v57, 5  ;;  %v3756_v42 = vshll.u32 %v3543_v48, 16  ;;  %v1935_v63 = vrot.slane %v1934_v12, 4  ;;  %v3761_v8 = vshrl.u32 %v3544_v19, 16  ;;  %v1716_v57 = vld [vmem:[#allocation2 + $0x80] sm:$0x1] }
 0x251   : > { %7489 = vmatmul.mubr.msk.bf16.gmra.mrb[44].mxu0 %vm680_vm7, %v6865_v39  ;;  %v1930_v38 = vsel %vm8825_vm11, %v1925_v41, %v1929_v23  ;;  %v3764_v30 = vshll.u32 %v3544_v19, 16  ;;  %v3743_v28 = vor.u32 %v3742_v44, %v3739_v22  ;;  %v3752_v1 = vrot.slane %v3750_v46, 4  ;;  %v9454_v12 = vld [vmem:[#allocation2 + $0x7c] sm:$0xf] }
 0x252   : > { %v3758_v52 = vrot.slane %v3756_v42, 5  ;;  %v3770_v40 = vshll.u32 %v9414_v25, 16  ;;  %v1940_v9 = vsel %vm8825_vm11, %v1935_v63, %v1939_v35  ;;  %v3763_v36 = vrot.slane %v3761_v8, 4  ;;  %v3547_v42 = vld [vmem:[#allocation2 + $0x78] sm:$0xf] }
 0x253   : > { %v3766_v24 = vrot.slane %v3764_v30, 5  ;;  %v3774_v55 = vshrl.u32 %v9414_v25, 16  ;;  %v6866_v62 = vcombine.low %v1930_v38, %v1940_v9  ;;  %v3744_v33 = vrot.slane %v3743_v28, 4  ;;  %v9461_v9 = vld [vmem:[#allocation2 + $0x80] sm:$0x1] }
 0x254   : > { %v3753_v53 = vor.u32 %v3752_v1, %v3748_v56  ;;  %v3772_v7 = vrot.slane %v3770_v40, 5  ;;  %v3780_v37 = vshll.u32 %v9417_v11, 16  ;;  %v1942_v15 = vshrl.u32 %v9423_v51, 16 }
 0x255   : > { %v3767_v32 = vor.u32 %v3766_v24, %v3763_v36  ;;  %v3776_v45 = vrot.slane %v3774_v55, 4  ;;  %7492 = vmatprep.mubr.msk.bf16.mxu0 %vm680_vm7, %v6866_v62  ;;  %v3749_v61 = vsel %vm8825_vm11, %v3744_v33, %v3748_v56  ;;  %v1945_v58 = vshll.u32 %v9423_v51, 16 }
 0x256   : > { %v3754_v54 = vrot.slane %v3753_v53, 4  ;;  %v1951_v60 = vshll.u32 %v9428_v31, 16  ;;  %v3782_v26 = vrot.slane %v3780_v37, 5  ;;  %v1944_v13 = vrot.slane %v1942_v15, 4 }
 0x257   : > { %v3768_v17 = vrot.slane %v3767_v32, 4  ;;  %v3777_v20 = vor.u32 %v3776_v45, %v3772_v7  ;;  %v1947_v48 = vrot.slane %v1945_v58, 5  ;;  %v1955_v0 = vshrl.u32 %v9428_v31, 16  ;;  %v3550_v45 = vld [vmem:[#allocation2 + $0x84] sm:$0xf] }
 0x258   : > { %v3759_v23 = vsel %vm8825_vm11, %v3754_v54, %v3758_v52  ;;  %v1953_v14 = vrot.slane %v1951_v60, 5  ;;  %v1961_v47 = vshll.u32 %v1715_v59, 16  ;;  %v1966_v39 = vshrl.u32 %v9442_v2, 16  ;;  %v9470_v54 = vld [vmem:[#allocation2 + $0x88] sm:$0xf] }
 0x259   : > { %v7017_v35 = vcombine.low %v3749_v61, %v3759_v23  ;;  %v3773_v4 = vsel %vm8825_vm11, %v3768_v17, %v3772_v7  ;;  %v3778_v19 = vrot.slane %v3777_v20, 4  ;;  %v1948_v16 = vor.u32 %v1947_v48, %v1944_v13 }
 0x25a   : > { %v1957_v21 = vrot.slane %v1955_v0, 4  ;;  %v1969_v41 = vshll.u32 %v9442_v2, 16  ;;  %v1963_v44 = vrot.slane %v1961_v47, 5  ;;  %v1975_v56 = vshll.u32 %v9444_v18, 16  ;;  %v9475_v0 = vld [vmem:[#allocation2 + $0x84] sm:$0xf] }
 0x25b   : > { %7633 = vmatmul.mubr.msk.bf16.gmra.mrb[12].mxu1 %vm680_vm7, %v7017_v35  ;;  %v3783_v22 = vsel %vm8825_vm11, %v3778_v19, %v3782_v26  ;;  %v1979_v46 = vshrl.u32 %v9444_v18, 16  ;;  %v1949_v63 = vrot.slane %v1948_v16, 4  ;;  %v1968_v30 = vrot.slane %v1966_v39, 4  ;;  %v9472_v26 = vld [vmem:[#allocation2 + $0x8c] sm:$0x1] }
 0x25c   : > { %v7018_v38 = vcombine.low %v3773_v4, %v3783_v22  ;;  %v1958_v8 = vor.u32 %v1957_v21, %v1953_v14  ;;  %v1971_v28 = vrot.slane %v1969_v41, 5  ;;  %v1977_v1 = vrot.slane %v1975_v56, 5  ;;  %v9483_v41 = vld [vmem:[#allocation2 + $0x88] sm:$0xf] }
 0x25d   : > { %v1981_v52 = vrot.slane %v1979_v46, 4  ;;  %v1985_v40 = vshll.u32 %v1716_v57, 16  ;;  %v1954_v36 = vsel %vm8825_vm11, %v1949_v63, %v1953_v14  ;;  %v3785_v55 = vshrl.u32 %v3547_v42, 16 }
 0x25e   : > { %7636 = vmatprep.mubr.msk.bf16.mxu1 %vm680_vm7, %v7018_v38  ;;  %v1959_v24 = vrot.slane %v1958_v8, 4  ;;  %v3788_v62 = vshll.u32 %v3547_v42, 16  ;;  %v1972_v33 = vor.u32 %v1971_v28, %v1968_v30  ;;  %v3794_v32 = vshll.u32 %v9454_v12, 16  ;;  %v1717_v8 = vld [vmem:[#allocation2 + $0x8c] sm:$0x1] }
 0x25f   : > { %v1982_v53 = vor.u32 %v1981_v52, %v1977_v1  ;;  %v1987_v7 = vrot.slane %v1985_v40, 5  ;;  %v3787_v59 = vrot.slane %v3785_v55, 4  ;;  %v3798_v61 = vshrl.u32 %v9454_v12, 16 }
 0x260   : > { %v1964_v37 = vsel %vm8825_vm11, %v1959_v24, %v1963_v44  ;;  %v3790_v15 = vrot.slane %v3788_v62, 5  ;;  %v1973_v60 = vrot.slane %v1972_v33, 4  ;;  %v3796_v20 = vrot.slane %v3794_v32, 5 }
 0x261   : > { %v6867_v58 = vcombine.low %v1954_v36, %v1964_v37  ;;  %v1983_v17 = vrot.slane %v1982_v53, 4  ;;  %v3800_v23 = vrot.slane %v3798_v61, 4  ;;  %v3804_v48 = vshll.u32 %v9461_v9, 16  ;;  %v9493_v36 = vld [vmem:[#allocation2 + $0x90] sm:$0xf] }
 0x262   : > { %v3791_v13 = vor.u32 %v3790_v15, %v3787_v59  ;;  %v3809_v14 = vshrl.u32 %v3550_v45, 16  ;;  %v1978_v35 = vsel %vm8825_vm11, %v1973_v60, %v1977_v1  ;;  %v3812_v19 = vshll.u32 %v3550_v45, 16  ;;  %v9498_v53 = vld [vmem:[#allocation2 + $0x94] sm:$0xf] }
 0x263   : > { %7493 = vmatmul.mubr.msk.bf16.gmra.mrb[48].mxu0 %vm680_vm7, %v6867_v58  ;;  %v1988_v4 = vsel %vm8825_vm11, %v1983_v17, %v1987_v7  ;;  %v3818_v47 = vshll.u32 %v9470_v54, 16  ;;  %v3801_v57 = vor.u32 %v3800_v23, %v3796_v20  ;;  %v3806_v39 = vrot.slane %v3804_v48, 5 }
 0x264   : > { %v6868_v16 = vcombine.low %v1978_v35, %v1988_v4  ;;  %v3792_v21 = vrot.slane %v3791_v13, 4  ;;  %v3811_v22 = vrot.slane %v3809_v14, 4  ;;  %v3814_v44 = vrot.slane %v3812_v19, 5  ;;  %v1718_v13 = vld [vmem:[#allocation2 + $0x98] sm:$0x1] }
 0x265   : > { %v3820_v56 = vrot.slane %v3818_v47, 5  ;;  %v3822_v46 = vshrl.u32 %v9470_v54, 16  ;;  %v3802_v38 = vrot.slane %v3801_v57, 4  ;;  %v3828_v63 = vshll.u32 %v9472_v26, 16  ;;  %v3553_v19 = vld [vmem:[#allocation2 + $0x90] sm:$0xf] }
 0x266   : > { %7496 = vmatprep.mubr.msk.bf16.mxu0 %vm680_vm7, %v6868_v16  ;;  %v3797_v42 = vsel %vm8825_vm11, %v3792_v21, %v3796_v20  ;;  %v1990_v30 = vshrl.u32 %v9475_v0, 16  ;;  %v3815_v28 = vor.u32 %v3814_v44, %v3811_v22  ;;  %v1993_v52 = vshll.u32 %v9475_v0, 16 }
 0x267   : > { %v3824_v1 = vrot.slane %v3822_v46, 4  ;;  %v1999_v40 = vshll.u32 %v9483_v41, 16  ;;  %v3807_v24 = vsel %vm8825_vm11, %v3802_v38, %v3806_v39  ;;  %v3830_v55 = vrot.slane %v3828_v63, 5  ;;  %v9509_v39 = vld [vmem:[#allocation2 + $0x94] sm:$0xf] }
 0x268   : > { %v1992_v62 = vrot.slane %v1990_v30, 4  ;;  %v2003_v33 = vshrl.u32 %v9483_v41, 16  ;;  %v7019_v7 = vcombine.low %v3797_v42, %v3807_v24  ;;  %v3816_v32 = vrot.slane %v3815_v28, 4  ;;  %v9511_v42 = vld [vmem:[#allocation2 + $0x98] sm:$0x1] }
 0x269   : > { %v3825_v45 = vor.u32 %v3824_v1, %v3820_v56  ;;  %v1995_v37 = vrot.slane %v1993_v52, 5  ;;  %v2001_v59 = vrot.slane %v1999_v40, 5  ;;  %v2009_v61 = vshll.u32 %v1717_v8, 16  ;;  %v3556_v24 = vld [vmem:[#allocation2 + $0x9c] sm:$0xf] }
 0x26a   : > { %v2005_v15 = vrot.slane %v2003_v33, 4  ;;  %v2014_v58 = vshrl.u32 %v9493_v36, 16  ;;  %7637 = vmatmul.mubr.msk.bf16.gmra.mrb[16].mxu1 %vm680_vm7, %v7019_v7  ;;  %v3821_v60 = vsel %vm8825_vm11, %v3816_v32, %v3820_v56  ;;  %v2017_v23 = vshll.u32 %v9493_v36, 16  ;;  %v9519_v32 = vld [vmem:[#allocation2 + $0xa0] sm:$0xf] }
 0x26b   : > { %v3826_v17 = vrot.slane %v3825_v45, 4  ;;  %v1996_v20 = vor.u32 %v1995_v37, %v1992_v62  ;;  %v2011_v14 = vrot.slane %v2009_v61, 5  ;;  %v2023_v4 = vshll.u32 %v9498_v53, 16 }
 0x26c   : > { %v2006_v48 = vor.u32 %v2005_v15, %v2001_v59  ;;  %v2016_v35 = vrot.slane %v2014_v58, 4  ;;  %v2019_v21 = vrot.slane %v2017_v23, 5  ;;  %v2027_v57 = vshrl.u32 %v9498_v53, 16 }
 0x26d   : > { %v3831_v47 = vsel %vm8825_vm11, %v3826_v17, %v3830_v55  ;;  %v1997_v16 = vrot.slane %v1996_v20, 4  ;;  %v2025_v56 = vrot.slane %v2023_v4, 5  ;;  %v2033_v46 = vshll.u32 %v1718_v13, 16  ;;  %v9528_v13 = vld [vmem:[#allocation2 + $0xa0] sm:$0xf] }
 0x26e   : > { %v7020_v22 = vcombine.low %v3821_v60, %v3831_v47  ;;  %v2007_v44 = vrot.slane %v2006_v48, 4  ;;  %v2020_v63 = vor.u32 %v2019_v21, %v2016_v35  ;;  %v2029_v8 = vrot.slane %v2027_v57, 4  ;;  %v9526_v60 = vld [vmem:[#allocation2 + $0xa4] sm:$0x1]  ;;  %v9531_v4 = vld [vmem:[#allocation2 + $0x9c] sm:$0xf] }
 0x26f   : > { %v2002_v38 = vsel %vm8825_vm11, %v1997_v16, %v2001_v59  ;;  %v3833_v30 = vshrl.u32 %v3553_v19, 16  ;;  %v2035_v1 = vrot.slane %v2033_v46, 5  ;;  %v3836_v52 = vshll.u32 %v3553_v19, 16 }
 0x270   : > { %7640 = vmatprep.mubr.msk.bf16.mxu1 %vm680_vm7, %v7020_v22  ;;  %v2012_v28 = vsel %vm8825_vm11, %v2007_v44, %v2011_v14  ;;  %v3842_v40 = vshll.u32 %v9509_v39, 16  ;;  %v2021_v62 = vrot.slane %v2020_v63, 4  ;;  %v2030_v33 = vor.u32 %v2029_v8, %v2025_v56  ;;  %v9537_v8 = vld [vmem:[#allocation2 + $0xa4] sm:$0x1] }
 0x271   : > { %v6869_v55 = vcombine.low %v2002_v38, %v2012_v28  ;;  %v3835_v7 = vrot.slane %v3833_v30, 4  ;;  %v3838_v45 = vrot.slane %v3836_v52, 5  ;;  %v3846_v59 = vshrl.u32 %v9509_v39, 16  ;;  %11395 = vst [vmem:[#allocation7_spill] sm:$0xff] %v9537_v8 }
 0x272   : > { %v3844_v37 = vrot.slane %v3842_v40, 5  ;;  %v3852_v15 = vshll.u32 %v9511_v42, 16  ;;  %v2026_v61 = vsel %vm8825_vm11, %v2021_v62, %v2025_v56  ;;  %v2031_v58 = vrot.slane %v2030_v33, 4 }
 0x273   : > { %7497 = vmatmul.mubr.msk.bf16.gmra.mrb[52].mxu0 %vm680_vm7, %v6869_v55  ;;  %v3857_v17 = vshrl.u32 %v3556_v24, 16  ;;  %v3860_v20 = vshll.u32 %v3556_v24, 16  ;;  %v3839_v23 = vor.u32 %v3838_v45, %v3835_v7  ;;  %v3848_v48 = vrot.slane %v3846_v59, 4  ;;  %v9545_v24 = vld [vmem:[#allocation2 + $0xa8] sm:$0xf] }
 0x274   : > { %v3854_v14 = vrot.slane %v3852_v15, 5  ;;  %v3866_v35 = vshll.u32 %v9519_v32, 16  ;;  %v2036_v19 = vsel %vm8825_vm11, %v2031_v58, %v2035_v1  ;;  %v3870_v21 = vshrl.u32 %v9519_v32, 16  ;;  %v9547_v45 = vld [vmem:[#allocation2 + $0xac] sm:$0xf] }
 0x275   : > { %v3859_v47 = vrot.slane %v3857_v17, 4  ;;  %v3862_v16 = vrot.slane %v3860_v20, 5  ;;  %v6870_v57 = vcombine.low %v2026_v61, %v2036_v19  ;;  %v3840_v22 = vrot.slane %v3839_v23, 4  ;;  %v9552_v58 = vld [vmem:[#allocation2 + $0xb0] sm:$0x1] }
 0x276   : > { %v3849_v44 = vor.u32 %v3848_v48, %v3844_v37  ;;  %v3868_v56 = vrot.slane %v3866_v35, 5  ;;  %v3872_v38 = vrot.slane %v3870_v21, 4  ;;  %v3876_v63 = vshll.u32 %v9526_v60, 16  ;;  %11396 = vst [vmem:[#allocation8_spill] sm:$0xff] %v9552_v58  ;;  %v3559_v35 = vld [vmem:[#allocation2 + $0xa8] sm:$0xf] }
 0x277   : > { %v3863_v46 = vor.u32 %v3862_v16, %v3859_v47  ;;  %v2038_v30 = vshrl.u32 %v9531_v4, 16  ;;  %7500 = vmatprep.mubr.msk.bf16.mxu0 %vm680_vm7, %v6870_v57  ;;  %v3845_v28 = vsel %vm8825_vm11, %v3840_v22, %v3844_v37  ;;  %v2041_v52 = vshll.u32 %v9531_v4, 16 }
 0x278   : > { %v3850_v1 = vrot.slane %v3849_v44, 4  ;;  %v2047_v40 = vshll.u32 %v9528_v13, 16  ;;  %v3873_v62 = vor.u32 %v3872_v38, %v3868_v56  ;;  %v3878_v33 = vrot.slane %v3876_v63, 5 }
 0x279   : > { %v3864_v55 = vrot.slane %v3863_v46, 4  ;;  %v2040_v7 = vrot.slane %v2038_v30, 4  ;;  %v2043_v15 = vrot.slane %v2041_v52, 5  ;;  %v2051_v37 = vshrl.u32 %v9528_v13, 16  ;;  %v9564_v30 = vld [vmem:[#allocation2 + $0xac] sm:$0xf] }
 0x27a   : > { %v3855_v59 = vsel %vm8825_vm11, %v3850_v1, %v3854_v14  ;;  %v2049_v61 = vrot.slane %v2047_v40, 5  ;;  %v3874_v23 = vrot.slane %v3873_v62, 4  ;;  %v2057_v48 = vshll.u32 %v9537_v8, 16 }
 0x27b   : > { %v7021_v17 = vcombine.low %v3845_v28, %v3855_v59  ;;  %v3869_v20 = vsel %vm8825_vm11, %v3864_v55, %v3868_v56  ;;  %v2044_v19 = vor.u32 %v2043_v15, %v2040_v7  ;;  %v2053_v47 = vrot.slane %v2051_v37, 4  ;;  %v9570_v59 = vld [vmem:[#allocation2 + $0xb8] sm:$0xf] }
 0x27c   : > { %v2062_v16 = vshrl.u32 %v9545_v24, 16  ;;  %v2065_v14 = vshll.u32 %v9545_v24, 16  ;;  %v3879_v21 = vsel %vm8825_vm11, %v3874_v23, %v3878_v33  ;;  %v2059_v57 = vrot.slane %v2057_v48, 5  ;;  %v3562_v48 = vld [vmem:[#allocation2 + $0xb4] sm:$0xf] }
 0x27d   : > { %7641 = vmatmul.mubr.msk.bf16.gmra.mrb[20].mxu1 %vm680_vm7, %v7021_v17  ;;  %v2071_v22 = vshll.u32 %v9547_v45, 16  ;;  %v2075_v44 = vshrl.u32 %v9547_v45, 16  ;;  %v7022_v56 = vcombine.low %v3869_v20, %v3879_v21  ;;  %v2045_v46 = vrot.slane %v2044_v19, 4  ;;  %v9572_v20 = vld [vmem:[#allocation2 + $0xb0] sm:$0x1] }
 0x27e   : > { %v2054_v38 = vor.u32 %v2053_v47, %v2049_v61  ;;  %v2064_v63 = vrot.slane %v2062_v16, 4  ;;  %v2067_v28 = vrot.slane %v2065_v14, 5  ;;  %v2081_v40 = vshll.u32 %v9552_v58, 16 }
 0x27f   : > { %v2073_v1 = vrot.slane %v2071_v22, 5  ;;  %v2077_v52 = vrot.slane %v2075_v44, 4  ;;  %7644 = vmatprep.mubr.msk.bf16.mxu1 %vm680_vm7, %v7022_v56  ;;  %v2050_v55 = vsel %vm8825_vm11, %v2045_v46, %v2049_v61  ;;  %v3881_v33 = vshrl.u32 %v3559_v35, 16  ;;  %v9578_v44 = vld [vmem:[#allocation2 + $0xbc] sm:$0x1] }
 0x280   : > { %v2055_v62 = vrot.slane %v2054_v38, 4  ;;  %v3884_v7 = vshll.u32 %v3559_v35, 16  ;;  %v2068_v15 = vor.u32 %v2067_v28, %v2064_v63  ;;  %v2083_v17 = vrot.slane %v2081_v40, 5 }
 0x281   : > { %v2078_v37 = vor.u32 %v2077_v52, %v2073_v1  ;;  %v3890_v23 = vshll.u32 %v9564_v30, 16  ;;  %v3883_v47 = vrot.slane %v3881_v33, 4  ;;  %v3894_v61 = vshrl.u32 %v9564_v30, 16 }
 0x282   : > { %v2060_v19 = vsel %vm8825_vm11, %v2055_v62, %v2059_v57  ;;  %v3886_v16 = vrot.slane %v3884_v7, 5  ;;  %v2069_v21 = vrot.slane %v2068_v15, 4  ;;  %v3900_v38 = vshll.u32 %v9572_v20, 16 }
 0x283   : > { %v6871_v14 = vcombine.low %v2050_v55, %v2060_v19  ;;  %v2079_v35 = vrot.slane %v2078_v37, 4  ;;  %v3892_v22 = vrot.slane %v3890_v23, 5  ;;  %v3896_v46 = vrot.slane %v3894_v61, 4  ;;  %v9587_v55 = vld [vmem:[#allocation2 + $0xb4] sm:$0xf] }
 0x284   : > { %v3887_v56 = vor.u32 %v3886_v16, %v3883_v47  ;;  %v3905_v63 = vshrl.u32 %v3562_v48, 16  ;;  %v2074_v57 = vsel %vm8825_vm11, %v2069_v21, %v2073_v1  ;;  %v3908_v52 = vshll.u32 %v3562_v48, 16  ;;  %v9589_v37 = vld [vmem:[#allocation2 + $0xb8] sm:$0xf]  ;;  %v9592_v1 = vld [vmem:[#allocation2 + $0xbc] sm:$0x1] }
 0x285   : > { %7501 = vmatmul.mubr.msk.bf16.gmra.mrb[56].mxu0 %vm680_vm7, %v6871_v14  ;;  %v2084_v28 = vsel %vm8825_vm11, %v2079_v35, %v2083_v17  ;;  %v3914_v40 = vshll.u32 %v9570_v59, 16  ;;  %v3897_v7 = vor.u32 %v3896_v46, %v3892_v22  ;;  %v3902_v15 = vrot.slane %v3900_v38, 5  ;;  %11397 = vst [vmem:[#allocation9_spill] sm:$0xff] %v9592_v1  ;;  %v3565_v21 = vld [vmem:[#allocation2 + $0xc0] sm:$0xf] }
 0x286   : > { %v6872_v62 = vcombine.low %v2074_v57, %v2084_v28  ;;  %v3888_v33 = vrot.slane %v3887_v56, 4  ;;  %v3907_v23 = vrot.slane %v3905_v63, 4  ;;  %v3910_v19 = vrot.slane %v3908_v52, 5  ;;  %v9601_v63 = vld [vmem:[#allocation2 + $0xc4] sm:$0xf] }
 0x287   : > { %v3916_v47 = vrot.slane %v3914_v40, 5  ;;  %v3918_v16 = vshrl.u32 %v9570_v59, 16  ;;  %v3898_v48 = vrot.slane %v3897_v7, 4  ;;  %v3924_v61 = vshll.u32 %v9578_v44, 16 }
 0x288   : > { %7504 = vmatprep.mubr.msk.bf16.mxu0 %vm680_vm7, %v6872_v62  ;;  %v3893_v17 = vsel %vm8825_vm11, %v3888_v33, %v3892_v22  ;;  %v2086_v14 = vshrl.u32 %v9587_v55, 16  ;;  %v3911_v35 = vor.u32 %v3910_v19, %v3907_v23  ;;  %v2089_v46 = vshll.u32 %v9587_v55, 16 }
 0x289   : > { %v3920_v56 = vrot.slane %v3918_v16, 4  ;;  %v2095_v38 = vshll.u32 %v9589_v37, 16  ;;  %v3903_v57 = vsel %vm8825_vm11, %v3898_v48, %v3902_v15  ;;  %v3926_v28 = vrot.slane %v3924_v61, 5  ;;  %v9610_v48 = vld [vmem:[#allocation2 + $0xc8] sm:$0x1] }
 0x28a   : > { %v2088_v52 = vrot.slane %v2086_v14, 4  ;;  %v2099_v22 = vshrl.u32 %v9589_v37, 16  ;;  %v7023_v40 = vcombine.low %v3893_v17, %v3903_v57  ;;  %v3912_v62 = vrot.slane %v3911_v35, 4 }
 0x28b   : > { %v3921_v33 = vor.u32 %v3920_v56, %v3916_v47  ;;  %v2091_v7 = vrot.slane %v2089_v46, 5  ;;  %v2097_v3 = vrot.slane %v2095_v38, 5  ;;  %v2105_v19 = vshll.u32 %v9592_v1, 16 }
 0x28c   : > { %v2101_v23 = vrot.slane %v2099_v22, 4  ;;  %v3929_v16 = vshrl.u32 %v3565_v21, 16  ;;  %7645 = vmatmul.mubr.msk.bf16.gmra.mrb[24].mxu1 %vm680_vm7, %v7023_v40  ;;  %v3917_v43 = vsel %vm8825_vm11, %v3912_v62, %v3916_v47  ;;  %v3932_v61 = vshll.u32 %v3565_v21, 16  ;;  %v4257_v40 = vld [vmem:[#allocation2 + $0xc] sm:$0xe] }
 0x28d   : > { %v3922_v50 = vrot.slane %v3921_v33, 4  ;;  %v2092_v15 = vor.u32 %v2091_v7, %v2088_v52  ;;  %v2107_v17 = vrot.slane %v2105_v19, 5  ;;  %v3938_v56 = vshll.u32 %v9601_v63, 16 }
 0x28e   : > { %v2102_v14 = vor.u32 %v2101_v23, %v2097_v3  ;;  %v3931_v35 = vrot.slane %v3929_v16, 4  ;;  %v3934_v57 = vrot.slane %v3932_v61, 5  ;;  %v3942_v22 = vshrl.u32 %v9601_v63, 16 }
 0x28f   : > { %v3927_v46 = vsel %vm8825_vm11, %v3922_v50, %v3926_v28  ;;  %v2093_v38 = vrot.slane %v2092_v15, 4  ;;  %v3940_v62 = vrot.slane %v3938_v56, 5  ;;  %v3948_v52 = vshll.u32 %v9610_v48, 16  ;;  %v4258_v28 = vld [vmem:[#allocation2 + $0x18] sm:$0xe] }
 0x290   : > { %v7024_v1 = vcombine.low %v3917_v43, %v3927_v46  ;;  %v2103_v47 = vrot.slane %v2102_v14, 4  ;;  %v3935_v33 = vor.u32 %v3934_v57, %v3931_v35  ;;  %v3944_v7 = vrot.slane %v3942_v22, 4  ;;  %v8184_v56 = vld [vmem:[#allocation2 + $0x20] sm:$0x1]  ;;  %v9634_v22 = vld [vmem:[#allocation2 + $0x4] sm:$0xf] }
 0x291   : > { %v2098_v21 = vsel %vm8825_vm11, %v2093_v38, %v2097_v3  ;;  %v11398_v23 = vrot.slane %v9320_v34, 5  ;;  %v7044_v43 = vrot.slane %v4257_v40, 9  ;;  %v11401_v3 = vrot.slane %v9283_v49, 5  ;;  %v8185_v57 = vld [vmem:[#allocation2] sm:$0xf] }
 0x292   : > { %7648 = vmatprep.mubr.msk.bf16.mxu1 %vm680_vm7, %v7024_v1  ;;  %v2108_v50 = vsel %vm8825_vm11, %v2103_v47, %v2107_v17  ;;  %v3936_v15 = vrot.slane %v3935_v33, 4  ;;  %v3945_v61 = vor.u32 %v3944_v7, %v3940_v62  ;;  %v4333_v46 = vrot.slane %v8184_v56, 5 }
 0x293   : > { %v4332_v19 = vrot.slane %v11398_v23, 4  ;;  %v6873_v16 = vcombine.low %v2098_v21, %v2108_v50  ;;  %v4325_v35 = vrot.slane %v11401_v3, 4  ;;  %v3950_v38 = vrot.slane %v3948_v52, 5  ;;  %v8187_v50 = vld [vmem:[#allocation2 + $0x28] sm:$0xf] }
 0x294   : > { %v11402_v1 = vmov %v11401_v3  ;;  %v6892_v40 = vcombine.low %v8185_v57, %v9634_v22  ;;  %v3941_v47 = vsel %vm8825_vm11, %v3936_v15, %v3940_v62  ;;  %v3946_v21 = vrot.slane %v3945_v61, 4  ;;  %v4259_v3 = vld [vmem:[#allocation2 + $0x24] sm:$0xe]  ;;  %v8192_v57 = vld [vmem:[#allocation2 + $0x2c] sm:$0x1] }
 0x295   : > { %v4324_v17 = vsel %vm9624_vm1, %v7044_v43, %v11402_v1  ;;  %7505 = vmatmul.mubr.msk.bf16.gmra.mrb[60].mxu0 %vm680_vm7, %v6873_v16  ;;  %v11403_v33 = vrot.slane %v9311_v5, 5  ;;  %v7045_v49 = vrot.slane %v4258_v28, 9  ;;  %v4334_v23 = vsel %vm9624_vm1, %v4332_v19, %v4333_v46  ;;  %v8189_v19 = vld [vmem:[#allocation2 + $0xc] sm:$0xf]  ;;  %v8190_v46 = vld [vmem:[#allocation2 + $0x18] sm:$0xf] }
 0x296   : > { %7512 = vmatprep.mubr.msk.bf16.mxu0 %vm680_vm7, %v6892_v40  ;;  %v4337_v43 = vrot.slane %v8187_v50, 5  ;;  %v3951_v16 = vsel %vm8825_vm11, %v3946_v21, %v3950_v38  ;;  %v11404_v62 = vrot.slane %v9320_v34, 5  ;;  %v8141_v34 = vld [vmem:[%s11337_s5 + $0x28] sm:$0xff]   ;;  %v9661_v38 = vld [vmem:[#allocation2 + $0x1c] sm:$0xf]  ;;  %v4340_v40 = vrot.slane %v8192_v57, 5 }
 0x297   : > { %v4327_v52 = vsel %vm9624_vm1, %v4325_v35, %v11403_v33  ;;  %v7025_v15 = vcombine.low %v3941_v47, %v3951_v16  ;;  %v9655_v35 = vld [vmem:[#allocation2 + $0x10] sm:$0xf]  ;;  %v6894_v1 = vcombine.low %v8190_v46, %v9661_v38  ;;  %v8193_v47 = vld [vmem:[#allocation2 + $0x34] sm:$0xf]  ;;  %v8194_v33 = vld [vmem:[#allocation2 + $0x40] sm:$0xf] }
 0x298   : > { %v7060_v7 = vcombine.low %v4324_v17, %v4327_v52  ;;  %v4331_v5 = vsel %vm9624_vm1, %v7045_v49, %v11404_v62  ;;  %v4339_v28 = vrot.slane %v4337_v43, 4  ;;  %v6893_v56 = vcombine.low %v8189_v19, %v9655_v35  ;;  %v4261_v50 = vld [vmem:[#allocation2 + $0x3c] sm:$0xe]  ;;  %v8195_v16 = vld [vmem:[#allocation2 + $0x4c] sm:$0xf]  ;;  %v8196_v46 = vld [vmem:[%s11337_s5 + $0x60] sm:$0xff]  }
 0x299   : > { %v7061_v61 = vcombine.low %v4331_v5, %v4334_v23  ;;  %7649 = vmatmul.mubr.msk.bf16.gmra.mrb[28].mxu1 %vm680_vm7, %v7025_v15  ;;  %v7046_v17 = vrot.slane %v4259_v3, 9  ;;  %v4344_v21 = vrot.slane %v8193_v47, 5  ;;  %v4351_v52 = vrot.slane %v8194_v33, 5  ;;  %v8132_v5 = vld [vmem:[%s11337_s5 + $0x68] sm:$0xff]   ;;  %v9677_v15 = vld [vmem:[%s11337_s5 + $0x30] sm:$0xff]  }
 0x29a   : > { %7656 = vmatprep.mubr.msk.bf16.mxu1 %vm680_vm7, %v7060_v7  ;;  %v4341_v49 = vsel %vm9624_vm1, %v4339_v28, %v4340_v40  ;;  %v4260_v7 = vld [vmem:[#allocation2 + $0x30] sm:$0xe]  ;;  %v4358_v62 = vrot.slane %v8195_v16, 5  ;;  %11405 = vst [vmem:[#allocation10_spill] sm:$0xff] %v9677_v15  ;;  %v4365_v19 = vrot.slane %v9387_v6, 5  ;;  %v7048_v6 = vrot.slane %v4261_v50, 9 }
 0x29b   : > { %v4338_v23 = vsel %vm9624_vm1, %v7046_v17, %v4337_v43  ;;  %v4346_v28 = vrot.slane %v4344_v21, 4  ;;  %v7047_v43 = vrot.slane %v4260_v7, 9  ;;  %v9685_v17 = vld [vmem:[#allocation2 + $0x28] sm:$0xf]  ;;  %v8199_v40 = vld [vmem:[#allocation2 + $0x38] sm:$0x1] }
 0x29c   : > { %v7062_v3 = vcombine.low %v4338_v23, %v4341_v49  ;;  %v4347_v47 = vrot.slane %v8199_v40, 5  ;;  %v8200_v33 = vld [vmem:[#allocation2 + $0x44] sm:$0x1]  ;;  %v4263_v49 = vld [vmem:[#allocation2 + $0x54] sm:$0xe]  ;;  %v4360_v16 = vrot.slane %v4358_v62, 4 }
 0x29d   : > { %7513 = vmatmul.mubr.msk.bf16.vlgmr.msra.gmra.mrb[32].mxu0 %vm680_vm7, %v6893_v56  ;;  %v4262_v56 = vld [vmem:[#allocation2 + $0x48] sm:$0xe]  ;;  %v8201_v7 = vld [vmem:[#allocation2 + $0x30] sm:$0xf]  ;;  %v4367_v40 = vrot.slane %v4365_v19, 4  ;;  %v4361_v58 = vrot.slane %v8203_v29, 5 }
 0x29e   : > { %7516 = vmatprep.mubr.msk.bf16.mxu0 %vm680_vm7, %v6894_v1  ;;  %7545 = vmatpush3.bf16.msra.mxu0 %v9435_v27  ;;  %v4353_v27 = vrot.slane %v4351_v52, 4  ;;  %v8197_v1 = vld [vmem:[#allocation2 + $0x24] sm:$0xf]  ;;  %v4348_v50 = vsel %vm9624_vm1, %v4346_v28, %v4347_v47  ;;  %v7050_v8 = vrot.slane %v4263_v49, 9 }
 0x29f   : > { %7546 = vmatprep.subr.bf16.mxu0 %v8141_v34  ;;  %v6895_v57 = vcombine.low %v8197_v1, %v9685_v17  ;;  %v7049_v1 = vrot.slane %v4262_v56, 9  ;;  %v9710_v56 = vld [vmem:[#allocation2 + $0x4c] sm:$0xf]  ;;  %v4362_v49 = vsel %vm9624_vm1, %v4360_v16, %v4361_v58 }
 0x2a0   : > { %v4366_v58 = vsel %vm9624_vm1, %v7050_v8, %v4365_v19  ;;  %v4410_v19 = vrot.slane %v9526_v60, 5 }
 0x2a1   : > { %7657 = vmatmul.mubr.msk.bf16.vlgmr.msra.gmra.mrb[0].mxu1 %vm680_vm7, %v7061_v61  ;;  %v4354_v61 = vrot.slane %v8200_v33, 5  ;;  %v4268_v33 = vld [vmem:[#allocation2 + $0x90] sm:$0xe] }
 0x2a2   : > { %7547 = vmatpush3.bf16.msra.mxu0 %v8141_v34  ;;  %7689 = vmatpush3.bf16.msra.mxu1 %v8196_v46  ;;  %v9688_v34 = vld [vmem:[#allocation2 + $0x34] sm:$0xf] }
 0x2a3   : > { %7660 = vmatprep.mubr.msk.bf16.mxu1 %vm680_vm7, %v7062_v3  ;;  %11406 = vst [vmem:[#allocation11_spill] sm:$0xff] %v9688_v34  ;;  %v6896_v23 = vcombine.low %v8201_v7, %v9688_v34  ;;  %7690 = vmatprep.subr.bf16.mxu1 %v8132_v5  ;;  %v9694_v3 = vld [vmem:[%s11337_s5 + $0x70] sm:$0xff]   ;;  %v4355_v46 = vsel %vm9624_vm1, %v4353_v27, %v4354_v61  ;;  %v9707_v34 = vld [vmem:[#allocation2 + $0x40] sm:$0xf]  ;;  %v8206_v27 = vld [vmem:[#allocation2 + $0x48] sm:$0xf] }
 0x2a4   : > { %7580 = vmatprep.subr.bf16.mxu0 %v9677_v15  ;;  %v4345_v7 = vsel %vm9624_vm1, %v7047_v43, %v4344_v21  ;;  %v8204_v15 = vld [vmem:[#allocation2 + $0x3c] sm:$0xf]  ;;  %11407 = vst [vmem:[#allocation12_spill] sm:$0xff] %v9707_v34  ;;  %v6898_v47 = vcombine.low %v8206_v27, %v9710_v56  ;;  %v9722_v27 = vld [vmem:[#allocation2 + $0x58] sm:$0xf] }
 0x2a5   : > { %7517 = vmatmul.mubr.msk.bf16.gmra.mrb[36].mxu0 %vm680_vm7, %v6895_v57  ;;  %v4352_v57 = vsel %vm9624_vm1, %v7048_v6, %v4351_v52  ;;  %v6897_v28 = vcombine.low %v8204_v15, %v9707_v34  ;;  %v8208_v61 = vld [vmem:[#allocation2 + $0x5c] sm:$0x1]  ;;  %v4269_v21 = vld [vmem:[#allocation2 + $0x9c] sm:$0xe]  ;;  %v7063_v43 = vcombine.low %v4345_v7, %v4348_v50  ;;  %v7055_v52 = vrot.slane %v4268_v33, 9 }
 0x2a6   : > { %7520 = vmatprep.mubr.msk.bf16.mxu0 %vm680_vm7, %v6896_v23  ;;  %v4368_v23 = vrot.slane %v8208_v61, 5  ;;  %7691 = vmatpush3.bf16.msra.mxu1 %v8132_v5  ;;  %v7064_v29 = vcombine.low %v4352_v57, %v4355_v46  ;;  %v4359_v15 = vsel %vm9624_vm1, %v7049_v1, %v4358_v62  ;;  %v9720_v34 = vld [vmem:[#allocation2 + $0x54] sm:$0xf]  ;;  %v4400_v50 = vrot.slane %v9509_v39, 5  ;;  %v4270_v46 = vld [vmem:[#allocation2 + $0xa8] sm:$0xe] }
 0x2a7   : > { %7724 = vmatprep.subr.bf16.mxu1 %v9694_v3  ;;  %v6899_v5 = vcombine.low %v9720_v34, %v9722_v27  ;;  %v4372_v62 = vrot.slane %v9404_v10, 5  ;;  %v7056_v16 = vrot.slane %v4269_v21, 9  ;;  %v4407_v1 = vrot.slane %v9519_v32, 5 }
 0x2a8   : > { %v4369_v6 = vsel %vm9624_vm1, %v4367_v40, %v4368_v23  ;;  %v4271_v40 = vld [vmem:[#allocation2 + $0xb4] sm:$0xe]  ;;  %v7065_v33 = vcombine.low %v4359_v15, %v4362_v49  ;;  %v4379_v7 = vrot.slane %v9414_v25, 5  ;;  %v4402_v34 = vrot.slane %v4400_v50, 4  ;;  %v4264_v15 = vld [vmem:[#allocation2 + $0x60] sm:$0xe] }
 0x2a9   : > { %7661 = vmatmul.mubr.msk.bf16.gmra.mrb[4].mxu1 %vm680_vm7, %v7063_v43  ;;  %v4403_v39 = vrot.slane %v9511_v42, 5  ;;  %v7066_v57 = vcombine.low %v4366_v58, %v4369_v6  ;;  %v9737_v61 = vsel %vm9624_vm1, %v7055_v52, %v4400_v50  ;;  %v4409_v8 = vrot.slane %v4407_v1, 4  ;;  %v4272_v43 = vld [vmem:[#allocation2 + $0xc0] sm:$0xe] }
 0x2aa   : > { %7664 = vmatprep.mubr.msk.bf16.mxu1 %vm680_vm7, %v7064_v29  ;;  %v7057_v23 = vrot.slane %v4270_v46, 9  ;;  %v4414_v25 = vrot.slane %v9564_v30, 5  ;;  %v7058_v21 = vrot.slane %v4271_v40, 9  ;;  %v9751_v29 = vsel %vm9624_vm1, %v7056_v16, %v4407_v1  ;;  %v4265_v16 = vld [vmem:[#allocation2 + $0x6c] sm:$0xe] }
 0x2ab   : > { %v9743_v32 = vsel %vm9624_vm1, %v4402_v34, %v4403_v39  ;;  %v9755_v60 = vsel %vm9624_vm1, %v4409_v8, %v4410_v19  ;;  %v4374_v30 = vrot.slane %v4372_v62, 4  ;;  %v4417_v52 = vrot.slane %v9572_v20, 5  ;;  %v8211_v8 = vld [vmem:[#allocation2 + $0x60] sm:$0xf]  ;;  %v9786_v19 = vld [vmem:[#allocation2 + $0x64] sm:$0xf] }
 0x2ac   : > { %v7071_v42 = vcombine.low %v9737_v61, %v9743_v32  ;;  %v7072_v49 = vcombine.low %v9751_v29, %v9755_v60  ;;  %v4424_v50 = vrot.slane %v9578_v44, 5  ;;  %v7059_v46 = vrot.slane %v4272_v43, 9 }
 0x2ad   : > { %7521 = vmatmul.mubr.msk.bf16.gmra.mrb[40].mxu0 %vm680_vm7, %v6897_v28  ;;  %v4421_v28 = vrot.slane %v9570_v59, 5  ;;  %v4428_v58 = vrot.slane %v9601_v63, 5  ;;  %v4381_v1 = vrot.slane %v4379_v7, 4  ;;  %v9767_v59 = vsel %vm9624_vm1, %v7057_v23, %v4414_v25 }
 0x2ae   : > { %7524 = vmatprep.mubr.msk.bf16.mxu0 %vm680_vm7, %v6898_v47  ;;  %v4416_v47 = vrot.slane %v4414_v25, 4  ;;  %v4431_v39 = vrot.slane %v9610_v48, 5  ;;  %v6900_v23 = vcombine.low %v8211_v8, %v9786_v19  ;;  %v7051_v25 = vrot.slane %v4264_v15, 9 }
 0x2af   : > { %v4423_v6 = vrot.slane %v4421_v28, 4  ;;  %v9775_v20 = vsel %vm9624_vm1, %v7058_v21, %v4421_v28  ;;  %v4430_v34 = vrot.slane %v4428_v58, 4  ;;  %v8213_v21 = vld [vmem:[#allocation2 + $0x68] sm:$0x1]  ;;  %v7052_v28 = vrot.slane %v4265_v16, 9 }
 0x2b0   : > { %v9771_v40 = vsel %vm9624_vm1, %v4416_v47, %v4417_v52  ;;  %v4382_v47 = vrot.slane %v9417_v11, 5  ;;  %v9794_v52 = vsel %vm9624_vm1, %v7059_v46, %v4428_v58  ;;  %v4386_v15 = vrot.slane %v9454_v12, 5  ;;  %v4266_v12 = vld [vmem:[#allocation2 + $0x78] sm:$0xe] }
 0x2b1   : > { %7665 = vmatmul.mubr.msk.bf16.gmra.mrb[8].mxu1 %vm680_vm7, %v7065_v33  ;;  %v7073_v44 = vcombine.low %v9767_v59, %v9771_v40  ;;  %v9782_v63 = vsel %vm9624_vm1, %v4423_v6, %v4424_v50  ;;  %v4375_v33 = vrot.slane %v8213_v21, 5  ;;  %v9798_v48 = vsel %vm9624_vm1, %v4430_v34, %v4431_v39  ;;  %v8214_v21 = vld [vmem:[#allocation2 + $0x8] sm:$0x1]  ;;  %v2686_v40 = vld [vmem:[#allocation2 + $0x24] sm:$0xe] }
 0x2b2   : > { %7668 = vmatprep.mubr.msk.bf16.mxu1 %vm680_vm7, %v7066_v57  ;;  %v7074_v43 = vcombine.low %v9775_v20, %v9782_v63  ;;  %v7075_v6 = vcombine.low %v9794_v52, %v9798_v48  ;;  %v4383_v11 = vsel %vm9624_vm1, %v4381_v1, %v4382_v47  ;;  %v4393_v50 = vrot.slane %v9470_v54, 5  ;;  %v4267_v20 = vld [vmem:[#allocation2 + $0x84] sm:$0xe]  ;;  %v8161_v48 = vld [vmem:[%s11337_s5 + $0x38] sm:$0xff]  }
 0x2b3   : > { %v4376_v57 = vsel %vm9624_vm1, %v4374_v30, %v4375_v33  ;;  %v4380_v30 = vsel %vm9624_vm1, %v7052_v28, %v4379_v7  ;;  %v4388_v16 = vrot.slane %v4386_v15, 4  ;;  %v6901_v54 = vcombine.low %v9423_v51, %v9428_v31  ;;  %v2685_v28 = vld [vmem:[#allocation2 + $0x18] sm:$0xe] }
 0x2b4   : > { %v7068_v58 = vcombine.low %v4380_v30, %v4383_v11  ;;  %v4395_v63 = vrot.slane %v4393_v50, 4  ;;  %v7053_v10 = vrot.slane %v4266_v12, 9  ;;  %v4389_v1 = vrot.slane %v9461_v9, 5  ;;  %v11408_v11 = vld [vmem:[#allocation11_spill] sm:$0xff] }
 0x2b5   : > { %7525 = vmatmul.mubr.msk.bf16.gmra.mrb[44].mxu0 %vm680_vm7, %v6899_v5  ;;  %v4373_v5 = vsel %vm9624_vm1, %v7051_v25, %v4372_v62  ;;  %v6902_v62 = vcombine.low %v9442_v2, %v9444_v18  ;;  %v7054_v34 = vrot.slane %v4267_v20, 9  ;;  %v4396_v7 = vrot.slane %v9472_v26, 5  ;;  %v2683_v25 = vld [vmem:[#allocation2] sm:$0xe] }
 0x2b6   : > { %7528 = vmatprep.mubr.msk.bf16.mxu0 %vm680_vm7, %v6900_v23  ;;  %v7067_v46 = vcombine.low %v4373_v5, %v4376_v57  ;;  %v4390_v39 = vsel %vm9624_vm1, %v4388_v16, %v4389_v1  ;;  %v4387_v51 = vsel %vm9624_vm1, %v7053_v10, %v4386_v15  ;;  %v6903_v9 = vcombine.low %v9475_v0, %v9483_v41  ;;  %v2688_v1 = vld [vmem:[#allocation2 + $0x3c] sm:$0xe] }
 0x2b7   : > { %v4397_v8 = vsel %vm9624_vm1, %v4395_v63, %v4396_v7  ;;  %v7069_v31 = vcombine.low %v4387_v51, %v4390_v39  ;;  %v4394_v2 = vsel %vm9624_vm1, %v7054_v34, %v4393_v50  ;;  %v6904_v26 = vcombine.low %v9493_v36, %v9498_v53  ;;  %v8216_v50 = vld [vmem:[#allocation2 + $0x20] sm:$0x1]  ;;  %v8217_v63 = vld [vmem:[#allocation2 + $0x2c] sm:$0x1] }
 0x2b8   : > { %v7070_v18 = vcombine.low %v4394_v2, %v4397_v8  ;;  %v2736_v23 = vrot.slane %v9634_v22, 5  ;;  %v6905_v0 = vcombine.low %v9531_v4, %v9528_v13  ;;  %v6926_v41 = vrot.slane %v2683_v25, 9  ;;  %v2684_v4 = vld [vmem:[#allocation2 + $0xc] sm:$0xe]  ;;  %v8219_v25 = vld [vmem:[#allocation2 + $0x44] sm:$0x1] }
 0x2b9   : > { %7669 = vmatmul.mubr.msk.bf16.gmra.mrb[12].mxu1 %vm680_vm7, %v7067_v46  ;;  %v2739_v33 = vrot.slane %v8214_v21, 5  ;;  %v6906_v22 = vcombine.low %v9545_v24, %v9547_v45  ;;  %v2750_v29 = vrot.slane %v9661_v38, 5  ;;  %v6907_v60 = vcombine.low %v9587_v55, %v9589_v37 }
 0x2ba   : > { %7672 = vmatprep.mubr.msk.bf16.mxu1 %vm680_vm7, %v7068_v58  ;;  %v2738_v36 = vrot.slane %v2736_v23, 4  ;;  %v2737_v61 = vsel %vm9624_vm1, %v6926_v41, %v2736_v23  ;;  %v2757_v47 = vrot.slane %v9685_v17, 5  ;;  %v6927_v57 = vrot.slane %v2684_v4, 9  ;;  %v11409_v17 = vld [vmem:[#allocation12_spill] sm:$0xff]  ;;  %v8140_v58 = vld [vmem:[#allocation2 + $0x18] sm:$0xff]   ;;  %v8144_v4 = vld [vmem:[#allocation2 + $0x30] sm:$0xff]  }
 0x2bb   : > { %v2752_v15 = vrot.slane %v2750_v29, 4  ;;  %v6928_v59 = vrot.slane %v2685_v28, 9  ;;  %v2753_v5 = vrot.slane %v8216_v50, 5  ;;  %v2771_v30 = vrot.slane %v11409_v17, 5  ;;  %v2690_v41 = vld [vmem:[#allocation2 + $0x54] sm:$0xe] }
 0x2bc   : > { %v2740_v32 = vsel %vm9624_vm1, %v2738_v36, %v2739_v33  ;;  %v2759_v46 = vrot.slane %v2757_v47, 4  ;;  %v6929_v20 = vrot.slane %v2686_v40, 9  ;;  %v2778_v39 = vrot.slane %v9710_v56, 5  ;;  %v8222_v40 = vld [vmem:[#allocation2 + $0x7c] sm:$0xf] }
 0x2bd   : > { %7529 = vmatmul.mubr.msk.bf16.gmra.mrb[48].mxu0 %vm680_vm7, %v6901_v54  ;;  %v6942_v24 = vcombine.low %v2737_v61, %v2740_v32  ;;  %v2754_v16 = vsel %vm9624_vm1, %v2752_v15, %v2753_v5  ;;  %v2760_v54 = vrot.slane %v8217_v63, 5  ;;  %v2751_v34 = vsel %vm9624_vm1, %v6928_v59, %v2750_v29  ;;  %v2691_v61 = vld [vmem:[#allocation2 + $0x60] sm:$0xe]  ;;  %v11410_v32 = vld [vmem:[#allocation10_spill] sm:$0xff]  ;;  %v2692_v15 = vld [vmem:[#allocation2 + $0x6c] sm:$0xe] }
 0x2be   : > { %7532 = vmatprep.mubr.msk.bf16.mxu0 %vm680_vm7, %v6902_v62  ;;  %v2773_v51 = vrot.slane %v2771_v30, 4  ;;  %v2785_v2 = vrot.slane %v9722_v27, 5  ;;  %v2792_v52 = vrot.slane %v9786_v19, 5  ;;  %v6931_v56 = vrot.slane %v2688_v1, 9  ;;  %v8151_v59 = vld [vmem:[%s11337_s5 + $0x78] sm:$0xff]  }
 0x2bf   : > { %v9891_v8 = vsel %vm9624_vm1, %v2759_v46, %v2760_v54  ;;  %v8224_v50 = vld [vmem:[#allocation2 + $0x68] sm:$0x1]  ;;  %v2693_v46 = vld [vmem:[#allocation2 + $0x78] sm:$0xe]  ;;  %v2694_v1 = vld [vmem:[#allocation2 + $0x84] sm:$0xe] }
 0x2c0   : > { %v2795_v5 = vrot.slane %v8224_v50, 5  ;;  %v9923_v17 = vld [vmem:[#allocation2 + $0x88] sm:$0xf] }
 0x2c1   : > { %7673 = vmatmul.mubr.msk.bf16.gmra.mrb[16].mxu1 %vm680_vm7, %v7069_v31  ;;  %v2689_v31 = vld [vmem:[#allocation2 + $0x48] sm:$0xe] }
 0x2c2   : > { %7676 = vmatprep.mubr.msk.bf16.mxu1 %vm680_vm7, %v7070_v18  ;;  %v8218_v18 = vld [vmem:[#allocation2 + $0x38] sm:$0x1]  ;;  %v6932_v33 = vrot.slane %v2689_v31, 9 }
 0x2c5   : > { %7533 = vmatmul.mubr.msk.bf16.gmra.mrb[52].mxu0 %vm680_vm7, %v6903_v9  ;;  %v2767_v9 = vrot.slane %v8218_v18, 5 }
 0x2c6   : > { %7536 = vmatprep.mubr.msk.bf16.mxu0 %vm680_vm7, %v6904_v26  ;;  %v2758_v26 = vsel %vm9624_vm1, %v6929_v20, %v2757_v47  ;;  %v9918_v47 = vsel %vm9624_vm1, %v6931_v56, %v2771_v30  ;;  %v2813_v30 = vrot.slane %v9923_v17, 5  ;;  %v5108_v56 = vld [vmem:[#allocation2 + $0x18] sm:$0xf]  ;;  %v2834_v17 = vrot.slane %v9547_v45, 5 }
 0x2c7   : > { %v6945_v36 = vcombine.low %v2758_v26, %v9891_v8  ;;  %v9951_v8 = vld [vmem:[%s11337_s5 + $0x80] sm:$0xff]   ;;  %v6937_v26 = vrot.slane %v2694_v1, 9 }
 0x2c9   : > { %7677 = vmatmul.mubr.msk.bf16.gmra.mrb[20].mxu1 %vm680_vm7, %v7071_v42  ;;  %v2743_v42 = vrot.slane %v9655_v35, 5  ;;  %v8215_v35 = vld [vmem:[#allocation2 + $0x14] sm:$0x1] }
 0x2ca   : > { %7680 = vmatprep.mubr.msk.bf16.mxu1 %vm680_vm7, %v7072_v49  ;;  %v2746_v38 = vrot.slane %v8215_v35, 5 }
 0x2cb   : > { %v2745_v49 = vrot.slane %v2743_v42, 4  ;;  %v2744_v12 = vsel %vm9624_vm1, %v6927_v57, %v2743_v42  ;;  %v8143_v42 = vld [vmem:[#allocation2 + $0x24] sm:$0xff]   ;;  %v8221_v57 = vld [vmem:[#allocation2 + $0x50] sm:$0x1] }
 0x2cc   : > { %v2781_v35 = vrot.slane %v8221_v57, 5  ;;  %v8229_v57 = vld [vmem:[#allocation2 + $0x98] sm:$0x1] }
 0x2cd   : > { %7537 = vmatmul.mubr.msk.bf16.gmra.mrb[56].mxu0 %vm680_vm7, %v6905_v0  ;;  %v2747_v55 = vsel %vm9624_vm1, %v2745_v49, %v2746_v38  ;;  %v2774_v0 = vrot.slane %v8219_v25, 5  ;;  %v8220_v49 = vld [vmem:[#allocation2 + $0x70] sm:$0xf]  ;;  %v6933_v38 = vrot.slane %v2690_v41, 9  ;;  %v5109_v41 = vld [vmem:[#allocation2 + $0x1c] sm:$0xf] }
 0x2ce   : > { %7540 = vmatprep.mubr.msk.bf16.mxu0 %vm680_vm7, %v6906_v22  ;;  %v6943_v62 = vcombine.low %v2744_v12, %v2747_v55  ;;  %v2780_v22 = vrot.slane %v2778_v39, 4  ;;  %v2799_v28 = vrot.slane %v8220_v49, 5  ;;  %v6934_v55 = vrot.slane %v2691_v61, 9 }
 0x2cf   : > { %v9910_v29 = vsel %vm9624_vm1, %v2773_v51, %v2774_v0  ;;  %v9958_v51 = vsel %vm9624_vm1, %v6933_v38, %v2785_v2  ;;  %v5160_v49 = vshll.u32 %v5108_v56, 16  ;;  %v2697_v38 = vld [vmem:[#allocation2 + $0xa8] sm:$0xe] }
 0x2d0   : > { %v9937_v20 = vsel %vm9624_vm1, %v2780_v22, %v2781_v35  ;;  %v9964_v31 = vsel %vm9624_vm1, %v6934_v55, %v2792_v52  ;;  %v2823_v35 = vrot.slane %v8229_v57, 5 }
 0x2d1   : > { %7681 = vmatmul.mubr.msk.bf16.gmra.mrb[24].mxu1 %vm680_vm7, %v7073_v44  ;;  %v2687_v44 = vld [vmem:[#allocation2 + $0x30] sm:$0xe]  ;;  %v5162_v1 = vrot.slane %v5160_v49, 5 }
 0x2d2   : > { %7684 = vmatprep.mubr.msk.bf16.mxu1 %vm680_vm7, %v7074_v43  ;;  %v2764_v43 = vrot.slane %v11408_v11, 5  ;;  %v6930_v10 = vrot.slane %v2687_v44, 9  ;;  %v2806_v44 = vrot.slane %v8222_v40, 5  ;;  %v8223_v11 = vld [vmem:[#allocation2 + $0x5c] sm:$0x1] }
 0x2d4   : > { %v2766_v7 = vrot.slane %v2764_v43, 4  ;;  %v2765_v23 = vsel %vm9624_vm1, %v6930_v10, %v2764_v43  ;;  %v2788_v43 = vrot.slane %v8223_v11, 5  ;;  %v2801_v10 = vrot.slane %v2799_v28, 4 }
 0x2d5   : > { %7541 = vmatmul.mubr.msk.bf16.gmra.mrb[60].mxu0 %vm680_vm7, %v6907_v60  ;;  %v2794_v60 = vrot.slane %v2792_v52, 4 }
 0x2d6   : > { %7548 = vmatprep.mubr.msk.bf16.mxu0 %vm680_vm7, %v6942_v24  ;;  %v2768_v21 = vsel %vm9624_vm1, %v2766_v7, %v2767_v9  ;;  %v2787_v24 = vrot.slane %v2785_v2, 4  ;;  %v2808_v7 = vrot.slane %v2806_v44, 4  ;;  %v8227_v9 = vld [vmem:[#allocation2 + $0x80] sm:$0x1] }
 0x2d7   : > { %v6946_v12 = vcombine.low %v2765_v23, %v2768_v21  ;;  %v9945_v54 = vsel %vm9624_vm1, %v2794_v60, %v2795_v5  ;;  %v2809_v19 = vrot.slane %v8227_v9, 5  ;;  %v8228_v23 = vld [vmem:[#allocation2 + $0x8c] sm:$0x1]  ;;  %v5157_v60 = vshrl.u32 %v5108_v56, 16  ;;  %v11411_v5 = vld [vmem:[#allocation7_spill] sm:$0xff] }
 0x2d8   : > { %v9941_v63 = vsel %vm9624_vm1, %v2787_v24, %v2788_v43  ;;  %v6950_v2 = vcombine.low %v9964_v31, %v9945_v54  ;;  %v2816_v25 = vrot.slane %v8228_v23, 5  ;;  %v2827_v24 = vrot.slane %v9528_v13, 5  ;;  %v5111_v43 = vld [vmem:[#allocation2 + $0x24] sm:$0xf]  ;;  %v11412_v9 = vld [vmem:[#allocation8_spill] sm:$0xff] }
 0x2d9   : > { %7685 = vmatmul.mubr.msk.bf16.gmra.mrb[28].mxu1 %vm680_vm7, %v7075_v6  ;;  %v6944_v6 = vcombine.low %v2751_v34, %v2754_v16  ;;  %v9931_v16 = vsel %vm9624_vm1, %v6932_v33, %v2778_v39  ;;  %v6935_v34 = vrot.slane %v2692_v15, 9  ;;  %v2820_v39 = vrot.slane %v9498_v53, 5  ;;  %v8226_v53 = vld [vmem:[#allocation2 + $0x74] sm:$0x1]  ;;  %v2698_v56 = vld [vmem:[#allocation2 + $0xb4] sm:$0xe] }
 0x2da   : > { %7692 = vmatprep.mubr.msk.bf16.mxu1 %vm680_vm7, %v8140_v58  ;;  %v6947_v58 = vcombine.low %v9918_v47, %v9910_v29  ;;  %v6948_v18 = vcombine.low %v9931_v16, %v9937_v20  ;;  %v6949_v27 = vcombine.low %v9958_v51, %v9941_v63  ;;  %v9987_v22 = vsel %vm9624_vm1, %v2808_v7, %v2809_v19  ;;  %v8147_v29 = vld [vmem:[#allocation2 + $0x54] sm:$0xff]   ;;  %v10067_v63 = vld [vmem:[#allocation2 + $0x2c] sm:$0x1] }
 0x2db   : > { %v9979_v21 = vsel %vm9624_vm1, %v6935_v34, %v2799_v28  ;;  %v2822_v61 = vrot.slane %v2820_v39, 4  ;;  %v5166_v15 = vshll.u32 %v5109_v41, 16  ;;  %v10003_v13 = vsel %vm9624_vm1, %v6937_v26, %v2813_v30  ;;  %v8148_v26 = vld [vmem:[#allocation2 + $0x60] sm:$0xff]   ;;  %v8149_v31 = vld [vmem:[#allocation2 + $0x6c] sm:$0xff]  }
 0x2dc   : > { %v2829_v16 = vrot.slane %v2827_v24, 4  ;;  %v6940_v20 = vrot.slane %v2697_v38, 9  ;;  %v5184_v7 = vshll.u32 %v5111_v43, 16  ;;  %v2837_v19 = vrot.slane %v11412_v9, 5 }
 0x2dd   : > { %7549 = vmatmul.mubr.msk.bf16.vlgmr.msra.gmra.mrb[32].mxu0 %vm680_vm7, %v6943_v62  ;;  %v2695_v62 = vld [vmem:[#allocation2 + $0x90] sm:$0xe]  ;;  %v10013_v50 = vsel %vm9624_vm1, %v2822_v61, %v2823_v35 }
 0x2de   : > { %7552 = vmatprep.mubr.msk.bf16.mxu0 %vm680_vm7, %v6944_v6  ;;  %7581 = vmatpush3.bf16.msra.mxu0 %v11410_v32  ;;  %v2815_v6 = vrot.slane %v2813_v30, 4  ;;  %v6938_v0 = vrot.slane %v2695_v62, 9  ;;  %v2696_v32 = vld [vmem:[#allocation2 + $0x9c] sm:$0xe]  ;;  %v5114_v30 = vld [vmem:[#allocation2 + $0x30] sm:$0xf]  ;;  %v10049_v38 = vsel %vm9624_vm1, %v6940_v20, %v2834_v17 }
 0x2df   : > { %7582 = vmatprep.subr.bf16.mxu0 %v8161_v48  ;;  %v6939_v11 = vrot.slane %v2696_v32, 9  ;;  %v10022_v62 = vrot.slane %v5166_v15, 5  ;;  %v6941_v15 = vrot.slane %v2698_v56, 9  ;;  %v5120_v56 = vld [vmem:[#allocation2 + $0x48] sm:$0xf] }
 0x2e1   : > { %7693 = vmatmul.mubr.msk.bf16.vlgmr.msra.gmra.mrb[0].mxu1 %vm680_vm7, %v8143_v42  ;;  %v8146_v42 = vld [vmem:[#allocation2 + $0x48] sm:$0xff]  }
 0x2e2   : > { %7583 = vmatpush3.bf16.msra.mxu0 %v8161_v48  ;;  %7725 = vmatpush3.bf16.msra.mxu1 %v9694_v3  ;;  %v6936_v3 = vrot.slane %v2693_v46, 9  ;;  %v2802_v48 = vrot.slane %v8226_v53, 5  ;;  %v2830_v46 = vrot.slane %v11411_v5, 5 }
 0x2e3   : > { %7696 = vmatprep.mubr.msk.bf16.mxu1 %vm680_vm7, %v8144_v4  ;;  %7726 = vmatprep.subr.bf16.mxu1 %v8151_v59  ;;  %v9992_v4 = vsel %vm9624_vm1, %v2815_v6, %v2816_v25  ;;  %v5208_v6 = vshll.u32 %v5114_v30, 16  ;;  %v2841_v25 = vrot.slane %v9589_v37, 5 }
 0x2e4   : > { %v9975_v52 = vsel %vm9624_vm1, %v2801_v10, %v2802_v48  ;;  %v9983_v33 = vsel %vm9624_vm1, %v6936_v3, %v2806_v44  ;;  %v10007_v44 = vsel %vm9624_vm1, %v6938_v0, %v2820_v39  ;;  %v6953_v55 = vcombine.low %v10003_v13, %v9992_v4  ;;  %v10024_v39 = vld [vmem:[#allocation2 + $0x34] sm:$0xf]  ;;  %v10038_v0 = vld [vmem:[#allocation2 + $0x20] sm:$0x1] }
 0x2e5   : > { %7553 = vmatmul.mubr.msk.bf16.gmra.mrb[36].mxu0 %vm680_vm7, %v6945_v36  ;;  %v8145_v36 = vld [vmem:[#allocation2 + $0x3c] sm:$0xff]   ;;  %v6951_v28 = vcombine.low %v9979_v21, %v9975_v52  ;;  %v6952_v40 = vcombine.low %v9983_v33, %v9987_v22  ;;  %v5159_v10 = vrot.slane %v5157_v60, 4  ;;  %v5181_v3 = vshrl.u32 %v5111_v43, 16 }
 0x2e6   : > { %7556 = vmatprep.mubr.msk.bf16.mxu0 %vm680_vm7, %v6946_v12  ;;  %7727 = vmatpush3.bf16.msra.mxu1 %v8151_v59  ;;  %v5170_v59 = vshrl.u32 %v5109_v41, 16  ;;  %v5112_v12 = vld [vmem:[#allocation2 + $0x28] sm:$0xf]  ;;  %v5205_v48 = vshrl.u32 %v5114_v30, 16  ;;  %v6954_v47 = vcombine.low %v10007_v44, %v10013_v50  ;;  %v10035_v23 = vsel %vm9624_vm1, %v2829_v16, %v2830_v46  ;;  %v5117_v60 = vld [vmem:[#allocation2 + $0x3c] sm:$0xf] }
 0x2e7   : > { %7760 = vmatprep.subr.bf16.mxu1 %v9951_v8  ;;  %v5190_v45 = vshll.u32 %v5112_v12, 16  ;;  %v5194_v53 = vshrl.u32 %v5112_v12, 16  ;;  %v5214_v41 = vshll.u32 %v10024_v39, 16  ;;  %v5163_v61 = vor.u32 %v5162_v1, %v5159_v10  ;;  %v10059_v12 = vld [vmem:[#allocation2 + $0x40] sm:$0xf] }
 0x2e8   : > { %v5172_v34 = vrot.slane %v5170_v59, 4  ;;  %v5207_v37 = vrot.slane %v5205_v48, 4  ;;  %v5210_v35 = vrot.slane %v5208_v6, 5  ;;  %v11413_v59 = vld [vmem:[#allocation9_spill] sm:$0xff]  ;;  %v5176_v43 = vshll.u32 %v10038_v0, 16  ;;  %v8150_v6 = vld [vmem:[#allocation2 + $0x78] sm:$0xff]  }
 0x2e9   : > { %7697 = vmatmul.mubr.msk.bf16.gmra.mrb[4].mxu1 %vm680_vm7, %v8145_v36  ;;  %v5218_v36 = vshrl.u32 %v10024_v39, 16  ;;  %v10045_v49 = vrot.slane %v5190_v45, 5  ;;  %v5196_v57 = vrot.slane %v5194_v53, 4  ;;  %v10057_v5 = vrot.slane %v5214_v41, 5  ;;  %v10080_v45 = vld [vmem:[#allocation2 + $0x44] sm:$0x1] }
 0x2ea   : > { %7700 = vmatprep.mubr.msk.bf16.mxu1 %vm680_vm7, %v8146_v42  ;;  %v5173_v32 = vor.u32 %v5172_v34, %v10022_v62  ;;  %v5183_v42 = vrot.slane %v5181_v3, 4  ;;  %v5229_v30 = vshrl.u32 %v5117_v60, 16  ;;  %v5232_v16 = vshll.u32 %v5117_v60, 16  ;;  %v10074_v3 = vld [vmem:[#allocation2 + $0x38] sm:$0x1] }
 0x2eb   : > { %v5220_v46 = vrot.slane %v5218_v36, 4  ;;  %v2843_v20 = vrot.slane %v2841_v25, 4  ;;  %v5164_v10 = vrot.slane %v5163_v61, 4  ;;  %v5197_v34 = vor.u32 %v5196_v57, %v10045_v49  ;;  %v10105_v57 = vld [vmem:[#allocation2 + $0x4c] sm:$0xf] }
 0x2ec   : > { %v5174_v1 = vrot.slane %v5173_v32, 4  ;;  %v5211_v54 = vor.u32 %v5210_v35, %v5207_v37  ;;  %v5238_v53 = vshll.u32 %v10059_v12, 16  ;;  %v5242_v48 = vshrl.u32 %v10059_v12, 16  ;;  %v10185_v50 = vld [vmem:[#allocation2 + $0x5c] sm:$0x1] }
 0x2ed   : > { %7557 = vmatmul.mubr.msk.bf16.gmra.mrb[40].mxu0 %vm680_vm7, %v6947_v58  ;;  %v10030_v58 = vsel %vm9624_vm1, %v6939_v11, %v2827_v24  ;;  %v5186_v24 = vrot.slane %v5184_v7, 5  ;;  %v2844_v11 = vrot.slane %v11413_v59, 5  ;;  %v5178_v7 = vrot.slane %v5176_v43, 5 }
 0x2ee   : > { %7560 = vmatprep.mubr.msk.bf16.mxu0 %vm680_vm7, %v6948_v18  ;;  %v2836_v18 = vrot.slane %v2834_v17, 4  ;;  %v6955_v17 = vcombine.low %v10030_v58, %v10035_v23  ;;  %v5231_v9 = vrot.slane %v5229_v30, 4  ;;  %v5169_v41 = vsel %vm8825_vm11, %v5164_v10, %v10022_v62  ;;  %v10141_v10 = vld [vmem:[#allocation2 + $0x58] sm:$0xf] }
 0x2ef   : > { %v5187_v51 = vor.u32 %v5186_v24, %v5183_v42  ;;  %v5224_v61 = vshll.u32 %v10074_v3, 16  ;;  %v5179_v32 = vsel %vm8825_vm11, %v5174_v1, %v5178_v7  ;;  %v10100_v42 = vrot.slane %v5197_v34, 4  ;;  %v8152_v1 = vld [vmem:[#allocation2 + $0x84] sm:$0xff]  }
 0x2f0   : > { %v10102_v24 = vrot.slane %v5211_v54, 4  ;;  %v5248_v60 = vshll.u32 %v10080_v45, 16  ;;  %v10107_v37 = vrot.slane %v5238_v53, 5  ;;  %v5244_v62 = vrot.slane %v5242_v48, 4  ;;  %v10146_v7 = vld [vmem:[#allocation2 + $0x64] sm:$0xf] }
 0x2f1   : > { %7701 = vmatmul.mubr.msk.bf16.gmra.mrb[8].mxu1 %vm680_vm7, %v8147_v29  ;;  %v5200_v29 = vshll.u32 %v10067_v63, 16  ;;  %v10094_v36 = vrot.slane %v5187_v51, 4  ;;  %v5253_v35 = vshrl.u32 %v5120_v56, 16  ;;  %v5262_v52 = vshll.u32 %v10105_v57, 16  ;;  %v5126_v51 = vld [vmem:[#allocation2 + $0x60] sm:$0xf] }
 0x2f2   : > { %7704 = vmatprep.mubr.msk.bf16.mxu1 %vm680_vm7, %v8148_v26  ;;  %v10089_v26 = vsel %vm9624_vm1, %v2843_v20, %v2844_v11  ;;  %v5266_v21 = vshrl.u32 %v10105_v57, 16  ;;  %v5217_v22 = vsel %vm8825_vm11, %v10102_v24, %v10057_v5  ;;  %v5245_v34 = vor.u32 %v5244_v62, %v10107_v37  ;;  %v8153_v53 = vld [vmem:[#allocation2 + $0x90] sm:$0xff]  }
 0x2f3   : > { %v10115_v11 = vrot.slane %v5200_v29, 5  ;;  %v5193_v20 = vsel %vm8825_vm11, %v10094_v36, %v10045_v49  ;;  %v10144_v54 = vrot.slane %v5248_v60, 5  ;;  %v5255_v49 = vrot.slane %v5253_v35, 4  ;;  %v10156_v36 = vld [vmem:[#allocation2 + $0x70] sm:$0xf] }
 0x2f4   : > { %v5310_v24 = vshll.u32 %v10146_v7, 16  ;;  %v5314_v60 = vshrl.u32 %v10146_v7, 16  ;;  %v5246_v62 = vrot.slane %v5245_v34, 4 }
 0x2f5   : > { %7561 = vmatmul.mubr.msk.bf16.gmra.mrb[44].mxu0 %vm680_vm7, %v6949_v27  ;;  %v10071_v27 = vsel %vm9624_vm1, %v2836_v18, %v2837_v19  ;;  %v5221_v18 = vor.u32 %v5220_v46, %v10057_v5  ;;  %v5234_v19 = vrot.slane %v5232_v16, 5  ;;  %v10125_v16 = vcombine.low %v5169_v41, %v5179_v32 }
 0x2f6   : > { %7564 = vmatprep.mubr.msk.bf16.mxu0 %vm680_vm7, %v6950_v2  ;;  %v10078_v2 = vsel %vm9624_vm1, %v6941_v15, %v2841_v25  ;;  %v5256_v15 = vshll.u32 %v5120_v56, 16  ;;  %v6956_v59 = vcombine.low %v10049_v38, %v10071_v27  ;;  %v5203_v33 = vsel %vm8825_vm11, %v10100_v42, %v10115_v11 }
 0x2f7   : > { %v10117_v43 = vrot.slane %v5221_v18, 4  ;;  %v5235_v46 = vor.u32 %v5234_v19, %v5231_v9  ;;  %v6957_v30 = vcombine.low %v10078_v2, %v10089_v26  ;;  %v5129_v18 = vld [vmem:[#allocation2 + $0x6c] sm:$0xf]  ;;  %v10152_v9 = vrot.slane %v5262_v52, 5 }
 0x2f8   : > { %v5268_v19 = vrot.slane %v5266_v21, 4  ;;  %v5286_v56 = vshll.u32 %v10141_v10, 16  ;;  %v5290_v41 = vshrl.u32 %v10141_v10, 16  ;;  %v5301_v32 = vshrl.u32 %v5126_v51, 16 }
 0x2f9   : > { %7705 = vmatmul.mubr.msk.bf16.gmra.mrb[12].mxu1 %vm680_vm7, %v8149_v31  ;;  %v5258_v31 = vrot.slane %v5256_v15, 5  ;;  %v5304_v42 = vshll.u32 %v5126_v51, 16  ;;  %v5325_v15 = vshrl.u32 %v5129_v18, 16  ;;  %v5328_v11 = vshll.u32 %v5129_v18, 16 }
 0x2fa   : > { %7708 = vmatprep.mubr.msk.bf16.mxu1 %vm680_vm7, %v8150_v6  ;;  %v5236_v6 = vrot.slane %v5235_v46, 4  ;;  %v5334_v52 = vshll.u32 %v10156_v36, 16  ;;  %v5338_v21 = vshrl.u32 %v10156_v36, 16  ;;  %v10175_v51 = vrot.slane %v5286_v56, 5 }
 0x2fb   : > { %v5259_v35 = vor.u32 %v5258_v31, %v5255_v49  ;;  %v5292_v4 = vrot.slane %v5290_v41, 4  ;;  %v5303_v13 = vrot.slane %v5301_v32, 4  ;;  %v5316_v34 = vrot.slane %v5314_v60, 4  ;;  %v8154_v49 = vld [vmem:[#allocation2 + $0x9c] sm:$0xff]   ;;  %v5132_v41 = vld [vmem:[#allocation2 + $0x78] sm:$0xf] }
 0x2fc   : > { %v5241_v31 = vsel %vm8825_vm11, %v5236_v6, %v10107_v37  ;;  %v5251_v44 = vsel %vm8825_vm11, %v5246_v62, %v10144_v54  ;;  %v5340_v56 = vrot.slane %v5338_v21, 4  ;;  %v10190_v32 = vcombine.low %v5193_v20, %v5203_v33  ;;  %v10204_v20 = vld [vmem:[#allocation2 + $0x74] sm:$0x1] }
 0x2fd   : > { %7565 = vmatmul.mubr.msk.bf16.gmra.mrb[48].mxu0 %vm680_vm7, %v6951_v28  ;;  %v5123_v28 = vld [vmem:[#allocation2 + $0x54] sm:$0xf]  ;;  %v5293_v54 = vor.u32 %v5292_v4, %v10175_v51  ;;  %v5296_v60 = vshll.u32 %v10185_v50, 16  ;;  %v5344_v38 = vshll.u32 %v10204_v20, 16 }
 0x2fe   : > { %7568 = vmatprep.mubr.msk.bf16.mxu0 %vm680_vm7, %v6952_v40  ;;  %v5226_v40 = vrot.slane %v5224_v61, 5  ;;  %v5277_v5 = vshrl.u32 %v5123_v28, 16  ;;  %v5280_v29 = vshll.u32 %v5123_v28, 16  ;;  %v10159_v61 = vld [vmem:[#allocation2 + $0x50] sm:$0x1]  ;;  %v5269_v28 = vor.u32 %v5268_v19, %v10152_v9 }
 0x2ff   : > { %v10187_v19 = vrot.slane %v5334_v52, 5  ;;  %v10223_v23 = vrot.slane %v5293_v54, 4  ;;  %v10227_v4 = vrot.slane %v5296_v60, 5  ;;  %v10261_v54 = vld [vmem:[#allocation2 + $0x88] sm:$0xf]  ;;  %v8159_v60 = vld [vmem:[#allocation2 + $0xc] sm:$0xff]  }
 0x300   : > { %v5227_v48 = vsel %vm8825_vm11, %v10117_v43, %v5226_v40  ;;  %v5279_v43 = vrot.slane %v5277_v5, 4  ;;  %v5282_v46 = vrot.slane %v5280_v29, 5  ;;  %v5272_v40 = vshll.u32 %v10159_v61, 16  ;;  %v8155_v5 = vld [vmem:[#allocation2 + $0xa8] sm:$0xff]  }
 0x301   : > { %7709 = vmatmul.mubr.msk.bf16.gmra.mrb[16].mxu1 %vm680_vm7, %v8152_v1  ;;  %v10177_v1 = vrot.slane %v5310_v24, 5  ;;  %v5260_v29 = vrot.slane %v5259_v35, 4  ;;  %v10192_v37 = vcombine.low %v5217_v22, %v5227_v48  ;;  %v5270_v6 = vrot.slane %v5269_v28, 4  ;;  %v5135_v28 = vld [vmem:[#allocation2 + $0x84] sm:$0xf] }
 0x302   : > { %7712 = vmatprep.mubr.msk.bf16.mxu1 %vm680_vm7, %v8153_v53  ;;  %v5330_v53 = vrot.slane %v5328_v11, 5  ;;  %v5283_v18 = vor.u32 %v5282_v46, %v5279_v43  ;;  %v5274_v24 = vrot.slane %v5272_v40, 5  ;;  %v10202_v11 = vcombine.low %v5241_v31, %v5251_v44  ;;  %v8156_v40 = vld [vmem:[#allocation2 + $0xb4] sm:$0xff]   ;;  %v8157_v44 = vld [vmem:[#allocation2 + $0xc0] sm:$0xff]  }
 0x303   : > { %v5317_v35 = vor.u32 %v5316_v34, %v10177_v1  ;;  %v5349_v22 = vshrl.u32 %v5132_v41, 16  ;;  %v5352_v48 = vshll.u32 %v5132_v41, 16  ;;  %v5265_v43 = vsel %vm8825_vm11, %v5260_v29, %v10152_v9 }
 0x304   : > { %v10213_v46 = vrot.slane %v5283_v18, 4  ;;  %v5341_v21 = vor.u32 %v5340_v56, %v10187_v19  ;;  %v5275_v58 = vsel %vm8825_vm11, %v5270_v6, %v5274_v24  ;;  %v5373_v31 = vshrl.u32 %v5135_v28, 16  ;;  %v5847_v18 = vld [vmem:[#allocation2 + $0x30] sm:$0xe] }
 0x305   : > { %7569 = vmatmul.mubr.msk.bf16.gmra.mrb[52].mxu0 %vm680_vm7, %v6953_v55  ;;  %v5306_v55 = vrot.slane %v5304_v42, 5  ;;  %v10195_v42 = vld [vmem:[#allocation2 + $0x68] sm:$0x1]  ;;  %v10238_v34 = vrot.slane %v5349_v22, 4  ;;  %v5376_v24 = vshll.u32 %v5135_v28, 16  ;;  %v5939_v22 = vrot.slane %v10105_v57, 5 }
 0x306   : > { %7572 = vmatprep.mubr.msk.bf16.mxu0 %vm680_vm7, %v6954_v47  ;;  %v5327_v47 = vrot.slane %v5325_v15, 4  ;;  %v10200_v15 = vld [vmem:[#allocation2 + $0x7c] sm:$0xf]  ;;  %v5320_v52 = vshll.u32 %v10195_v42, 16  ;;  %v10250_v29 = vrot.slane %v5341_v21, 4  ;;  %v10283_v21 = vrot.slane %v5373_v31, 4 }
 0x307   : > { %v5307_v62 = vor.u32 %v5306_v55, %v5303_v13  ;;  %v5362_v9 = vshrl.u32 %v10200_v15, 16  ;;  %v10231_v55 = vrot.slane %v5317_v35, 4  ;;  %v10285_v28 = vld [vmem:[#allocation2 + $0x94] sm:$0xf]  ;;  %v5925_v31 = vrot.slane %v10024_v39, 5 }
 0x308   : > { %v5331_v33 = vor.u32 %v5330_v53, %v5327_v47  ;;  %v10242_v47 = vcombine.low %v5265_v43, %v5275_v58  ;;  %v7164_v58 = vrot.slane %v5847_v18, 9  ;;  %v8160_v18 = vld [vmem:[#allocation2 + $0xcc] sm:$0xff]   ;;  %v10301_v26 = vrot.slane %v5376_v24, 5  ;;  %v5851_v53 = vld [vmem:[#allocation2 + $0x60] sm:$0xe] }
 0x309   : > { %7713 = vmatmul.mubr.msk.bf16.gmra.mrb[20].mxu1 %vm680_vm7, %v8154_v49  ;;  %v10229_v13 = vrot.slane %v5307_v62, 4  ;;  %v10240_v49 = vrot.slane %v5352_v48, 5  ;;  %v10259_v6 = vrot.slane %v5362_v9, 4  ;;  %v10275_v48 = vld [vmem:[#allocation2 + $0x90] sm:$0xf]  ;;  %v5927_v9 = vrot.slane %v5925_v31, 4 }
 0x30a   : > { %7716 = vmatprep.mubr.msk.bf16.mxu1 %vm680_vm7, %v8155_v5  ;;  %v10234_v27 = vrot.slane %v5331_v33, 4  ;;  %v10248_v5 = vrot.slane %v5320_v52, 5  ;;  %v10272_v33 = vrot.slane %v5344_v38, 5  ;;  %v5850_v52 = vld [vmem:[#allocation2 + $0x54] sm:$0xe]  ;;  %v5928_v62 = vrot.slane %v10074_v3, 5 }
 0x30b   : > { %v5932_v24 = vrot.slane %v10059_v12, 5  ;;  %v5935_v43 = vrot.slane %v10080_v45, 5  ;;  %v7167_v3 = vrot.slane %v5850_v52, 9  ;;  %v5946_v12 = vrot.slane %v10141_v10, 5  ;;  %v5853_v35 = vld [vmem:[#allocation2 + $0x78] sm:$0xe] }
 0x30c   : > { %v10315_v56 = vsel %vm9624_vm1, %v5927_v9, %v5928_v62  ;;  %v8162_v62 = vld [vmem:[#allocation2 + $0x18] sm:$0xff]   ;;  %v5941_v52 = vrot.slane %v5939_v22, 4  ;;  %v7168_v9 = vrot.slane %v5851_v53, 9 }
 0x30d   : > { %7573 = vmatmul.mubr.msk.bf16.gmra.mrb[56].mxu0 %vm680_vm7, %v6955_v17  ;;  %v5358_v17 = vshll.u32 %v10200_v15, 16  ;;  %v5948_v10 = vrot.slane %v5946_v12, 4 }
 0x30e   : > { %7576 = vmatprep.mubr.msk.bf16.mxu0 %vm680_vm7, %v6956_v59  ;;  %v10236_v59 = vld [vmem:[#allocation2 + $0x80] sm:$0x1] }
 0x30f   : > { %v10257_v41 = vrot.slane %v5358_v17, 5  ;;  %v5848_v17 = vld [vmem:[#allocation2 + $0x3c] sm:$0xe] }
 0x310   : > { %v7165_v39 = vrot.slane %v5848_v17, 9  ;;  %v5953_v17 = vrot.slane %v10146_v7, 5  ;;  %v5970_v7 = vrot.slane %v10236_v59, 5 }
 0x311   : > { %7717 = vmatmul.mubr.msk.bf16.gmra.mrb[24].mxu1 %vm680_vm7, %v8156_v40  ;;  %v8166_v40 = vld [vmem:[#allocation2 + $0x3c] sm:$0xff]  }
 0x312   : > { %7720 = vmatprep.mubr.msk.bf16.mxu1 %vm680_vm7, %v8157_v44  ;;  %v5849_v44 = vld [vmem:[#allocation2 + $0x48] sm:$0xe]  ;;  %v10328_v45 = vsel %vm9624_vm1, %v7165_v39, %v5932_v24  ;;  %v5854_v39 = vld [vmem:[#allocation2 + $0x84] sm:$0xe] }
 0x313   : > { %v7166_v2 = vrot.slane %v5849_v44, 9  ;;  %v5852_v44 = vld [vmem:[#allocation2 + $0x6c] sm:$0xe] }
 0x315   : > { %7577 = vmatmul.mubr.msk.bf16.gmra.mrb[60].mxu0 %vm680_vm7, %v6957_v30  ;;  %v10332_v57 = vsel %vm9624_vm1, %v7166_v2, %v5939_v22  ;;  %v10349_v22 = vsel %vm9624_vm1, %v7167_v3, %v5946_v12  ;;  %v5960_v12 = vrot.slane %v10156_v36, 5  ;;  %v5967_v3 = vrot.slane %v10200_v15, 5  ;;  %v5856_v36 = vld [vmem:[#allocation2 + $0x9c] sm:$0xe]  ;;  %v8165_v30 = vld [vmem:[#allocation2 + $0x30] sm:$0xff]  }
 0x316   : > { %7584 = vmatprep.mubr.msk.bf16.mxu0 %vm680_vm7, %v8159_v60  ;;  %v10310_v60 = vsel %vm9624_vm1, %v7164_v58, %v5925_v31  ;;  %v5934_v58 = vrot.slane %v5932_v24, 4  ;;  %v5942_v31 = vrot.slane %v10159_v61, 5  ;;  %11415 = vst [vmem:[#allocation11_spill] sm:$0xff] %v10349_v22  ;;  %v5955_v24 = vrot.slane %v5953_v17, 4 }
 0x317   : > { %v5974_v2 = vrot.slane %v10261_v54, 5 }
 0x318   : > { %v10336_v61 = vsel %vm9624_vm1, %v5934_v58, %v5935_v43  ;;  %v10345_v53 = vsel %vm9624_vm1, %v5941_v52, %v5942_v31  ;;  %v5956_v43 = vrot.slane %v10195_v42, 5  ;;  %v7169_v58 = vrot.slane %v5852_v44, 9  ;;  %v10359_v31 = vld [vmem:[#allocation2 + $0x8c] sm:$0x1]  ;;  %v5855_v52 = vld [vmem:[#allocation2 + $0x90] sm:$0xe] }
 0x319   : > { %7721 = vmatmul.mubr.msk.bf16.gmra.mrb[28].mxu1 %vm680_vm7, %v8160_v18  ;;  %v8164_v18 = vld [vmem:[#allocation2 + $0x24] sm:$0xff]   ;;  %v10365_v42 = vsel %vm9624_vm1, %v7168_v9, %v5953_v17  ;;  %v7171_v17 = vrot.slane %v5854_v39, 9  ;;  %v10379_v9 = vld [vmem:[#allocation2 + $0xa0] sm:$0xf]  ;;  %v5969_v39 = vrot.slane %v5967_v3, 4  ;;  %v5976_v38 = vrot.slane %v5974_v2, 4 }
 0x31a   : > { %7728 = vmatprep.mubr.msk.bf16.mxu1 %vm680_vm7, %v10125_v16  ;;  %v5949_v16 = vrot.slane %v10185_v50, 5  ;;  %11417 = vst [vmem:[#allocation10_spill] sm:$0xff] %v10365_v42  ;;  %v10375_v44 = vsel %vm9624_vm1, %v5955_v24, %v5956_v43  ;;  %v10387_v43 = vld [vmem:[#allocation2 + $0xa4] sm:$0x1]  ;;  %v7172_v24 = vrot.slane %v5855_v52, 9 }
 0x31b   : > { %11418 = vst [vmem:[#allocation7_spill] sm:$0xff] %v10375_v44  ;;  %v10416_v52 = vsel %vm9624_vm1, %v7171_v17, %v5974_v2  ;;  %v10420_v44 = vld [vmem:[#allocation2 + $0xb0] sm:$0x1]  ;;  %v10422_v42 = vld [vmem:[#allocation2 + $0xb8] sm:$0xf] }
 0x31c   : > { %v10357_v50 = vsel %vm9624_vm1, %v5948_v10, %v5949_v16  ;;  %v10371_v10 = vld [vmem:[#allocation2 + $0x98] sm:$0x1]  ;;  %v5963_v16 = vrot.slane %v10204_v20, 5  ;;  %v10391_v20 = vsel %vm9624_vm1, %v7169_v58, %v5960_v12  ;;  %v5977_v58 = vrot.slane %v10359_v31, 5  ;;  %11423 = vst [vmem:[#allocation14_spill] sm:$0xff] %v10416_v52 }
 0x31d   : > { %7585 = vmatmul.mubr.msk.bf16.vlgmr.msra.gmra.mrb[32].mxu0 %vm680_vm7, %v8162_v62  ;;  %11416 = vst [vmem:[#allocation12_spill] sm:$0xff] %v10357_v50  ;;  %v7170_v62 = vrot.slane %v5853_v35, 9  ;;  %v5962_v35 = vrot.slane %v5960_v12, 4  ;;  %11419 = vst [vmem:[#allocation8_spill] sm:$0xff] %v10391_v20  ;;  %v5981_v12 = vrot.slane %v10285_v28, 5  ;;  %v11448_v14 = vld [vmem:[#allocation11_spill] sm:$0xff] }
 0x31e   : > { %7588 = vmatprep.mubr.msk.bf16.mxu0 %vm680_vm7, %v8164_v18  ;;  %v8172_v18 = vld [vmem:[%s11337_s5 + $0x88] sm:$0xff]   ;;  %v10431_v2 = vld [vmem:[#allocation2 + $0xbc] sm:$0x1]  ;;  %v10433_v17 = vld [vmem:[#allocation2 + $0xc4] sm:$0xf] }
 0x31f   : > { %v10395_v15 = vsel %vm9624_vm1, %v7170_v62, %v5967_v3  ;;  %v5857_v62 = vld [vmem:[#allocation2 + $0xa8] sm:$0xe]  ;;  %v10406_v3 = vld [vmem:[#allocation2 + $0xac] sm:$0xf]  ;;  %v10439_v20 = vsel %vm9624_vm1, %v7172_v24, %v5981_v12  ;;  %v5998_v24 = vrot.slane %v10420_v44, 5  ;;  %v6005_v52 = vrot.slane %v10431_v2, 5 }
 0x320   : > { %11420 = vst [vmem:[#allocation9_spill] sm:$0xff] %v10395_v15  ;;  %11425 = vst [vmem:[#allocation16_spill] sm:$0xff] %v10439_v20  ;;  %v5859_v15 = vld [vmem:[#allocation2 + $0xc0] sm:$0xe]  ;;  %v6009_v50 = vrot.slane %v10433_v17, 5 }
 0x321   : > { %7729 = vmatmul.mubr.msk.bf16.vlgmr.msra.gmra.mrb[0].mxu1 %vm680_vm7, %v10190_v32  ;;  %v10402_v32 = vsel %vm9624_vm1, %v5962_v35, %v5963_v16  ;;  %v5984_v16 = vrot.slane %v10371_v10, 5  ;;  %v5858_v35 = vld [vmem:[#allocation2 + $0xb4] sm:$0xe]  ;;  %v7176_v20 = vrot.slane %v5859_v15, 9  ;;  %v10482_v15 = vld [vmem:[#allocation2 + $0xd0] sm:$0xf] }
 0x322   : > { %7761 = vmatpush3.bf16.msra.mxu1 %v9951_v8  ;;  %7732 = vmatprep.mubr.msk.bf16.mxu1 %vm680_vm7, %v10192_v37  ;;  %11421 = vst [vmem:[#allocation6_spill] sm:$0xff] %v10402_v32  ;;  %v10412_v37 = vsel %vm9624_vm1, %v5969_v39, %v5970_v7  ;;  %v10428_v7 = vsel %vm9624_vm1, %v5976_v38, %v5977_v58  ;;  %v5983_v39 = vrot.slane %v5981_v12, 4  ;;  %v7173_v32 = vrot.slane %v5856_v36, 9 }
 0x323   : > { %7762 = vmatprep.subr.bf16.mxu1 %v8172_v18  ;;  %11422 = vst [vmem:[#allocation13_spill] sm:$0xff] %v10412_v37  ;;  %11424 = vst [vmem:[#allocation15_spill] sm:$0xff] %v10428_v7  ;;  %v5988_v8 = vrot.slane %v10379_v9, 5  ;;  %v7174_v37 = vrot.slane %v5857_v62, 9  ;;  %v5995_v36 = vrot.slane %v10406_v3, 5  ;;  %v7175_v58 = vrot.slane %v5858_v35, 9 }
 0x324   : > { %v10444_v38 = vsel %vm9624_vm1, %v5983_v39, %v5984_v16  ;;  %v6002_v12 = vrot.slane %v10422_v42, 5  ;;  %v5860_v62 = vld [vmem:[#allocation2 + $0xcc] sm:$0xe] }
 0x325   : > { %7589 = vmatmul.mubr.msk.bf16.gmra.mrb[36].mxu0 %vm680_vm7, %v8165_v30  ;;  %11426 = vst [vmem:[#allocation17_spill] sm:$0xff] %v10444_v38  ;;  %v5990_v7 = vrot.slane %v5988_v8, 4  ;;  %v10456_v16 = vsel %vm9624_vm1, %v7173_v32, %v5988_v8  ;;  %v10460_v39 = vsel %vm9624_vm1, %v7174_v37, %v5995_v36  ;;  %v5997_v35 = vrot.slane %v5995_v36, 4  ;;  %v8167_v32 = vld [vmem:[#allocation2 + $0x48] sm:$0xff]   ;;  %v8168_v8 = vld [vmem:[#allocation2 + $0x54] sm:$0xff]  }
 0x326   : > { %7592 = vmatprep.mubr.msk.bf16.mxu0 %vm680_vm7, %v8166_v40  ;;  %7763 = vmatpush3.bf16.msra.mxu1 %v8172_v18  ;;  %v5991_v40 = vrot.slane %v10387_v43, 5  ;;  %v10452_v18 = vld [vmem:[#allocation2 + $0xc8] sm:$0x1]  ;;  %11427 = vst [vmem:[#allocation18_spill] sm:$0xff] %v10460_v39  ;;  %v6004_v38 = vrot.slane %v6002_v12, 4  ;;  %v6011_v37 = vrot.slane %v6009_v50, 4 }
 0x327   : > { %v10476_v36 = vsel %vm9624_vm1, %v5997_v35, %v5998_v24  ;;  %v6012_v24 = vrot.slane %v10452_v18, 5  ;;  %v6016_v35 = vrot.slane %v10482_v15, 5 }
 0x328   : > { %v10467_v30 = vsel %vm9624_vm1, %v5990_v7, %v5991_v40  ;;  %11428 = vst [vmem:[#allocation19_spill] sm:$0xff] %v10476_v36  ;;  %v7177_v7 = vrot.slane %v5860_v62, 9  ;;  %v10484_v40 = vld [vmem:[#allocation2 + $0xd4] sm:$0x1]  ;;  %v10490_v22 = vsel %vm9624_vm1, %v6004_v38, %v6005_v52  ;;  %v11431_v52 = vshrl.u32 %v10261_v54, 16 }
 0x329   : > { %7733 = vmatmul.mubr.msk.bf16.gmra.mrb[4].mxu1 %vm680_vm7, %v10202_v11  ;;  %v10480_v11 = vsel %vm9624_vm1, %v7175_v58, %v6002_v12  ;;  %11429 = vst [vmem:[#allocation20_spill] sm:$0xff] %v10490_v22  ;;  %v11430_v58 = vshll.u32 %v10261_v54, 16  ;;  %v11432_v36 = vshrl.u32 %v10275_v48, 16  ;;  %v11433_v62 = vshll.u32 %v10275_v48, 16 }
 0x32a   : > { %7736 = vmatprep.mubr.msk.bf16.mxu1 %vm680_vm7, %v10242_v47  ;;  %v6019_v47 = vrot.slane %v10484_v40, 5  ;;  %v5388_v38 = vrot.slane %v11431_v52, 4  ;;  %v10521_v54 = vsel %vm9624_vm1, %v7177_v7, %v6016_v35  ;;  %v6018_v52 = vrot.slane %v6016_v35, 4 }
 0x32b   : > { %v10496_v12 = vrot.slane %v11430_v58, 5  ;;  %v5399_v39 = vrot.slane %v11432_v36, 4  ;;  %v10513_v58 = vsel %vm9624_vm1, %v6011_v37, %v6012_v24  ;;  %v5402_v22 = vrot.slane %v11433_v62, 5 }
 0x32c   : > { %v11436_v37 = vsel %vm8825_vm11, %v10231_v55, %v10248_v5  ;;  %v11437_v36 = vsel %vm8825_vm11, %v10229_v13, %v10177_v1  ;;  %v11438_v24 = vshll.u32 %v10285_v28, 16  ;;  %v11441_v55 = vsel %vm8825_vm11, %v10234_v27, %v10187_v19 }
 0x32d   : > { %7593 = vmatmul.mubr.msk.bf16.gmra.mrb[40].mxu0 %vm680_vm7, %v8167_v32  ;;  %v10509_v32 = vsel %vm9624_vm1, %v7176_v20, %v6009_v50  ;;  %v11434_v50 = vsel %vm8825_vm11, %v10223_v23, %v10227_v4  ;;  %v11435_v20 = vsel %vm8825_vm11, %v10213_v46, %v10175_v51  ;;  %v7134_v7 = vcombine.low %v11437_v36, %v11436_v37  ;;  %v5141_v51 = vld [vmem:[#allocation2 + $0x9c] sm:$0xf]  ;;  %v8170_v37 = vld [vmem:[#allocation2 + $0x6c] sm:$0xff]  }
 0x32e   : > { %7596 = vmatprep.mubr.msk.bf16.mxu0 %vm680_vm7, %v8168_v8  ;;  %v7192_v8 = vcombine.low %v10509_v32, %v10513_v58  ;;  %v7133_v48 = vcombine.low %v11435_v20, %v11434_v50  ;;  %v10545_v23 = vrot.slane %v11438_v24, 5  ;;  %v11439_v4 = vshrl.u32 %v10285_v28, 16  ;;  %v5144_v50 = vld [vmem:[#allocation2 + $0xa8] sm:$0xf] }
 0x32f   : > { %v11440_v46 = vsel %vm8825_vm11, %v10250_v29, %v10272_v33  ;;  %v11442_v13 = vor.u32 %v10240_v49, %v10238_v34  ;;  %v11443_v35 = vshll.u32 %v10236_v59, 16  ;;  %v10566_v20 = vsel %vm9624_vm1, %v6018_v52, %v6019_v47  ;;  %v8169_v34 = vld [vmem:[#allocation2 + $0x60] sm:$0xff]  }
 0x330   : > { %v5412_v62 = vrot.slane %v11439_v4, 4  ;;  %v7135_v1 = vcombine.low %v11441_v55, %v11440_v46  ;;  %v11444_v29 = vor.u32 %v10259_v6, %v10257_v41  ;;  %v5379_v19 = vor.u32 %v10301_v26, %v10283_v21 }
 0x331   : > { %v5356_v5 = vrot.slane %v11442_v13, 4  ;;  %v5370_v28 = vrot.slane %v11443_v35, 5  ;;  %7737 = vmatmul.mubr.msk.bf16.gmra.mrb[8].mxu1 %vm680_vm7, %v7133_v48  ;;  %v5389_v27 = vor.u32 %v5388_v38, %v10496_v12  ;;  %v7193_v59 = vcombine.low %v10521_v54, %v10566_v20 }
 0x332   : > { %v5366_v33 = vrot.slane %v11444_v29, 4  ;;  %7740 = vmatprep.mubr.msk.bf16.mxu1 %vm680_vm7, %v7134_v7  ;;  %v5403_v49 = vor.u32 %v5402_v22, %v5399_v39  ;;  %v5421_v47 = vshrl.u32 %v5141_v51, 16  ;;  %v5424_v52 = vshll.u32 %v5141_v51, 16 }
 0x333   : > { %v5430_v48 = vshll.u32 %v10379_v9, 16  ;;  %v5413_v6 = vor.u32 %v5412_v62, %v10545_v23  ;;  %v5434_v36 = vshrl.u32 %v10379_v9, 16  ;;  %v5445_v24 = vshrl.u32 %v5144_v50, 16 }
 0x334   : > { %v5448_v21 = vshll.u32 %v5144_v50, 16  ;;  %v5361_v26 = vsel %vm8825_vm11, %v5356_v5, %v10257_v41  ;;  %v5392_v38 = vshll.u32 %v10359_v31, 16  ;;  %v5454_v22 = vshll.u32 %v10406_v3, 16 }
 0x335   : > { %7597 = vmatmul.mubr.msk.bf16.gmra.mrb[44].mxu0 %vm680_vm7, %v8169_v34  ;;  %v5458_v39 = vshrl.u32 %v10406_v3, 16  ;;  %v5371_v7 = vsel %vm8825_vm11, %v5366_v33, %v5370_v28  ;;  %v5380_v9 = vrot.slane %v5379_v19, 4  ;;  %v5390_v4 = vrot.slane %v5389_v27, 4  ;;  %v8171_v33 = vld [vmem:[#allocation2 + $0x78] sm:$0xff]  }
 0x336   : > { %7600 = vmatprep.mubr.msk.bf16.mxu0 %vm680_vm7, %v8170_v37  ;;  %v5416_v62 = vshll.u32 %v10371_v10, 16  ;;  %v5404_v51 = vrot.slane %v5403_v49, 4  ;;  %v5423_v46 = vrot.slane %v5421_v47, 4  ;;  %v5426_v55 = vrot.slane %v5424_v52, 5  ;;  %v5147_v37 = vld [vmem:[#allocation2 + $0xb4] sm:$0xf] }
 0x337   : > { %v10592_v13 = vrot.slane %v5430_v48, 5  ;;  %v5414_v41 = vrot.slane %v5413_v6, 4  ;;  %v5436_v31 = vrot.slane %v5434_v36, 4  ;;  %v5447_v5 = vrot.slane %v5445_v24, 4  ;;  %v5150_v52 = vld [vmem:[#allocation2 + $0xc0] sm:$0xf] }
 0x338   : > { %v5450_v35 = vrot.slane %v5448_v21, 5  ;;  %v7136_v50 = vcombine.low %v5361_v26, %v5371_v7  ;;  %v5394_v3 = vrot.slane %v5392_v38, 5  ;;  %v10594_v29 = vrot.slane %v5454_v22, 5 }
 0x339   : > { %v5460_v34 = vrot.slane %v5458_v39, 4  ;;  %7741 = vmatmul.mubr.msk.bf16.gmra.mrb[12].mxu1 %vm680_vm7, %v7135_v1  ;;  %v5385_v10 = vsel %vm8825_vm11, %v5380_v9, %v10496_v12  ;;  %v5418_v28 = vrot.slane %v5416_v62, 5  ;;  %v5409_v27 = vsel %vm8825_vm11, %v5404_v51, %v10545_v23  ;;  %v8173_v1 = vld [vmem:[#allocation2 + $0x84] sm:$0xff]  }
 0x33a   : > { %7744 = vmatprep.mubr.msk.bf16.mxu1 %vm680_vm7, %v7136_v50  ;;  %v5395_v19 = vsel %vm8825_vm11, %v5390_v4, %v5394_v3  ;;  %v5427_v49 = vor.u32 %v5426_v55, %v5423_v46  ;;  %v5440_v47 = vshll.u32 %v10387_v43, 16  ;;  %v5437_v12 = vor.u32 %v5436_v31, %v10592_v13  ;;  %v5153_v31 = vld [vmem:[#allocation2 + $0xcc] sm:$0xf] }
 0x33b   : > { %v5419_v48 = vsel %vm8825_vm11, %v5414_v41, %v5418_v28  ;;  %v5451_v6 = vor.u32 %v5450_v35, %v5447_v5  ;;  %v5469_v36 = vshrl.u32 %v5147_v37, 16  ;;  %v5461_v24 = vor.u32 %v5460_v34, %v10594_v29 }
 0x33c   : > { %v5472_v21 = vshll.u32 %v5147_v37, 16  ;;  %v5478_v26 = vshll.u32 %v10422_v42, 16  ;;  %v5482_v23 = vshrl.u32 %v10422_v42, 16  ;;  %v5493_v43 = vshrl.u32 %v5150_v52, 16 }
 0x33d   : > { %7601 = vmatmul.mubr.msk.bf16.gmra.mrb[48].mxu0 %vm680_vm7, %v8171_v33  ;;  %v5496_v38 = vshll.u32 %v5150_v52, 16  ;;  %v5502_v22 = vshll.u32 %v10433_v17, 16  ;;  %v5506_v39 = vshrl.u32 %v10433_v17, 16  ;;  %v7137_v7 = vcombine.low %v5385_v10, %v5395_v19  ;;  %v8174_v10 = vld [vmem:[#allocation2 + $0x90] sm:$0xff]  }
 0x33e   : > { %7604 = vmatprep.mubr.msk.bf16.mxu0 %vm680_vm7, %v8173_v1  ;;  %v7138_v9 = vcombine.low %v5409_v27, %v5419_v48  ;;  %v5428_v4 = vrot.slane %v5427_v49, 4  ;;  %v5442_v62 = vrot.slane %v5440_v47, 5  ;;  %v5438_v51 = vrot.slane %v5437_v12, 4  ;;  %v8175_v27 = vld [vmem:[#allocation2 + $0x9c] sm:$0xff]  }
 0x33f   : > { %v5452_v46 = vrot.slane %v5451_v6, 4  ;;  %v5464_v55 = vshll.u32 %v10420_v44, 16  ;;  %v5471_v41 = vrot.slane %v5469_v36, 4  ;;  %v5462_v5 = vrot.slane %v5461_v24, 4 }
 0x340   : > { %v5474_v42 = vrot.slane %v5472_v21, 5  ;;  %v5480_v35 = vrot.slane %v5478_v26, 5  ;;  %v5484_v50 = vrot.slane %v5482_v23, 4  ;;  %v5495_v3 = vrot.slane %v5493_v43, 4 }
 0x341   : > { %7745 = vmatmul.mubr.msk.bf16.gmra.mrb[16].mxu1 %vm680_vm7, %v7137_v7  ;;  %v5498_v34 = vrot.slane %v5496_v38, 5  ;;  %v5504_v37 = vrot.slane %v5502_v22, 5  ;;  %v5508_v17 = vrot.slane %v5506_v39, 4  ;;  %v5517_v28 = vshrl.u32 %v5153_v31, 16 }
 0x342   : > { %7748 = vmatprep.mubr.msk.bf16.mxu1 %vm680_vm7, %v7138_v9  ;;  %v5520_v33 = vshll.u32 %v5153_v31, 16  ;;  %v5526_v19 = vshll.u32 %v10482_v15, 16  ;;  %v5530_v44 = vshrl.u32 %v10482_v15, 16  ;;  %v5433_v49 = vsel %vm8825_vm11, %v5428_v4, %v10592_v13  ;;  %v8176_v4 = vld [vmem:[#allocation2 + $0xa8] sm:$0xff]  }
 0x343   : > { %v5466_v47 = vrot.slane %v5464_v55, 5  ;;  %v5443_v52 = vsel %vm8825_vm11, %v5438_v51, %v5442_v62  ;;  %v5457_v1 = vsel %vm8825_vm11, %v5452_v46, %v10594_v29  ;;  %v5475_v48 = vor.u32 %v5474_v42, %v5471_v41  ;;  %v8177_v55 = vld [vmem:[#allocation2 + $0xb4] sm:$0xff]  }
 0x344   : > { %v5485_v12 = vor.u32 %v5484_v50, %v5480_v35  ;;  %v5488_v6 = vshll.u32 %v10431_v2, 16  ;;  %v5499_v13 = vor.u32 %v5498_v34, %v5495_v3  ;;  %v5509_v36 = vor.u32 %v5508_v17, %v5504_v37  ;;  %v8230_v50 = vld [vmem:[#allocation2 + $0x1c] sm:$0xf] }
 0x345   : > { %7605 = vmatmul.mubr.msk.bf16.gmra.mrb[52].mxu0 %vm680_vm7, %v8174_v10  ;;  %v5467_v15 = vsel %vm8825_vm11, %v5462_v5, %v5466_v47  ;;  %v5519_v24 = vrot.slane %v5517_v28, 4  ;;  %v5522_v21 = vrot.slane %v5520_v33, 5  ;;  %v5528_v26 = vrot.slane %v5526_v19, 5  ;;  %v5845_v33 = vld [vmem:[#allocation2 + $0x18] sm:$0xe]  ;;  %v8178_v19 = vld [vmem:[#allocation2 + $0xc0] sm:$0xff]  }
 0x346   : > { %7608 = vmatprep.mubr.msk.bf16.mxu0 %vm680_vm7, %v8175_v27  ;;  %v5532_v23 = vrot.slane %v5530_v44, 4  ;;  %v7139_v43 = vcombine.low %v5433_v49, %v5443_v52  ;;  %v5512_v38 = vshll.u32 %v10452_v18, 16  ;;  %v7140_v22 = vcombine.low %v5457_v1, %v5467_v15  ;;  %v8231_v47 = vld [vmem:[#allocation2 + $0x28] sm:$0xf]  ;;  %v5846_v15 = vld [vmem:[#allocation2 + $0x24] sm:$0xe] }
 0x347   : > { %v5476_v29 = vrot.slane %v5475_v48, 4  ;;  %v5486_v39 = vrot.slane %v5485_v12, 4  ;;  %v5500_v7 = vrot.slane %v5499_v13, 4  ;;  %v5510_v9 = vrot.slane %v5509_v36, 4 }
 0x348   : > { %v5490_v2 = vrot.slane %v5488_v6, 5  ;;  %v5523_v62 = vor.u32 %v5522_v21, %v5519_v24  ;;  %v5533_v51 = vor.u32 %v5532_v23, %v5528_v26  ;;  %v5536_v46 = vshll.u32 %v10484_v40, 16 }
 0x349   : > { %7749 = vmatmul.mubr.msk.bf16.gmra.mrb[20].mxu1 %vm680_vm7, %v7139_v43  ;;  %v5514_v41 = vrot.slane %v5512_v38, 5  ;;  %v5481_v18 = vsel %vm8825_vm11, %v5476_v29, %v5480_v35  ;;  %v5505_v5 = vsel %vm8825_vm11, %v5500_v7, %v5504_v37  ;;  %v5911_v40 = vrot.slane %v8230_v50, 5  ;;  %v11449_v43 = vld [vmem:[#allocation12_spill] sm:$0xff]  ;;  %v11452_v29 = vld [vmem:[#allocation7_spill] sm:$0xff]  ;;  %v11458_v7 = vld [vmem:[#allocation13_spill] sm:$0xff] }
 0x34a   : > { %7752 = vmatprep.mubr.msk.bf16.mxu1 %vm680_vm7, %v7140_v22  ;;  %v5491_v31 = vsel %vm8825_vm11, %v5486_v39, %v5490_v2  ;;  %v5524_v3 = vrot.slane %v5523_v62, 4  ;;  %v5534_v34 = vrot.slane %v5533_v51, 4  ;;  %v5538_v17 = vrot.slane %v5536_v46, 5  ;;  %v11451_v22 = vld [vmem:[#allocation10_spill] sm:$0xff]  ;;  %v11463_v2 = vld [vmem:[#allocation16_spill] sm:$0xff]  ;;  %v11464_v62 = vld [vmem:[#allocation17_spill] sm:$0xff] }
 0x34b   : > { %v5515_v42 = vsel %vm8825_vm11, %v5510_v9, %v5514_v41  ;;  %v7141_v10 = vcombine.low %v5481_v18, %v5491_v31  ;;  %v5913_v35 = vrot.slane %v5911_v40, 4  ;;  %v7162_v27 = vrot.slane %v5845_v33, 9  ;;  %v11455_v39 = vld [vmem:[#allocation6_spill] sm:$0xff]  ;;  %v11461_v9 = vld [vmem:[#allocation15_spill] sm:$0xff]  ;;  %v11470_v31 = vld [vmem:[#allocation20_spill] sm:$0xff] }
 0x34c   : > { %v7142_v28 = vcombine.low %v5505_v5, %v5515_v42  ;;  %v5529_v37 = vsel %vm8825_vm11, %v5524_v3, %v5528_v26  ;;  %v5539_v44 = vsel %vm8825_vm11, %v5534_v34, %v5538_v17  ;;  %v5914_v49 = vrot.slane %v10038_v0, 5  ;;  %v11468_v41 = vld [vmem:[#allocation19_spill] sm:$0xff] }
 0x34d   : > { %7609 = vmatmul.mubr.msk.bf16.gmra.mrb[56].mxu0 %vm680_vm7, %v8176_v4  ;;  %v5918_v52 = vrot.slane %v8231_v47, 5  ;;  %v7143_v1 = vcombine.low %v5529_v37, %v5539_v44  ;;  %v5912_v12 = vsel %vm9624_vm1, %v7162_v27, %v5911_v40  ;;  %v7163_v25 = vrot.slane %v5846_v15, 9 }
 0x34e   : > { %7612 = vmatprep.mubr.msk.bf16.mxu0 %vm680_vm7, %v8177_v55  ;;  %v5915_v48 = vsel %vm9624_vm1, %v5913_v35, %v5914_v49  ;;  %v5921_v0 = vrot.slane %v10067_v63, 5  ;;  %v11445_v26 = vcombine.low %v10310_v60, %v10315_v56  ;;  %v11446_v23 = vcombine.low %v10328_v45, %v10336_v61  ;;  %v11454_v60 = vld [vmem:[#allocation8_spill] sm:$0xff]  ;;  %v11457_v61 = vld [vmem:[#allocation9_spill] sm:$0xff]  ;;  %v11467_v55 = vld [vmem:[#allocation18_spill] sm:$0xff] }
 0x34f   : > { %v7178_v6 = vcombine.low %v5912_v12, %v5915_v48  ;;  %v5920_v13 = vrot.slane %v5918_v52, 4  ;;  %v5919_v24 = vsel %vm9624_vm1, %v7163_v25, %v5918_v52  ;;  %v11447_v63 = vcombine.low %v10332_v57, %v10345_v53  ;;  %v11460_v53 = vld [vmem:[#allocation14_spill] sm:$0xff] }
 0x350   : > { %v11450_v38 = vcombine.low %v11448_v14, %v11449_v43  ;;  %v11453_v56 = vcombine.low %v11451_v22, %v11452_v29  ;;  %v11456_v45 = vcombine.low %v11454_v60, %v11455_v39  ;;  %v11459_v57 = vcombine.low %v11457_v61, %v11458_v7 }
 0x351   : > { %7753 = vmatmul.mubr.msk.bf16.gmra.mrb[24].mxu1 %vm680_vm7, %v7141_v10  ;;  %v5922_v36 = vsel %vm9624_vm1, %v5920_v13, %v5921_v0  ;;  %v11462_v4 = vcombine.low %v11460_v53, %v11461_v9  ;;  %v11465_v51 = vcombine.low %v11463_v2, %v11464_v62  ;;  %v11466_v46 = vcombine.low %v10456_v16, %v10467_v30 }
 0x352   : > { %7756 = vmatprep.mubr.msk.bf16.mxu1 %vm680_vm7, %v7142_v28  ;;  %v7179_v21 = vcombine.low %v5919_v24, %v5922_v36  ;;  %v11469_v18 = vcombine.low %v11467_v55, %v11468_v41  ;;  %v11471_v5 = vcombine.low %v10480_v11, %v11470_v31 }
 0x355   : > { %7613 = vmatmul.mubr.msk.bf16.gmra.mrb[60].mxu0 %vm680_vm7, %v8178_v19 }
 0x359   : > { %7757 = vmatmul.mubr.msk.bf16.gmra.mrb[28].mxu1 %vm680_vm7, %v7143_v1 }
 0x35a   : > { %7764 = vmatprep.mubr.msk.bf16.mxu1 %vm680_vm7, %v7178_v6 }
 0x361   : > { %7765 = vmatmul.mubr.msk.bf16.vlgmr.msra.gmra.mrb[0].mxu1 %vm680_vm7, %v7179_v21 }
 0x362   : > { %7768 = vmatprep.mubr.msk.bf16.mxu1 %vm680_vm7, %v11445_v26 }
 0x369   : > { %7769 = vmatmul.mubr.msk.bf16.gmra.mrb[4].mxu1 %vm680_vm7, %v11446_v23 }
 0x36a   : > { %7772 = vmatprep.mubr.msk.bf16.mxu1 %vm680_vm7, %v11447_v63 }
 0x371   : > { %7773 = vmatmul.mubr.msk.bf16.gmra.mrb[8].mxu1 %vm680_vm7, %v11450_v38 }
 0x372   : > { %7776 = vmatprep.mubr.msk.bf16.mxu1 %vm680_vm7, %v11453_v56 }
 0x379   : > { %7777 = vmatmul.mubr.msk.bf16.gmra.mrb[12].mxu1 %vm680_vm7, %v11456_v45 }
 0x37a   : > { %7780 = vmatprep.mubr.msk.bf16.mxu1 %vm680_vm7, %v11459_v57 }
 0x381   : > { %7781 = vmatmul.mubr.msk.bf16.gmra.mrb[16].mxu1 %vm680_vm7, %v11462_v4 }
 0x382   : > { %7784 = vmatprep.mubr.msk.bf16.mxu1 %vm680_vm7, %v11465_v51 }
 0x389   : > { %7785 = vmatmul.mubr.msk.bf16.gmra.mrb[20].mxu1 %vm680_vm7, %v11466_v46 }
 0x38a   : > { %7788 = vmatprep.mubr.msk.bf16.mxu1 %vm680_vm7, %v11469_v18 }
 0x391   : > { %7789 = vmatmul.mubr.msk.bf16.gmra.mrb[24].mxu1 %vm680_vm7, %v11471_v5 }
 0x392   : > { %7792 = vmatprep.mubr.msk.bf16.mxu1 %vm680_vm7, %v7192_v8 }
 0x399   : > { %7793 = vmatmul.mubr.msk.bf16.gmra.mrb[28].mxu1 %vm680_vm7, %v7193_v59 }
 0x3f0   : > { %v7586_v30 = vpop.f32.mrb[32].mxu0 }
 0x3f1   : > { %v3361_v16 = vpop.f32.mrb[33].mxu0 }
 0x3f2   : > { %v7587_v42 = vpop.f32.mrb[34].mxu0 }
 0x3f3   : > { %v3364_v50 = vpop.f32.mrb[35].mxu0 }
 0x3f8   : > { %v7590_v40 = vpop.f32.mrb[36].mxu0 }
 0x3f9   : > { %v3377_v3 = vpop.f32.mrb[37].mxu0 }
 0x3fa   : > { %v7591_v34 = vpop.f32.mrb[38].mxu0 }
 0x3fb   : > { %v3380_v11 = vpop.f32.mrb[39].mxu0 }
 0x400   : > { %v7594_v17 = vpop.f32.mrb[40].mxu0 }
 0x401   : > { %v3393_v10 = vpop.f32.mrb[41].mxu0 }
 0x402   : > { %v7595_v28 = vpop.f32.mrb[42].mxu0 }
 0x403   : > { %v3396_v33 = vpop.f32.mrb[43].mxu0 }
 0x408   : > { %v10725_v32 = vpop.f32.mrb[44].mxu0 }
 0x409   : > { %v10727_v58 = vpop.f32.mrb[45].mxu0 }
 0x40a   : > { %v10729_v8 = vpop.f32.mrb[46].mxu0 }
 0x40b   : > { %v10731_v54 = vpop.f32.mrb[47].mxu0 }
 0x410   : > { %v10733_v20 = vpop.f32.mrb[48].mxu0 }
 0x411   : > { %v10735_v59 = vpop.f32.mrb[49].mxu0 }
 0x412   : > { %v10737_v35 = vpop.f32.mrb[50].mxu0 }
 0x413   : > { %v10739_v19 = vpop.f32.mrb[51].mxu0 }
 0x418   : > { %v10741_v37 = vpop.f32.mrb[52].mxu0 }
 0x419   : > { %v10743_v44 = vpop.f32.mrb[53].mxu0 }
 0x41a   : > { %v10745_v27 = vpop.f32.mrb[54].mxu0 }
 0x41b   : > { %v10747_v49 = vpop.f32.mrb[55].mxu0 }
 0x420   : > { %v10749_v47 = vpop.f32.mrb[56].mxu0 }
 0x421   : > { %v10751_v52 = vpop.f32.mrb[57].mxu0 }
 0x422   : > { %v10753_v1 = vpop.f32.mrb[58].mxu0 }
 0x423   : > { %v10755_v48 = vpop.f32.mrb[59].mxu0 }
 0x428   : > { %v10757_v12 = vpop.f32.mrb[60].mxu0 }
 0x429   : > { %v10759_v15 = vpop.f32.mrb[61].mxu0 }
 0x42a   : > { %v10761_v6 = vpop.f32.mrb[62].mxu0 }
 0x42b   : > { %v10763_v13 = vpop.f32.mrb[63].mxu0 }
 0x434   : > { %v7766_v25 = vpop.f32.mrb[0].mxu1 }
 0x435   : > { %v10765_v0 = vadd.f32 %v7766_v25, %v7586_v30  ;;  %v6167_v36 = vpop.f32.mrb[1].mxu1 }
 0x436   : > { %v10767_v24 = vadd.f32 %v6167_v36, %v3361_v16  ;;  %v7767_v21 = vpop.f32.mrb[2].mxu1 }
 0x437   : > { %v10769_v26 = vadd.f32 %v7767_v21, %v7587_v42  ;;  %v6170_v23 = vpop.f32.mrb[3].mxu1  ;;  %v6331_v22 = vsel %vm680_vm7, %v10765_v0, 0.0 }
 0x438   : > { %v10771_v63 = vadd.f32 %v6170_v23, %v3364_v50  ;;  %v6328_v14 = vsel %vm680_vm7, %v10767_v24, 0.0 }
 0x439   : > { %v6333_v45 = vsel %vm680_vm7, %v10769_v26, 0.0 }
 0x43a   : > { %v6329_v43 = vsel %vm680_vm7, %v10771_v63, 0.0 }
 0x43b   : > { %v6330_v38 = vadd.f32 %v6329_v43, %v6328_v14 }
 0x43c   : > { %v7770_v29 = vpop.f32.mrb[4].mxu1 }
 0x43d   : > { %v6332_v56 = vadd.f32 %v6331_v22, %v6330_v38  ;;  %v10779_v60 = vadd.f32 %v7770_v29, %v7590_v40  ;;  %v6183_v39 = vpop.f32.mrb[5].mxu1 }
 0x43e   : > { %v10783_v61 = vadd.f32 %v6183_v39, %v3377_v3  ;;  %v7771_v7 = vpop.f32.mrb[6].mxu1 }
 0x43f   : > { %v6334_v57 = vadd.f32 %v6333_v45, %v6332_v56  ;;  %v10785_v53 = vadd.f32 %v7771_v7, %v7591_v34  ;;  %v6186_v9 = vpop.f32.mrb[7].mxu1  ;;  %v6339_v55 = vsel %vm680_vm7, %v10779_v60, 0.0 }
 0x440   : > { %v6335_v4 = vsel %vm680_vm7, %v10783_v61, 0.0  ;;  %v10789_v2 = vadd.f32 %v6186_v9, %v3380_v11 }
 0x441   : > { %v6336_v62 = vadd.f32 %v6335_v4, %v6334_v57  ;;  %v6341_v30 = vsel %vm680_vm7, %v10785_v53, 0.0 }
 0x442   : > { %v6337_v51 = vsel %vm680_vm7, %v10789_v2, 0.0 }
 0x443   : > { %v6338_v46 = vadd.f32 %v6337_v51, %v6336_v62 }
 0x444   : > { %v7774_v41 = vpop.f32.mrb[8].mxu1 }
 0x445   : > { %v6340_v18 = vadd.f32 %v6339_v55, %v6338_v46  ;;  %v10795_v31 = vadd.f32 %v7774_v41, %v7594_v17  ;;  %v6199_v5 = vpop.f32.mrb[9].mxu1 }
 0x446   : > { %v10799_v16 = vadd.f32 %v6199_v5, %v3393_v10  ;;  %v7775_v42 = vpop.f32.mrb[10].mxu1 }
 0x447   : > { %v6342_v50 = vadd.f32 %v6341_v30, %v6340_v18  ;;  %v10801_v40 = vadd.f32 %v7775_v42, %v7595_v28  ;;  %v6202_v3 = vpop.f32.mrb[11].mxu1  ;;  %v6347_v21 = vsel %vm680_vm7, %v10795_v31, 0.0 }
 0x448   : > { %v6343_v34 = vsel %vm680_vm7, %v10799_v16, 0.0  ;;  %v10805_v11 = vadd.f32 %v6202_v3, %v3396_v33 }
 0x449   : > { %v6344_v25 = vadd.f32 %v6343_v34, %v6342_v50  ;;  %v6349_v43 = vsel %vm680_vm7, %v10801_v40, 0.0 }
 0x44a   : > { %v6345_v17 = vsel %vm680_vm7, %v10805_v11, 0.0 }
 0x44b   : > { %v6346_v36 = vadd.f32 %v6345_v17, %v6344_v25 }
 0x44c   : > { %v7778_v10 = vpop.f32.mrb[12].mxu1 }
 0x44d   : > { %v6348_v23 = vadd.f32 %v6347_v21, %v6346_v36  ;;  %v10812_v14 = vadd.f32 %v7778_v10, %v10725_v32  ;;  %v6215_v28 = vpop.f32.mrb[13].mxu1 }
 0x44e   : > { %v10817_v33 = vadd.f32 %v6215_v28, %v10727_v58  ;;  %v7779_v38 = vpop.f32.mrb[14].mxu1 }
 0x44f   : > { %v6350_v22 = vadd.f32 %v6349_v43, %v6348_v23  ;;  %v10820_v29 = vadd.f32 %v7779_v38, %v10729_v8  ;;  %v6218_v56 = vpop.f32.mrb[15].mxu1  ;;  %v6355_v58 = vsel %vm680_vm7, %v10812_v14, 0.0 }
 0x450   : > { %v6351_v39 = vsel %vm680_vm7, %v10817_v33, 0.0  ;;  %v10825_v45 = vadd.f32 %v6218_v56, %v10731_v54 }
 0x451   : > { %v6352_v32 = vadd.f32 %v6351_v39, %v6350_v22  ;;  %v6357_v51 = vsel %vm680_vm7, %v10820_v29, 0.0 }
 0x452   : > { %v6353_v7 = vsel %vm680_vm7, %v10825_v45, 0.0 }
 0x453   : > { %v6354_v57 = vadd.f32 %v6353_v7, %v6352_v32 }
 0x454   : > { %v7782_v9 = vpop.f32.mrb[16].mxu1 }
 0x455   : > { %v6356_v4 = vadd.f32 %v6355_v58, %v6354_v57  ;;  %v10832_v8 = vadd.f32 %v7782_v9, %v10733_v20  ;;  %v6231_v62 = vpop.f32.mrb[17].mxu1 }
 0x456   : > { %v10837_v54 = vadd.f32 %v6231_v62, %v10735_v59  ;;  %v7783_v46 = vpop.f32.mrb[18].mxu1 }
 0x457   : > { %v6358_v55 = vadd.f32 %v6357_v51, %v6356_v4  ;;  %v10840_v41 = vadd.f32 %v7783_v46, %v10737_v35  ;;  %v6234_v18 = vpop.f32.mrb[19].mxu1  ;;  %v6363_v59 = vsel %vm680_vm7, %v10832_v8, 0.0 }
 0x458   : > { %v6359_v5 = vsel %vm680_vm7, %v10837_v54, 0.0  ;;  %v10845_v30 = vadd.f32 %v6234_v18, %v10739_v19 }
 0x459   : > { %v6360_v20 = vadd.f32 %v6359_v5, %v6358_v55  ;;  %v6365_v17 = vsel %vm680_vm7, %v10840_v41, 0.0 }
 0x45a   : > { %v6361_v42 = vsel %vm680_vm7, %v10845_v30, 0.0 }
 0x45b   : > { %v6362_v50 = vadd.f32 %v6361_v42, %v6360_v20 }
 0x45c   : > { %v7786_v3 = vpop.f32.mrb[20].mxu1 }
 0x45d   : > { %v6364_v34 = vadd.f32 %v6363_v59, %v6362_v50  ;;  %v10852_v35 = vadd.f32 %v7786_v3, %v10741_v37  ;;  %v6247_v25 = vpop.f32.mrb[21].mxu1 }
 0x45e   : > { %v10857_v19 = vadd.f32 %v6247_v25, %v10743_v44  ;;  %v7787_v36 = vpop.f32.mrb[22].mxu1 }
 0x45f   : > { %v6366_v21 = vadd.f32 %v6365_v17, %v6364_v34  ;;  %v10860_v10 = vadd.f32 %v7787_v36, %v10745_v27  ;;  %v6250_v23 = vpop.f32.mrb[23].mxu1  ;;  %v6371_v56 = vsel %vm680_vm7, %v10852_v35, 0.0 }
 0x460   : > { %v6367_v28 = vsel %vm680_vm7, %v10857_v19, 0.0  ;;  %v7819_v43 = vadd.f32 %v6250_v23, %v10747_v49 }
 0x461   : > { %v6368_v37 = vadd.f32 %v6367_v28, %v6366_v21  ;;  %v6373_v27 = vsel %vm680_vm7, %v10860_v10, 0.0 }
 0x462   : > { %v6369_v38 = vsel %vm680_vm7, %v7819_v43, 0.0 }
 0x463   : > { %v6370_v22 = vadd.f32 %v6369_v38, %v6368_v37 }
 0x464   : > { %v7790_v44 = vpop.f32.mrb[24].mxu1 }
 0x465   : > { %v6372_v39 = vadd.f32 %v6371_v56, %v6370_v22  ;;  %v7820_v32 = vadd.f32 %v7790_v44, %v10749_v47  ;;  %v6263_v7 = vpop.f32.mrb[25].mxu1 }
 0x466   : > { %v7821_v57 = vadd.f32 %v6263_v7, %v10751_v52  ;;  %v7791_v58 = vpop.f32.mrb[26].mxu1 }
 0x467   : > { %v6374_v9 = vadd.f32 %v6373_v27, %v6372_v39  ;;  %v7822_v49 = vadd.f32 %v7791_v58, %v10753_v1  ;;  %v6266_v4 = vpop.f32.mrb[27].mxu1  ;;  %v6379_v47 = vsel %vm680_vm7, %v7820_v32, 0.0 }
 0x468   : > { %v6375_v62 = vsel %vm680_vm7, %v7821_v57, 0.0  ;;  %v7823_v51 = vadd.f32 %v6266_v4, %v10755_v48 }
 0x469   : > { %v6376_v46 = vadd.f32 %v6375_v62, %v6374_v9  ;;  %v6381_v50 = vsel %vm680_vm7, %v7822_v49, 0.0 }
 0x46a   : > { %v6377_v55 = vsel %vm680_vm7, %v7823_v51, 0.0 }
 0x46b   : > { %v6378_v18 = vadd.f32 %v6377_v55, %v6376_v46 }
 0x46c   : > { %v7794_v5 = vpop.f32.mrb[28].mxu1 }
 0x46d   : > { %v6380_v20 = vadd.f32 %v6379_v47, %v6378_v18  ;;  %v7824_v42 = vadd.f32 %v7794_v5, %v10757_v12  ;;  %v6279_v52 = vpop.f32.mrb[29].mxu1 }
 0x46e   : > { %v7825_v1 = vadd.f32 %v6279_v52, %v10759_v15  ;;  %v7795_v59 = vpop.f32.mrb[30].mxu1 }
 0x46f   : > { %v6382_v3 = vadd.f32 %v6381_v50, %v6380_v20  ;;  %v7826_v34 = vadd.f32 %v7795_v59, %v10761_v6  ;;  %v6282_v48 = vpop.f32.mrb[31].mxu1  ;;  %v6387_v12 = vsel %vm680_vm7, %v7824_v42, 0.0 }
 0x470   : > { %v6383_v25 = vsel %vm680_vm7, %v7825_v1, 0.0  ;;  %v7827_v17 = vadd.f32 %v6282_v48, %v10763_v13 }
 0x471   : > { %v6384_v36 = vadd.f32 %v6383_v25, %v6382_v3  ;;  %v6389_v37 = vsel %vm680_vm7, %v7826_v34, 0.0 }
 0x472   : > { %v6385_v21 = vsel %vm680_vm7, %v7827_v17, 0.0 }
 0x473   : > { %v6386_v23 = vadd.f32 %v6385_v21, %v6384_v36 }
 0x475   : > { %v6388_v28 = vadd.f32 %v6387_v12, %v6386_v23 }
 0x477   : > { %v6390_v38 = vadd.f32 %v6389_v37, %v6388_v28 }
 0x479   : > { %v6391_v15 = vrot.slane %v6390_v38, 4 }
 0x47b   : > { %v6392_v22 = vadd.f32 %v6391_v15, %v6390_v38 }
 0x47d   : > { %v6393_v56 = vrot.slane %v6392_v22, 2 }
 0x47f   : > { %v6394_v44 = vadd.f32 %v6393_v56, %v6392_v22 }
 0x481   : > { %v6395_v6 = vrot.slane %v6394_v44, 1 }
 0x483   : > { %v6396_v39 = vadd.f32 %v6395_v6, %v6394_v44 }
 0x485   : > { %v6397_v7 = vmul.f32 0.00390625, %v6396_v39 }
 0x487   : > { %v10887_v27 = vsub.f32 %v10805_v11, %v6397_v7  ;;  %v10890_v13 = vsub.f32 %v10801_v40, %v6397_v7  ;;  %v10893_v58 = vsub.f32 %v10817_v33, %v6397_v7  ;;  %v10896_v9 = vsub.f32 %v10825_v45, %v6397_v7 }
 0x488   : > { %v10899_v4 = vsub.f32 %v10812_v14, %v6397_v7  ;;  %v10902_v62 = vsub.f32 %v10820_v29, %v6397_v7  ;;  %v10905_v46 = vsub.f32 %v10837_v54, %v6397_v7  ;;  %v10908_v11 = vsub.f32 %v10845_v30, %v6397_v7 }
 0x489   : > { %v10911_v40 = vsub.f32 %v10832_v8, %v6397_v7  ;;  %v10914_v33 = vsub.f32 %v10840_v41, %v6397_v7  ;;  %v10917_v45 = vsub.f32 %v10857_v19, %v6397_v7  ;;  %v10919_v14 = vsub.f32 %v7819_v43, %v6397_v7 }
 0x48a   : > { %v10922_v29 = vsub.f32 %v10852_v35, %v6397_v7  ;;  %v10925_v54 = vsub.f32 %v10860_v10, %v6397_v7  ;;  %v10927_v55 = vsub.f32 %v7821_v57, %v6397_v7  ;;  %v10929_v30 = vsub.f32 %v7823_v51, %v6397_v7 }
 0x48b   : > { %v10931_v8 = vsub.f32 %v7820_v32, %v6397_v7  ;;  %v10933_v18 = vsub.f32 %v7822_v49, %v6397_v7  ;;  %v10935_v41 = vsub.f32 %v7825_v1, %v6397_v7  ;;  %v10937_v19 = vsub.f32 %v7827_v17, %v6397_v7 }
 0x48c   : > { %v10939_v43 = vsub.f32 %v7824_v42, %v6397_v7  ;;  %v10941_v47 = vsub.f32 %v7826_v34, %v6397_v7  ;;  %v10944_v35 = vsub.f32 %v10767_v24, %v6397_v7  ;;  %v10947_v10 = vsub.f32 %v10771_v63, %v6397_v7 }
 0x48d   : > { %v10950_v57 = vsub.f32 %v10765_v0, %v6397_v7  ;;  %v10953_v32 = vsub.f32 %v10769_v26, %v6397_v7  ;;  %v10960_v5 = vsub.f32 %v10783_v61, %v6397_v7  ;;  %v10965_v63 = vsub.f32 %v10789_v2, %v6397_v7 }
 0x48e   : > { %v6430_v49 = vmul.f32 %v10944_v35, %v10944_v35  ;;  %v6431_v51 = vmul.f32 %v10947_v10, %v10947_v10  ;;  %v10972_v52 = vsub.f32 %v10779_v60, %v6397_v7  ;;  %v10978_v2 = vsub.f32 %v10785_v53, %v6397_v7 }
 0x48f   : > { %v6432_v24 = vmul.f32 %v10950_v57, %v10950_v57  ;;  %v6433_v0 = vmul.f32 %v10953_v32, %v10953_v32  ;;  %v6434_v61 = vmul.f32 %v10960_v5, %v10960_v5  ;;  %v6435_v59 = vmul.f32 %v10965_v63, %v10965_v63 }
 0x490   : > { %v6462_v26 = vsel %vm680_vm7, %v6430_v49, 0.0  ;;  %v6463_v20 = vsel %vm680_vm7, %v6431_v51, 0.0  ;;  %v10984_v48 = vsub.f32 %v10799_v16, %v6397_v7  ;;  %v6436_v60 = vmul.f32 %v10972_v52, %v10972_v52 }
 0x491   : > { %v6464_v42 = vadd.f32 %v6463_v20, %v6462_v26  ;;  %v6465_v50 = vsel %vm680_vm7, %v6432_v24, 0.0  ;;  %v6467_v3 = vsel %vm680_vm7, %v6433_v0, 0.0  ;;  %v6469_v25 = vsel %vm680_vm7, %v6434_v61, 0.0 }
 0x492   : > { %v6437_v36 = vmul.f32 %v10978_v2, %v10978_v2  ;;  %v6471_v53 = vsel %vm680_vm7, %v6435_v59, 0.0  ;;  %v10993_v23 = vsub.f32 %v10795_v31, %v6397_v7  ;;  %v6438_v12 = vmul.f32 %v10984_v48, %v10984_v48 }
 0x493   : > { %v6466_v1 = vadd.f32 %v6465_v50, %v6464_v42  ;;  %v6473_v16 = vsel %vm680_vm7, %v6436_v60, 0.0  ;;  %v6439_v37 = vmul.f32 %v10887_v27, %v10887_v27  ;;  %v6441_v31 = vmul.f32 %v10890_v13, %v10890_v13 }
 0x494   : > { %v6475_v38 = vsel %vm680_vm7, %v6437_v36, 0.0  ;;  %v6440_v22 = vmul.f32 %v10993_v23, %v10993_v23  ;;  %v6477_v56 = vsel %vm680_vm7, %v6438_v12, 0.0  ;;  %v6442_v7 = vmul.f32 %v10893_v58, %v10893_v58 }
 0x495   : > { %v6468_v34 = vadd.f32 %v6467_v3, %v6466_v1  ;;  %v6479_v6 = vsel %vm680_vm7, %v6439_v37, 0.0  ;;  %v6443_v24 = vmul.f32 %v10896_v9, %v10896_v9  ;;  %v6483_v0 = vsel %vm680_vm7, %v6441_v31, 0.0 }
 0x496   : > { %v6481_v49 = vsel %vm680_vm7, %v6440_v22, 0.0  ;;  %v6444_v20 = vmul.f32 %v10899_v4, %v10899_v4  ;;  %v6485_v42 = vsel %vm680_vm7, %v6442_v7, 0.0  ;;  %v6445_v50 = vmul.f32 %v10902_v62, %v10902_v62 }
 0x497   : > { %v6470_v17 = vadd.f32 %v6469_v25, %v6468_v34  ;;  %v6487_v1 = vsel %vm680_vm7, %v6443_v24, 0.0  ;;  %v6446_v3 = vmul.f32 %v10905_v46, %v10905_v46  ;;  %v6447_v25 = vmul.f32 %v10908_v11, %v10908_v11 }
 0x498   : > { %v6489_v34 = vsel %vm680_vm7, %v6444_v20, 0.0 }
 0x499   : > { %v6472_v21 = vadd.f32 %v6471_v53, %v6470_v17  ;;  %v6491_v17 = vsel %vm680_vm7, %v6445_v50, 0.0  ;;  %v6448_v53 = vmul.f32 %v10911_v40, %v10911_v40 }
 0x49b   : > { %v6474_v28 = vadd.f32 %v6473_v16, %v6472_v21  ;;  %v6493_v21 = vsel %vm680_vm7, %v6446_v3, 0.0  ;;  %v6449_v16 = vmul.f32 %v10914_v33, %v10914_v33 }
 0x49d   : > { %v6476_v15 = vadd.f32 %v6475_v38, %v6474_v28  ;;  %v6495_v28 = vsel %vm680_vm7, %v6447_v25, 0.0  ;;  %v6450_v38 = vmul.f32 %v10917_v45, %v10917_v45 }
 0x49f   : > { %v6478_v44 = vadd.f32 %v6477_v56, %v6476_v15  ;;  %v6497_v15 = vsel %vm680_vm7, %v6448_v53, 0.0  ;;  %v6451_v56 = vmul.f32 %v10919_v14, %v10919_v14 }
 0x4a1   : > { %v6480_v39 = vadd.f32 %v6479_v6, %v6478_v44  ;;  %v6499_v44 = vsel %vm680_vm7, %v6449_v16, 0.0  ;;  %v6452_v6 = vmul.f32 %v10922_v29, %v10922_v29 }
 0x4a3   : > { %v6482_v51 = vadd.f32 %v6481_v49, %v6480_v39  ;;  %v6501_v39 = vsel %vm680_vm7, %v6450_v38, 0.0  ;;  %v6453_v49 = vmul.f32 %v10925_v54, %v10925_v54 }
 0x4a5   : > { %v6484_v26 = vadd.f32 %v6483_v0, %v6482_v51  ;;  %v6503_v51 = vsel %vm680_vm7, %v6451_v56, 0.0  ;;  %v6454_v0 = vmul.f32 %v10927_v55, %v10927_v55 }
 0x4a7   : > { %v6486_v61 = vadd.f32 %v6485_v42, %v6484_v26  ;;  %v6505_v26 = vsel %vm680_vm7, %v6452_v6, 0.0  ;;  %v6455_v42 = vmul.f32 %v10929_v30, %v10929_v30 }
 0x4a9   : > { %v6488_v59 = vadd.f32 %v6487_v1, %v6486_v61  ;;  %v6507_v61 = vsel %vm680_vm7, %v6453_v49, 0.0  ;;  %v6456_v1 = vmul.f32 %v10931_v8, %v10931_v8 }
 0x4ab   : > { %v6490_v60 = vadd.f32 %v6489_v34, %v6488_v59  ;;  %v6509_v59 = vsel %vm680_vm7, %v6454_v0, 0.0  ;;  %v6457_v34 = vmul.f32 %v10933_v18, %v10933_v18 }
 0x4ad   : > { %v6492_v36 = vadd.f32 %v6491_v17, %v6490_v60  ;;  %v6511_v60 = vsel %vm680_vm7, %v6455_v42, 0.0  ;;  %v6458_v17 = vmul.f32 %v10935_v41, %v10935_v41 }
 0x4af   : > { %v6494_v12 = vadd.f32 %v6493_v21, %v6492_v36  ;;  %v6513_v36 = vsel %vm680_vm7, %v6456_v1, 0.0  ;;  %v6459_v21 = vmul.f32 %v10937_v19, %v10937_v19 }
 0x4b1   : > { %v6496_v37 = vadd.f32 %v6495_v28, %v6494_v12  ;;  %v6515_v12 = vsel %vm680_vm7, %v6457_v34, 0.0  ;;  %v6460_v28 = vmul.f32 %v10939_v43, %v10939_v43 }
 0x4b3   : > { %v6498_v22 = vadd.f32 %v6497_v15, %v6496_v37  ;;  %v6517_v37 = vsel %vm680_vm7, %v6458_v17, 0.0  ;;  %v6461_v15 = vmul.f32 %v10941_v47, %v10941_v47 }
 0x4b5   : > { %v6500_v31 = vadd.f32 %v6499_v44, %v6498_v22  ;;  %v6519_v22 = vsel %vm680_vm7, %v6459_v21, 0.0  ;;  %v6521_v44 = vsel %vm680_vm7, %v6460_v28, 0.0  ;;  %v6523_v6 = vsel %vm680_vm7, %v6461_v15, 0.0 }
 0x4b7   : > { %v6502_v7 = vadd.f32 %v6501_v39, %v6500_v31 }
 0x4b9   : > { %v6504_v24 = vadd.f32 %v6503_v51, %v6502_v7 }
 0x4bb   : > { %v6506_v20 = vadd.f32 %v6505_v26, %v6504_v24 }
 0x4bd   : > { %v6508_v50 = vadd.f32 %v6507_v61, %v6506_v20 }
 0x4bf   : > { %v6510_v3 = vadd.f32 %v6509_v59, %v6508_v50  ;;  %v11073_v50 = vld [vmem:[%s11339_s7] ss:$0 sm:$0xff] }
 0x4c1   : > { %v6512_v25 = vadd.f32 %v6511_v60, %v6510_v3  ;;  %v11082_v60 = vld [vmem:[%s11340_s8] ss:$0 sm:$0xff] }
 0x4c3   : > { %v6514_v53 = vadd.f32 %v6513_v36, %v6512_v25 }
 0x4c5   : > { %v6516_v16 = vadd.f32 %v6515_v12, %v6514_v53 }
 0x4c7   : > { %v6518_v38 = vadd.f32 %v6517_v37, %v6516_v16 }
 0x4c9   : > { %v6520_v56 = vadd.f32 %v6519_v22, %v6518_v38 }
 0x4cb   : > { %v6522_v31 = vadd.f32 %v6521_v44, %v6520_v56 }
 0x4cd   : > { %v6524_v39 = vadd.f32 %v6523_v6, %v6522_v31 }
 0x4cf   : > { %v6525_v7 = vrot.slane %v6524_v39, 4 }
 0x4d1   : > { %v6526_v49 = vadd.f32 %v6525_v7, %v6524_v39 }
 0x4d3   : > { %v6527_v51 = vrot.slane %v6526_v49, 2 }
 0x4d5   : > { %v6528_v24 = vadd.f32 %v6527_v51, %v6526_v49 }
 0x4d7   : > { %v6529_v0 = vrot.slane %v6528_v24, 1 }
 0x4d9   : > { %v6530_v26 = vadd.f32 %v6529_v0, %v6528_v24 }
 0x4db   : > { %v6531_v20 = vmul.f32 0.00390625, %v6530_v26 }
 0x4dd   : > { %v6532_v42 = vadd.f32 1e-05, %v6531_v20 }
 0x4df   : > { %8181 = vrsqrt.f32 %v6532_v42 }
 0x4e9   : > { %v8182_v61 = vpop.eup %8181 }
 0x4ea   : > { %v6563_v1 = vmul.f32 %v8182_v61, %v10937_v19  ;;  %v6534_v59 = vmul.f32 %v8182_v61, %v10944_v35  ;;  %v6535_v3 = vmul.f32 %v8182_v61, %v10947_v10  ;;  %v6536_v34 = vmul.f32 %v8182_v61, %v10950_v57 }
 0x4eb   : > { %v6537_v25 = vmul.f32 %v8182_v61, %v10953_v32  ;;  %v6538_v17 = vmul.f32 %v8182_v61, %v10960_v5  ;;  %v6539_v36 = vmul.f32 %v8182_v61, %v10965_v63  ;;  %v6540_v53 = vmul.f32 %v8182_v61, %v10972_v52 }
 0x4ec   : > { %v6601_v19 = vmul.f32 %v11073_v50, %v6563_v1  ;;  %v6541_v35 = vmul.f32 %v8182_v61, %v10978_v2  ;;  %v6542_v10 = vmul.f32 %v8182_v61, %v10984_v48  ;;  %v6543_v57 = vmul.f32 %v8182_v61, %v10887_v27 }
 0x4ed   : > { %v6544_v21 = vmul.f32 %v8182_v61, %v10993_v23  ;;  %v6545_v32 = vmul.f32 %v8182_v61, %v10890_v13  ;;  %v6546_v5 = vmul.f32 %v8182_v61, %v10893_v58  ;;  %v6547_v63 = vmul.f32 %v8182_v61, %v10896_v9 }
 0x4ee   : > { %v6639_v52 = vadd.f32 %v11082_v60, %v6601_v19  ;;  %v6548_v12 = vmul.f32 %v8182_v61, %v10899_v4  ;;  %v6549_v16 = vmul.f32 %v8182_v61, %v10902_v62  ;;  %v6550_v2 = vmul.f32 %v8182_v61, %v10905_v46 }
 0x4ef   : > { %v6551_v48 = vmul.f32 %v8182_v61, %v10908_v11  ;;  %v6552_v27 = vmul.f32 %v8182_v61, %v10911_v40  ;;  %v6553_v23 = vmul.f32 %v8182_v61, %v10914_v33  ;;  %v6554_v13 = vmul.f32 %v8182_v61, %v10917_v45 }
 0x4f0   : > { %v6671_v28 = vmax.f32 %v6639_v52, 0.0  ;;  %v6555_v58 = vmul.f32 %v8182_v61, %v10919_v14  ;;  %v6556_v9 = vmul.f32 %v8182_v61, %v10922_v29  ;;  %v6557_v37 = vmul.f32 %v8182_v61, %v10925_v54 }
 0x4f1   : > { %v6558_v4 = vmul.f32 %v8182_v61, %v10927_v55  ;;  %v6559_v62 = vmul.f32 %v8182_v61, %v10929_v30  ;;  %v6560_v46 = vmul.f32 %v8182_v61, %v10931_v8  ;;  %v6561_v11 = vmul.f32 %v8182_v61, %v10933_v18 }
 0x4f2   : > { %6703 = vst.msk [vmem:[%s11113_s24 + $0xe8] sm:$0xff] %vm680_vm7, %v6671_v28  ;;  %v6562_v40 = vmul.f32 %v8182_v61, %v10935_v41  ;;  %v6564_v33 = vmul.f32 %v8182_v61, %v10939_v43  ;;  %v6565_v45 = vmul.f32 %v8182_v61, %v10941_v47  ;;  %v6572_v14 = vmul.f32 %v11073_v50, %v6534_v59 }
 0x4f3   : > { %v6573_v29 = vmul.f32 %v11073_v50, %v6535_v3  ;;  %v6574_v54 = vmul.f32 %v11073_v50, %v6536_v34  ;;  %v6575_v55 = vmul.f32 %v11073_v50, %v6537_v25  ;;  %v6576_v30 = vmul.f32 %v11073_v50, %v6538_v17 }
 0x4f4   : > { %v6577_v8 = vmul.f32 %v11073_v50, %v6539_v36  ;;  %v6578_v18 = vmul.f32 %v11073_v50, %v6540_v53  ;;  %v6579_v41 = vmul.f32 %v11073_v50, %v6541_v35  ;;  %v6580_v43 = vmul.f32 %v11073_v50, %v6542_v10 }
 0x4f5   : > { %v6581_v47 = vmul.f32 %v11073_v50, %v6543_v57  ;;  %v6582_v38 = vmul.f32 %v11073_v50, %v6544_v21  ;;  %v6583_v15 = vmul.f32 %v11073_v50, %v6545_v32  ;;  %v6584_v22 = vmul.f32 %v11073_v50, %v6546_v5 }
 0x4f6   : > { %v6585_v56 = vmul.f32 %v11073_v50, %v6547_v63  ;;  %v6586_v44 = vmul.f32 %v11073_v50, %v6548_v12  ;;  %v6587_v31 = vmul.f32 %v11073_v50, %v6549_v16  ;;  %v6588_v6 = vmul.f32 %v11073_v50, %v6550_v2 }
 0x4f7   : > { %v6589_v39 = vmul.f32 %v11073_v50, %v6551_v48  ;;  %v6590_v7 = vmul.f32 %v11073_v50, %v6552_v27  ;;  %v6591_v49 = vmul.f32 %v11073_v50, %v6553_v23  ;;  %v6592_v51 = vmul.f32 %v11073_v50, %v6554_v13 }
 0x4f8   : > { %v6593_v24 = vmul.f32 %v11073_v50, %v6555_v58  ;;  %v6594_v0 = vmul.f32 %v11073_v50, %v6556_v9  ;;  %v6595_v26 = vmul.f32 %v11073_v50, %v6557_v37  ;;  %v6596_v20 = vmul.f32 %v11073_v50, %v6558_v4 }
 0x4f9   : > { %v6597_v42 = vmul.f32 %v11073_v50, %v6559_v62  ;;  %v6598_v61 = vmul.f32 %v11073_v50, %v6560_v46  ;;  %v6599_v1 = vmul.f32 %v11073_v50, %v6561_v11  ;;  %v6600_v59 = vmul.f32 %v11073_v50, %v6562_v40 }
 0x4fa   : > { %v6602_v3 = vmul.f32 %v11073_v50, %v6564_v33  ;;  %v6603_v34 = vmul.f32 %v11073_v50, %v6565_v45  ;;  %v6610_v25 = vadd.f32 %v11082_v60, %v6572_v14  ;;  %v6611_v17 = vadd.f32 %v11082_v60, %v6573_v29 }
 0x4fb   : > { %v6612_v36 = vadd.f32 %v11082_v60, %v6574_v54  ;;  %v6613_v53 = vadd.f32 %v11082_v60, %v6575_v55  ;;  %v6614_v19 = vadd.f32 %v11082_v60, %v6576_v30  ;;  %v6615_v35 = vadd.f32 %v11082_v60, %v6577_v8 }
 0x4fc   : > { %v6616_v10 = vadd.f32 %v11082_v60, %v6578_v18  ;;  %v6617_v57 = vadd.f32 %v11082_v60, %v6579_v41  ;;  %v6618_v21 = vadd.f32 %v11082_v60, %v6580_v43  ;;  %v6619_v50 = vadd.f32 %v11082_v60, %v6581_v47 }
 0x4fd   : > { %v6620_v32 = vadd.f32 %v11082_v60, %v6582_v38  ;;  %v6621_v5 = vadd.f32 %v11082_v60, %v6583_v15  ;;  %v6622_v63 = vadd.f32 %v11082_v60, %v6584_v22  ;;  %v6623_v52 = vadd.f32 %v11082_v60, %v6585_v56 }
 0x4fe   : > { %v6624_v12 = vadd.f32 %v11082_v60, %v6586_v44  ;;  %v6625_v16 = vadd.f32 %v11082_v60, %v6587_v31  ;;  %v6626_v2 = vadd.f32 %v11082_v60, %v6588_v6  ;;  %v6627_v48 = vadd.f32 %v11082_v60, %v6589_v39 }
 0x4ff   : > { %v6628_v27 = vadd.f32 %v11082_v60, %v6590_v7  ;;  %v11171_v23 = vadd.f32 %v11082_v60, %v6591_v49  ;;  %v11174_v13 = vadd.f32 %v11082_v60, %v6592_v51  ;;  %v11177_v28 = vadd.f32 %v11082_v60, %v6593_v24 }
 0x500   : > { %v11180_v58 = vadd.f32 %v11082_v60, %v6594_v0  ;;  %v11183_v9 = vadd.f32 %v11082_v60, %v6595_v26  ;;  %v11186_v37 = vadd.f32 %v11082_v60, %v6596_v20  ;;  %v11189_v4 = vadd.f32 %v11082_v60, %v6597_v42 }
 0x501   : > { %v11192_v62 = vadd.f32 %v11082_v60, %v6598_v61  ;;  %v11195_v46 = vadd.f32 %v11082_v60, %v6599_v1  ;;  %v11198_v11 = vadd.f32 %v11082_v60, %v6600_v59  ;;  %v11201_v40 = vadd.f32 %v11082_v60, %v6602_v3 }
 0x502   : > { %v11204_v33 = vadd.f32 %v11082_v60, %v6603_v34  ;;  %v6642_v45 = vmax.f32 %v6610_v25, 0.0  ;;  %v6643_v14 = vmax.f32 %v6611_v17, 0.0  ;;  %v6644_v29 = vmax.f32 %v6612_v36, 0.0 }
 0x503   : > { %v6645_v54 = vmax.f32 %v6613_v53, 0.0  ;;  %v6646_v55 = vmax.f32 %v6614_v19, 0.0  ;;  %v6647_v30 = vmax.f32 %v6615_v35, 0.0  ;;  %v6648_v8 = vmax.f32 %v6616_v10, 0.0 }
 0x504   : > { %v6649_v18 = vmax.f32 %v6617_v57, 0.0  ;;  %v6650_v41 = vmax.f32 %v6618_v21, 0.0  ;;  %v6651_v43 = vmax.f32 %v6619_v50, 0.0  ;;  %v6652_v47 = vmax.f32 %v6620_v32, 0.0  ;;  %6674 = vst.msk [vmem:[%s11113_s24] sm:$0xff] %vm680_vm7, %v6642_v45  ;;  %6675 = vst.msk [vmem:[%s11113_s24 + $0x8] sm:$0xff] %vm680_vm7, %v6643_v14 }
 0x505   : > { %6676 = vst.msk [vmem:[%s11113_s24 + $0x10] sm:$0xff] %vm680_vm7, %v6644_v29  ;;  %v6653_v60 = vmax.f32 %v6621_v5, 0.0  ;;  %v6654_v38 = vmax.f32 %v6622_v63, 0.0  ;;  %v6655_v15 = vmax.f32 %v6623_v52, 0.0  ;;  %v6656_v22 = vmax.f32 %v6624_v12, 0.0  ;;  %6677 = vst.msk [vmem:[%s11113_s24 + $0x18] sm:$0xff] %vm680_vm7, %v6645_v54 }
 0x506   : > { %6678 = vst.msk [vmem:[%s11113_s24 + $0x20] sm:$0xff] %vm680_vm7, %v6646_v55  ;;  %6679 = vst.msk [vmem:[%s11113_s24 + $0x28] sm:$0xff] %vm680_vm7, %v6647_v30  ;;  %v6657_v56 = vmax.f32 %v6625_v16, 0.0  ;;  %v6658_v44 = vmax.f32 %v6626_v2, 0.0  ;;  %v6659_v31 = vmax.f32 %v6627_v48, 0.0  ;;  %v6660_v6 = vmax.f32 %v6628_v27, 0.0 }
 0x507   : > { %6680 = vst.msk [vmem:[%s11113_s24 + $0x30] sm:$0xff] %vm680_vm7, %v6648_v8  ;;  %6681 = vst.msk [vmem:[%s11113_s24 + $0x38] sm:$0xff] %vm680_vm7, %v6649_v18  ;;  %v6661_v39 = vmax.f32 %v11171_v23, 0.0  ;;  %v6662_v7 = vmax.f32 %v11174_v13, 0.0  ;;  %v6663_v49 = vmax.f32 %v11177_v28, 0.0  ;;  %v6664_v51 = vmax.f32 %v11180_v58, 0.0 }
 0x508   : > { %6682 = vst.msk [vmem:[%s11113_s24 + $0x40] sm:$0xff] %vm680_vm7, %v6650_v41  ;;  %6683 = vst.msk [vmem:[%s11113_s24 + $0x48] sm:$0xff] %vm680_vm7, %v6651_v43  ;;  %v6665_v24 = vmax.f32 %v11183_v9, 0.0  ;;  %v6666_v0 = vmax.f32 %v11186_v37, 0.0  ;;  %v6667_v26 = vmax.f32 %v11189_v4, 0.0  ;;  %v6668_v20 = vmax.f32 %v11192_v62, 0.0 }
 0x509   : > { %6684 = vst.msk [vmem:[%s11113_s24 + $0x50] sm:$0xff] %vm680_vm7, %v6652_v47  ;;  %6685 = vst.msk [vmem:[%s11113_s24 + $0x58] sm:$0xff] %vm680_vm7, %v6653_v60  ;;  %v6669_v42 = vmax.f32 %v11195_v46, 0.0  ;;  %v6670_v61 = vmax.f32 %v11198_v11, 0.0  ;;  %v6672_v1 = vmax.f32 %v11201_v40, 0.0  ;;  %v6673_v59 = vmax.f32 %v11204_v33, 0.0 }
 0x50a   : > { %6686 = vst.msk [vmem:[%s11113_s24 + $0x60] sm:$0xff] %vm680_vm7, %v6654_v38  ;;  %6687 = vst.msk [vmem:[%s11113_s24 + $0x68] sm:$0xff] %vm680_vm7, %v6655_v15 }
 0x50b   : > { %6688 = vst.msk [vmem:[%s11113_s24 + $0x70] sm:$0xff] %vm680_vm7, %v6656_v22  ;;  %6689 = vst.msk [vmem:[%s11113_s24 + $0x78] sm:$0xff] %vm680_vm7, %v6657_v56 }
 0x50c   : > { %6690 = vst.msk [vmem:[%s11113_s24 + $0x80] sm:$0xff] %vm680_vm7, %v6658_v44  ;;  %6691 = vst.msk [vmem:[%s11113_s24 + $0x88] sm:$0xff] %vm680_vm7, %v6659_v31 }
 0x50d   : > { %6692 = vst.msk [vmem:[%s11113_s24 + $0x90] sm:$0xff] %vm680_vm7, %v6660_v6  ;;  %6693 = vst.msk [vmem:[%s11113_s24 + $0x98] sm:$0xff] %vm680_vm7, %v6661_v39 }
 0x50e   : > { %6694 = vst.msk [vmem:[%s11113_s24 + $0xa0] sm:$0xff] %vm680_vm7, %v6662_v7  ;;  %6695 = vst.msk [vmem:[%s11113_s24 + $0xa8] sm:$0xff] %vm680_vm7, %v6663_v49 }
 0x50f   : > { %6696 = vst.msk [vmem:[%s11113_s24 + $0xb0] sm:$0xff] %vm680_vm7, %v6664_v51  ;;  %6697 = vst.msk [vmem:[%s11113_s24 + $0xb8] sm:$0xff] %vm680_vm7, %v6665_v24 }
 0x510   : > { %6698 = vst.msk [vmem:[%s11113_s24 + $0xc0] sm:$0xff] %vm680_vm7, %v6666_v0  ;;  %6699 = vst.msk [vmem:[%s11113_s24 + $0xc8] sm:$0xff] %vm680_vm7, %v6667_v26 }
 0x511   : > { %6700 = vst.msk [vmem:[%s11113_s24 + $0xd0] sm:$0xff] %vm680_vm7, %v6668_v20  ;;  %6701 = vst.msk [vmem:[%s11113_s24 + $0xd8] sm:$0xff] %vm680_vm7, %v6669_v42 }
 0x512   : > { %6702 = vst.msk [vmem:[%s11113_s24 + $0xe0] sm:$0xff] %vm680_vm7, %v6670_v61  ;;  %6704 = vst.msk [vmem:[%s11113_s24 + $0xf0] sm:$0xff] %vm680_vm7, %v6672_v1 }
 0x513   : > { %6705 = vst.msk [vmem:[%s11113_s24 + $0xf8] sm:$0xff] %vm680_vm7, %v6673_v59 }
 0x514   : > { %8245 = shalt.err (!%p8242_p3)
}
 0x515   : > { %s8246_s15 = scalar_lea.hbm %s11257_s28, 4096  ;;  %s8250_s23 = scalar_lea.hbm %s11341_s9, 8192 }
 0x516   : > { %p8247_p4 = scmp.ne.s32.totalorder %s11257_s28, %s8246_s15  ;;  %p8251_p9 = scmp.lt.u32.totalorder %s11257_s28, %s11341_s9 }
 0x517   : > { %p8252_p10 = scmp.lt.u32.totalorder %s8250_s23, %s8246_s15  ;;  %p8254_p12 = scmp.lt.u32.totalorder %s8246_s15, %s11257_s28 }
 0x518   : > { %p8248_p7 = pnand %p8247_p4, %p8388_p5 }
 0x519   : > { %p8253_p11 = por %p8252_p10, %p8251_p9 }
 0x51a   : > { %p8249_p8 = pneg %p8248_p7 }
 0x51b   : > { %p8255_p13 = por %p8254_p12, %p8253_p11 }
 0x51d   : > { %p8256_p0 = pnand %p8255_p13, %p8249_p8 }
 0x51f   : > { %8259 = shalt.err (!%p8256_p0)
}
 0x520   : > { %s8298_s6 = smov 128   ;;  %s8299_s27 = smov 8  }
 0x521   : > { %8053 = dma.vmem_to_hbm [thread:$0]  (%p8388_p5), %s11259_s26, 4096, %s11257_s28, %s11291_s2, %s8298_s6, %s8298_s6, %s8299_s27  }
 0x522 PF: > { %p8059_p1 = scmp.ge.s32.totalorder %s8294_s11, 2  ;;  %s6735_s12 = sand.u32 1, %s8282_s29  }
 0x523   : > { %s6736_s14 = scalar_lea.sflag [#allocation4], %s6735_s12 }
 0x524   : > { %p8056_p2 = pnand %p8059_p1, %p8392_p6 }
 0x526   : > { %8277 = dma.done.wait (!%p8056_p2), %s6736_s14, 4096  }
 0x527   : > { %8279 = vsyncadd (!%p8056_p2), %s6736_s14, 4294963200  ;;  %p19_p3 = scmp.ge.s32.totalorder %s8375_s13, 4   ;;  %s11472_s29 = smov %s8286_s30 }
 0x528   : > { %s11473_s30 = smov %s8290_s10  ;;  %s11474_s10 = smov %s8386_s16 }
 0x529   : > { %s11475_s11 = smov %s8375_s13  ;;  %21 = sbr.rel (!%p19_p3) target bundleno = 3 (0x3), region = 94 }
 0x530   :  { %6741 = vsyncpa [#allocation4], 1 }
 0x531   :  { %6743 = vsyncpa [#allocation4 + $0x1], 1 }

</bundles_post_ra>
